<compile_context>
chip_gen: v7x
topology: tpu7x:2x2x1
jax: 0.10.0
libtpu: 0.0.40
codegen_flags: <defaults>
</compile_context>

<pallas_src>
import jax
import jax.numpy as jnp
from jax.experimental import pallas as pl
from jax.experimental.pallas import tpu as pltpu

M = 1            # batch rows of x1
K = 1024         # in_features
N = 20000        # out_features
TN = 2560        # output-feature tile (128-aligned)
N_TILES = pl.cdiv(N, TN)      # 8 grid steps (last block ragged: 2080 valid cols)
NB = N_TILES * TN             # bias padded length (20480) -- bias only, resident


def linear_bias_relu_kernel(x_ref, w_ref, b_ref, o_ref):
    # x_ref: (M, K) f32 resident; w_ref: (K, TN) bf16 streamed tile;
    # b_ref: (1, NB) f32 resident; o_ref: (M, TN) f32.
    j = pl.program_id(0)
    x_bf = x_ref[...].astype(jnp.bfloat16)                 # tiny (1, K) cast
    acc = jnp.dot(x_bf, w_ref[...], preferred_element_type=jnp.float32)
    col0 = pl.multiple_of(j * TN, 128)
    bias = b_ref[:, pl.ds(col0, TN)]                       # slice resident bias
    o_ref[...] = jnp.maximum(acc + bias, 0.0).astype(o_ref.dtype)


def prepare_params(w_kn, b):
    """One-time parameter prep (NOT in the per-call path):
      * weight -> bf16 (halves the HBM stream; kernel accumulates in f32)
      * fold +2.5e-7 into the bias (v1 - (-2.5e-7) == v1 + 2.5e-7)
      * pad bias to a TN multiple so the resident bias can be sliced with a
        static-size pl.ds at every grid step (pad is never streamed)."""
    w_bf16 = w_kn.astype(jnp.bfloat16)
    b_eff = b.astype(jnp.float32) + jnp.float32(2.5e-07)
    b_pad = jnp.pad(b_eff, (0, NB - N)).reshape(1, NB)
    return w_bf16, b_pad


@jax.jit
def linear_sub_relu(x, w_bf16, b_pad):
    """x: (M, K) f32; w_bf16: (K, N) bf16; b_pad: (1, NB) f32."""
    cost = pl.CostEstimate(
        flops=2 * M * K * N,
        transcendentals=0,
        bytes_accessed=2 * K * N + 4 * (NB + M * K + M * N),
    )
    return pl.pallas_call(
        linear_bias_relu_kernel,
        out_shape=jax.ShapeDtypeStruct((M, N), jnp.float32),
        grid_spec=pltpu.PrefetchScalarGridSpec(
            num_scalar_prefetch=0,
            grid=(N_TILES,),
            in_specs=[
                pl.BlockSpec((M, K), lambda j: (0, 0)),    # x: resident
                pl.BlockSpec((K, TN), lambda j: (0, j)),   # W tile: streamed
                pl.BlockSpec((1, NB), lambda j: (0, 0)),   # bias: resident
            ],
            out_specs=pl.BlockSpec((M, TN), lambda j: (0, j)),
        ),
        compiler_params=pltpu.CompilerParams(
            dimension_semantics=("parallel",),
            # ~10 MiB double-buffered bf16 W + resident bias/x/out: leave
            # headroom but stay well under v7x's 64 MiB physical VMEM.
            vmem_limit_bytes=32 << 20,
        ),
        cost_estimate=cost,
    )(x, w_bf16, b_pad)


def reference(x, w_kn, b):
    # True f32 reference (HIGHEST precision so the TPU MXU doesn't truncate).
    v1 = jnp.dot(x, w_kn, precision=jax.lax.Precision.HIGHEST) + b
    return jnp.maximum(v1 + jnp.float32(2.5e-07), 0.0)


if __name__ == "__main__":
    key = jax.random.PRNGKey(0)
    kx, kw, kb = jax.random.split(key, 3)

    # Deterministic parameter init (torch.nn.Linear shapes: weight (20000,1024),
    # bias (20000,)).  Stored transposed as (K, N) so the kernel does x @ W.
    bound = 1.0 / jnp.sqrt(jnp.float32(K))
    w_kn = jax.random.uniform(kw, (K, N), jnp.float32, -bound, bound)
    b = jax.random.uniform(kb, (N,), jnp.float32, -bound, bound)
    x1 = jax.random.normal(kx, (M, K), jnp.float32)

    # One-time prep (bf16 cast + bias fold/pad) — not in the per-call path.
    w_bf16, b_pad = prepare_params(w_kn, b)
    w_bf16, b_pad = jax.block_until_ready((w_bf16, b_pad))

    out = linear_sub_relu(x1, w_bf16, b_pad)
    out = jax.block_until_ready(out)

    ref = reference(x1, w_kn, b)
    assert out.shape == (M, N)
    # bf16 weight storage: expected worst-case abs error vs f32 reference is a
    # few 1e-3 (values are O(1)); 2e-2 gives comfortable margin.
    max_err = float(jnp.max(jnp.abs(out - ref)))
    assert max_err < 2e-2, f"max abs err {max_err}"
    print("KERNEL_OK")
</pallas_src>

<mosaic_0001>
module attributes {stable_mosaic.version = 11 : i64} {
  func.func @linear_bias_relu_kernel(%arg0: i32, %arg1: memref<1x1024xf32, #tpu.memory_space<vmem>>, %arg2: memref<1024x2560xbf16, #tpu.memory_space<vmem>>, %arg3: memref<1x20480xf32, #tpu.memory_space<vmem>>, %arg4: memref<1x2560xf32, #tpu.memory_space<vmem>>) attributes {dimension_semantics = [#tpu.dimension_semantics<parallel>], iteration_bounds = array<i64: 8>, scalar_prefetch = 0 : i64, scratch_operands = 0 : i64, tpu.core_type = #tpu.core_type<tc>, window_params = [{pipeline_mode = #tpu.pipeline_mode<synchronous>, transform_indices = @transform_0, window_bounds = array<i64: 1, 1024>}, {transform_indices = @transform_1, window_bounds = array<i64: 1024, 2560>}, {pipeline_mode = #tpu.pipeline_mode<synchronous>, transform_indices = @transform_2, window_bounds = array<i64: 1, 20480>}, {transform_indices = @transform_3, window_bounds = array<i64: 1, 2560>}]} {
    %c0 = arith.constant 0 : index
    %c0_0 = arith.constant 0 : index
    %0 = vector.load %arg1[%c0, %c0_0] : memref<1x1024xf32, #tpu.memory_space<vmem>>, vector<1x1024xf32>
    %1 = arith.truncf %0 : vector<1x1024xf32> to vector<1x1024xbf16>
    %c0_1 = arith.constant 0 : index
    %c0_2 = arith.constant 0 : index
    %2 = vector.load %arg2[%c0_1, %c0_2] : memref<1024x2560xbf16, #tpu.memory_space<vmem>>, vector<1024x2560xbf16>
    %cst = arith.constant dense<0.000000e+00> : vector<1x2560xf32>
    %3 = tpu.matmul %1, %2, %cst {dimension_numbers = #tpu.dot_dimension_numbers<[1], [0], [0], [1], [0, 0, 1, 1], [], []>} : vector<1x1024xbf16>, vector<1024x2560xbf16>, vector<1x2560xf32> -> vector<1x2560xf32>
    %c2560_i32 = arith.constant 2560 : i32
    %4 = arith.muli %arg0, %c2560_i32 : i32
    %5 = tpu.assume_multiple %4, 128 : i32
    %c0_3 = arith.constant 0 : index
    %6 = arith.index_cast %5 : i32 to index
    %7 = vector.load %arg3[%c0_3, %6] : memref<1x20480xf32, #tpu.memory_space<vmem>>, vector<1x2560xf32>
    %8 = arith.addf %3, %7 : vector<1x2560xf32>
    %cst_4 = arith.constant 0.000000e+00 : f32
    %9 = vector.broadcast %cst_4 : f32 to vector<1x2560xf32>
    %10 = arith.maximumf %8, %9 : vector<1x2560xf32>
    %c0_5 = arith.constant 0 : index
    %c0_6 = arith.constant 0 : index
    %11 = vector.load %arg4[%c0_5, %c0_6] : memref<1x2560xf32, #tpu.memory_space<vmem>>, vector<1x2560xf32>
    tpu.vector_store %arg4[%c0_5, %c0_6], %10 {strides = array<i32>} : memref<1x2560xf32, #tpu.memory_space<vmem>>, vector<1x2560xf32>,
    return
  }
  func.func @transform_0(%arg0: i32) -> (i32, i32) {
    %c0_i32 = arith.constant 0 : i32
    %c0_i32_0 = arith.constant 0 : i32
    %c0_i32_1 = arith.constant 0 : i32
    return %c0_i32, %c0_i32_0 : i32, i32
  }
  func.func @transform_1(%arg0: i32) -> (i32, i32) {
    %c0_i32 = arith.constant 0 : i32
    %c0_i32_0 = arith.constant 0 : i32
    return %c0_i32, %arg0 : i32, i32
  }
  func.func @transform_2(%arg0: i32) -> (i32, i32) {
    %c0_i32 = arith.constant 0 : i32
    %c0_i32_0 = arith.constant 0 : i32
    %c0_i32_1 = arith.constant 0 : i32
    return %c0_i32, %c0_i32_0 : i32, i32
  }
  func.func @transform_3(%arg0: i32) -> (i32, i32) {
    %c0_i32 = arith.constant 0 : i32
    %c0_i32_0 = arith.constant 0 : i32
    return %c0_i32, %arg0 : i32, i32
  }
}

</mosaic_0001>

<bundles_post_ra>
// kernel: linear_sub_relu.1
= control target key start
LH: loop header
LB: loop body
LE: loop exit
PB: predicated region body
PF: predicated region fallthrough
CT: control target
= control target key end

     0   :  { %8 = vsyncpa [#allocation3], 0  ;;  %s15138_s0 = inlined_call_operand.vmem [shape: f32[1,1024], index: 0, kind: input, shape index: {}]   ;;  %s15139_s1 = inlined_call_operand.hbm [shape: bf16[1024,20000], index: 1, kind: input, shape index: {}]   ;;  %s15140_s2 = inlined_call_operand.vmem [shape: f32[1,20480], index: 2, kind: input, shape index: {}]   ;;  %s15141_s3 = inlined_call_operand.hbm [shape: f32[1,20000], index: 3, kind: output, shape index: {}]  }
   0x1   :  { %10 = vsyncpa [#allocation3 + $0x1], 0 }
   0x2   :  { %11 = vsyncpa [#allocation4], 0 }
   0x3   :  { %13 = vsyncpa [#allocation4 + $0x1], 0  ;;  %s13477_s12 = smov 0   ;;  %s13479_s13 = smov 0  }
   0x4   :  { %s13481_s14 = smov 0   ;;  %s13483_s15 = smov 0  }
   0x5 LB: > { %s13498_s16 = sadd.s32 4294967295, %s13450_s15   ;;  %s9949_s17 = sadd.s32 4294967294, %s13450_s15   ;;  %s13450_s15 = sphi %s13483_s15, %s15149_s15   ;;  %s13446_s14 = sphi %s13481_s14, %s15148_s14   ;;  %s13442_s13 = sphi %s13479_s13, %s15147_s13   ;;  %s13438_s12 = sphi %s13477_s12, %s15146_s12  }
   0x6   : > { %s13502_s18 = sadd.s32 1, %s13450_s15   ;;  %s47_s19 = sadd.s32 1, %s13446_s14 }
   0x7   : > { %s44_s20 = ssub.s32 %s13450_s15, %s13502_s18  ;;  %p54_p0 = scmp.ne.s32.totalorder %s13446_s14, %s13442_s13 }
   0x8   : > { %p45_p1 = scmp.eq.s32.totalorder %s44_s20, 0  ;;  %p55_p2 = scmp.eq.s32.totalorder %s13450_s15, 0 }
   0x9   : > { %p60_p3 = scmp.ne.s32.totalorder %s13442_s13, %s13438_s12  ;;  %p61_p4 = scmp.eq.s32.totalorder %s13498_s16, 0 }
   0xa   : > { %s13514_s21 = scalar_select %p45_p1, %s13446_s14, %s47_s19  }
   0xb   : > { %p56_p5 = por %p55_p2, %p54_p0  ;;  %p13516_p6 = por %p61_p4, %p60_p3 }
   0xc   : > { %p105_p7 = scmp.eq.s32.totalorder %s13498_s16, 7  ;;  %p111_p8 = scmp.eq.s32.totalorder %s9949_s17, 7 }
   0xd   : > { %p9951_p11 = scmp.ge.s32.totalorder %s13450_s15, 8 }
   0xe   : > { %p13521_p9 = por %p105_p7, %p54_p0  ;;  %p13525_p10 = por %p111_p8, %p60_p3 }
   0xf   : > { %133 = sbr.rel (%p9951_p11) target bundleno = 57 (0x39), region = 24 }
  0x10   : > { %s15144_s24 = scalar_select %p13525_p10, 1, 0 }
  0x16   : > { %136 = sbr.rel (!%p56_p5) target bundleno = 57 (0x39), region = 28  ;;  %s137_s25 = sand.u32 (%p56_p5), 1, %s13446_s14  }
  0x17   : > { %s142_s26 = smul.u32 (%p56_p5), 20, %s13450_s15  ;;  %s13538_s4 = scalar_lea.sflag (%p56_p5), [#allocation3], %s137_s25 }
  0x18   : > { %s11388_s27 = smul.u32 (%p56_p5), 10240, %s137_s25 }
  0x19   : > { %s143_s28 = ssub.s32 (%p56_p5), 157, %s142_s26 }
  0x1a   : > { %p144_p12 = scmp.lt.s32.totalorder (%p56_p5), %s143_s28, 20  ;;  %s141_s5 = scalar_lea.vmem (%p56_p5), [#allocation2], %s11388_s27 }
  0x1d   : > { %s15151_s28 = smov (!%p144_p12, %s143_s28), 20 }
  0x1e   : > { %s13535_s29 = sshll.u32 %s15151_s28, 13 }
  0x1f   : > { %s148_s30 = ssub.s32 163840, %s13535_s29 }
  0x20   : > { %149 = vsyncadd %s13538_s4, %s148_s30  ;;  %p9953_p13 = scmp.ne.s32.totalorder %s13535_s29, 0  ;;  %s11244_s6 = smul.u32 1280, %s13450_s15 }
  0x21   : > { %s9955_s7 = sshll.u32 %s15151_s28, 2  ;;  %s155_s8 = sshll.u32 %s141_s5, 4  ;;  %s13549_s8 = int_to_ptr.vmem [resolvable:$true] %s155_s8 }
  0x22   : > { %s13547_s11 = scalar_lea.hbm %s15139_s1, %s11244_s6  ;;  %s13360_s25 = scalar_lea.hbm %s15139_s1, 1286144 }
  0x23   : > { %s13356_s17 = scalar_lea.hbm %s13547_s11, %s13535_s29  ;;  %p13361_p3 = scmp.lt.u32.totalorder %s13547_s11, %s15139_s1 }
  0x24   : > { %p13357_p0 = scmp.ne.s32.totalorder %s13547_s11, %s13356_s17  ;;  %p13362_p4 = scmp.lt.u32.totalorder %s13360_s25, %s13356_s17 }
  0x25   : > { %p13364_p7 = scmp.lt.u32.totalorder %s13356_s17, %s13547_s11 }
  0x26   : > { %p13358_p1 = pnand %p13357_p0, %p9953_p13  ;;  %p13363_p5 = por %p13362_p4, %p13361_p3 }
  0x28   : > { %p13359_p2 = pneg %p13358_p1  ;;  %p13365_p8 = por %p13364_p7, %p13363_p5 }
  0x2a   : > { %p13366_p11 = pnand %p13365_p8, %p13359_p2 }
  0x2c   : > { %13369 = shalt.err (!%p13366_p11)
}
  0x2d   : > { %s13370_s30 = scalar_lea.vmem %s13549_s8, %s13535_s29  ;;  %s13452_s5 = smov [#allocation2]  }
  0x2e   : > { %p13371_p12 = scmp.ne.s32.totalorder %s13549_s8, %s13370_s30  ;;  %s13374_s6 = sshll.u32 %s13452_s5, 4  ;;  %s13375_s6 = int_to_ptr.vmem [resolvable:$false] %s13374_s6 }
  0x2f   : > { %s13376_s9 = scalar_lea.vmem %s13375_s6, 327680  ;;  %p13377_p10 = scmp.lt.s32.totalorder %s13549_s8, %s13375_s6 }
  0x30   : > { %p13372_p0 = pnand %p13371_p12, %p9953_p13  ;;  %p13378_p3 = scmp.lt.s32.totalorder %s13376_s9, %s13370_s30 }
  0x32   : > { %p13373_p1 = pneg %p13372_p0  ;;  %p13379_p4 = por %p13378_p3, %p13377_p10 }
  0x34   : > { %p13380_p5 = pnand %p13379_p4, %p13373_p1 }
  0x36   : > { %13383 = shalt.err (!%p13380_p5)
}
  0x37   : > { %s13453_s10 = smov 10048   ;;  %s13454_s17 = smov 1280  }
  0x38   : > { %161 = dma.hbm_to_vmem [thread:$0]  (%p9953_p13), %s13547_s11, %s13535_s29, %s13549_s8, %s13538_s4, %s13453_s10, %s13454_s17, %s9955_s7  }
  0x39 PF: > { %p9958_p2 = scmp.ge.s32.totalorder %s13450_s15, 1  ;;  %p163_p7 = scmp.lt.s32.totalorder %s13450_s15, 9 }
  0x3b   : > { %p164_p10 = pnand %p9958_p2, %p163_p7 }
  0x3c   : > { %s13581_s19 = sand.u32 (!%p164_p10), 1, %s13442_s13  }
  0x3d   : > { %167 = sbr.rel (%p164_p10) target bundleno = 1603 (0x643), region = 32  ;;  %s170_s25 = scalar_lea.sflag (!%p164_p10), [#allocation3], %s13581_s19 }
  0x3e   : > { %s11389_s20 = smul.u32 (!%p164_p10), 10240, %s13581_s19 }
  0x40   : > { %s13585_s26 = scalar_lea.vmem (!%p164_p10), [#allocation2], %s11389_s20 }
  0x44   : > { %13429 = dma.done.wait (%p13516_p6), %s170_s25, 163840  }
  0x45   : > { %13431 = vsyncadd (%p13516_p6), %s170_s25, 4294803456  ;;  %v11433_v0 = vld [vmem:[%s13585_s26 + $0x4] ss:$80 sps:$4 sm:$0xff]   ;;  %v11435_v1 = vld [vmem:[%s13585_s26 + $0xc] ss:$80 sps:$4 sm:$0xff]   ;;  %v208_v36 = vlaneseq  ;;  %s1536_s7 = smul.u32 2560, %s13498_s16 }
  0x46   : > { %8046 = vmatprep.subr.bf16.mxu0 %v11433_v0  ;;  %v11437_v2 = vld [vmem:[%s13585_s26] ss:$80 sps:$4 sm:$0xff]   ;;  %v11438_v3 = vld [vmem:[%s13585_s26 + $0x8] ss:$80 sps:$4 sm:$0xff]   ;;  %8210 = vmatprep.subr.bf16.mxu1 %v11435_v1  ;;  %v11439_v4 = vld [vmem:[%s13585_s26 + $0xa4] ss:$80 sps:$4 sm:$0xff]  }
  0x47   : > { %8047 = vmatpush1.bf16.msra.mxu0 %v11437_v2  ;;  %8211 = vmatpush1.bf16.msra.mxu1 %v11438_v3  ;;  %v11441_v5 = vld [vmem:[%s13585_s26 + $0xac] ss:$80 sps:$4 sm:$0xff]   ;;  %v11443_v6 = vld [vmem:[%s13585_s26 + $0xa0] ss:$80 sps:$4 sm:$0xff]   ;;  %v11444_v7 = vld [vmem:[%s13585_s26 + $0xa8] ss:$80 sps:$4 sm:$0xff]  }
  0x48   : > { %8048 = vmatprep.subr.bf16.mxu0 %v11439_v4  ;;  %8212 = vmatprep.subr.bf16.mxu1 %v11441_v5  ;;  %v11445_v8 = vld [vmem:[%s13585_s26 + $0x144] ss:$80 sps:$4 sm:$0xff]   ;;  %v11447_v9 = vld [vmem:[%s13585_s26 + $0x14c] ss:$80 sps:$4 sm:$0xff]   ;;  %v11449_v10 = vld [vmem:[%s13585_s26 + $0x140] ss:$80 sps:$4 sm:$0xff]  }
  0x49   : > { %v11450_v11 = vld [vmem:[%s13585_s26 + $0x148] ss:$80 sps:$4 sm:$0xff]   ;;  %v11451_v12 = vld [vmem:[%s13585_s26 + $0x1e4] ss:$80 sps:$4 sm:$0xff]   ;;  %v11453_v13 = vld [vmem:[%s13585_s26 + $0x1ec] ss:$80 sps:$4 sm:$0xff]  }
  0x4a   : > { %v11455_v14 = vld [vmem:[%s13585_s26 + $0x1e0] ss:$80 sps:$4 sm:$0xff]   ;;  %v11456_v15 = vld [vmem:[%s13585_s26 + $0x1e8] ss:$80 sps:$4 sm:$0xff]   ;;  %v11457_v16 = vld [vmem:[%s13585_s26 + $0x284] ss:$80 sps:$4 sm:$0xff]  }
  0x4b   : > { %8049 = vmatpush1.bf16.msra.mxu0 %v11443_v6  ;;  %8213 = vmatpush1.bf16.msra.mxu1 %v11444_v7  ;;  %v11459_v17 = vld [vmem:[%s13585_s26 + $0x28c] ss:$80 sps:$4 sm:$0xff]   ;;  %v11461_v18 = vld [vmem:[%s13585_s26 + $0x280] ss:$80 sps:$4 sm:$0xff]   ;;  %v11462_v19 = vld [vmem:[%s13585_s26 + $0x288] ss:$80 sps:$4 sm:$0xff]  }
  0x4c   : > { %8050 = vmatprep.subr.bf16.mxu0 %v11445_v8  ;;  %8214 = vmatprep.subr.bf16.mxu1 %v11447_v9  ;;  %v11463_v20 = vld [vmem:[%s13585_s26 + $0x324] ss:$80 sps:$4 sm:$0xff]   ;;  %v11465_v21 = vld [vmem:[%s13585_s26 + $0x32c] ss:$80 sps:$4 sm:$0xff]   ;;  %v11467_v22 = vld [vmem:[%s13585_s26 + $0x320] ss:$80 sps:$4 sm:$0xff]  }
  0x4d   : > { %v11468_v23 = vld [vmem:[%s13585_s26 + $0x328] ss:$80 sps:$4 sm:$0xff]   ;;  %v11469_v24 = vld [vmem:[%s13585_s26 + $0x3c4] ss:$80 sps:$4 sm:$0xff]   ;;  %v11471_v25 = vld [vmem:[%s13585_s26 + $0x3cc] ss:$80 sps:$4 sm:$0xff]  }
  0x4e   : > { %v11473_v26 = vld [vmem:[%s13585_s26 + $0x3c0] ss:$80 sps:$4 sm:$0xff]   ;;  %v11474_v27 = vld [vmem:[%s13585_s26 + $0x3c8] ss:$80 sps:$4 sm:$0xff]   ;;  %v11475_v28 = vld [vmem:[%s13585_s26 + $0x464] ss:$80 sps:$4 sm:$0xff]  }
  0x4f   : > { %8051 = vmatpush1.bf16.msra.mxu0 %v11449_v10  ;;  %8215 = vmatpush1.bf16.msra.mxu1 %v11450_v11  ;;  %v11477_v29 = vld [vmem:[%s13585_s26 + $0x46c] ss:$80 sps:$4 sm:$0xff]   ;;  %v11479_v30 = vld [vmem:[%s13585_s26 + $0x460] ss:$80 sps:$4 sm:$0xff]   ;;  %v11480_v31 = vld [vmem:[%s13585_s26 + $0x468] ss:$80 sps:$4 sm:$0xff]  }
  0x50   : > { %8052 = vmatprep.subr.bf16.mxu0 %v11451_v12  ;;  %8216 = vmatprep.subr.bf16.mxu1 %v11453_v13  ;;  %v11481_v32 = vld [vmem:[%s13585_s26 + $0x504] ss:$80 sps:$4 sm:$0xff]   ;;  %v11483_v33 = vld [vmem:[%s13585_s26 + $0x50c] ss:$80 sps:$4 sm:$0xff]   ;;  %v11485_v34 = vld [vmem:[%s13585_s26 + $0x500] ss:$80 sps:$4 sm:$0xff]  }
  0x51   : > { %v11486_v35 = vld [vmem:[%s13585_s26 + $0x508] ss:$80 sps:$4 sm:$0xff]   ;;  %v11487_v37 = vld [vmem:[%s13585_s26 + $0x5a4] ss:$80 sps:$4 sm:$0xff]   ;;  %v11489_v38 = vld [vmem:[%s13585_s26 + $0x5ac] ss:$80 sps:$4 sm:$0xff]  }
  0x52   : > { %v11491_v39 = vld [vmem:[%s13585_s26 + $0x5a0] ss:$80 sps:$4 sm:$0xff]   ;;  %v13631_v40 = vshrl.u32 %v208_v36, 7  ;;  %v11492_v41 = vld [vmem:[%s13585_s26 + $0x5a8] ss:$80 sps:$4 sm:$0xff]   ;;  %s1537_s8 = sshra.s32 %s1536_s7, 7 }
  0x53   : > { %8053 = vmatpush1.bf16.msra.mxu0 %v11455_v14  ;;  %8217 = vmatpush1.bf16.msra.mxu1 %v11456_v15  ;;  %v11493_v42 = vld [vmem:[%s13585_s26 + $0x644] ss:$80 sps:$4 sm:$0xff]   ;;  %v11495_v43 = vld [vmem:[%s13585_s26 + $0x64c] ss:$80 sps:$4 sm:$0xff]   ;;  %v11497_v44 = vld [vmem:[%s13585_s26 + $0x640] ss:$80 sps:$4 sm:$0xff]   ;;  %s14160_s30 = scalar_lea.vmem %s15140_s2, %s1537_s8 }
  0x54   : > { %8054 = vmatprep.subr.bf16.mxu0 %v11457_v16  ;;  %8218 = vmatprep.subr.bf16.mxu1 %v11459_v17  ;;  %v11498_v45 = vld [vmem:[%s13585_s26 + $0x648] ss:$80 sps:$4 sm:$0xff]   ;;  %v13639_v46 = vsub.s32 1, %v13631_v40  ;;  %v11499_v47 = vld [vmem:[%s13585_s26 + $0x6e4] ss:$80 sps:$4 sm:$0xff]   ;;  %v13668_v1 = vsub.s32 0, %v13631_v40 }
  0x55   : > { %v11501_v48 = vld [vmem:[%s13585_s26 + $0x6ec] ss:$80 sps:$4 sm:$0xff]   ;;  %v13646_v49 = vld [vmem:[%s15138_s0] sm:$0xff]  ;;  %v11504_v52 = vld [vmem:[%s13585_s26 + $0x6e8] ss:$80 sps:$4 sm:$0xff]   ;;  %v13674_v5 = vsub.s32 3, %v13631_v40 }
  0x56   : > { %v11503_v50 = vld [vmem:[%s13585_s26 + $0x6e0] ss:$80 sps:$4 sm:$0xff]   ;;  %v215_v51 = vrot.slane %v13646_v49, %v13639_v46  ;;  %v11505_v53 = vld [vmem:[%s13585_s26 + $0x784] ss:$80 sps:$4 sm:$0xff]   ;;  %v11507_v54 = vld [vmem:[%s13585_s26 + $0x78c] ss:$80 sps:$4 sm:$0xff]   ;;  %v211_v7 = vrot.slane %v13646_v49, %v13668_v1 }
  0x57   : > { %8055 = vmatpush1.bf16.msra.mxu0 %v11461_v18  ;;  %8219 = vmatpush1.bf16.msra.mxu1 %v11462_v19  ;;  %v11509_v56 = vld [vmem:[%s13585_s26 + $0x780] ss:$80 sps:$4 sm:$0xff]   ;;  %v11510_v57 = vld [vmem:[%s13585_s26 + $0x788] ss:$80 sps:$4 sm:$0xff]   ;;  %v11511_v58 = vld [vmem:[%s13585_s26 + $0x824] ss:$80 sps:$4 sm:$0xff]   ;;  %v223_v11 = vrot.slane %v13646_v49, %v13674_v5 }
  0x58   : > { %8056 = vmatprep.subr.bf16.mxu0 %v11463_v20  ;;  %8220 = vmatprep.subr.bf16.mxu1 %v11465_v21  ;;  %v13654_v55 = vpack.c.bf16 %v215_v51, %v215_v51  ;;  %v11513_v59 = vld [vmem:[%s13585_s26 + $0x82c] ss:$80 sps:$4 sm:$0xff]   ;;  %v11515_v60 = vld [vmem:[%s13585_s26 + $0x820] ss:$80 sps:$4 sm:$0xff]   ;;  %v11516_v61 = vld [vmem:[%s13585_s26 + $0x828] ss:$80 sps:$4 sm:$0xff]   ;;  %v13685_v13 = vpack.c.bf16 %v211_v7, %v211_v7 }
  0x59   : > { %v11517_v62 = vld [vmem:[%s13585_s26 + $0x8c4] ss:$80 sps:$4 sm:$0xff]   ;;  %v11519_v63 = vld [vmem:[%s13585_s26 + $0x8cc] ss:$80 sps:$4 sm:$0xff]   ;;  %v11521_v0 = vld [vmem:[%s13585_s26 + $0x8c0] ss:$80 sps:$4 sm:$0xff]   ;;  %v13690_v17 = vpack.c.bf16 %v223_v11, %v223_v11 }
  0x5a   : > { %8078 = vmatprep.mubr.bf16.mxu0 %v13654_v55  ;;  %8242 = vmatprep.mubr.bf16.mxu1 %v13654_v55  ;;  %v11522_v2 = vld [vmem:[%s13585_s26 + $0x8c8] ss:$80 sps:$4 sm:$0xff]   ;;  %v11523_v3 = vld [vmem:[%s13585_s26 + $0x964] ss:$80 sps:$4 sm:$0xff]   ;;  %v11525_v4 = vld [vmem:[%s13585_s26 + $0x96c] ss:$80 sps:$4 sm:$0xff]  }
  0x5b   : > { %8057 = vmatpush1.bf16.msra.mxu0 %v11467_v22  ;;  %8221 = vmatpush1.bf16.msra.mxu1 %v11468_v23  ;;  %v11527_v6 = vld [vmem:[%s13585_s26 + $0x960] ss:$80 sps:$4 sm:$0xff]   ;;  %v11528_v8 = vld [vmem:[%s13585_s26 + $0x968] ss:$80 sps:$4 sm:$0xff]   ;;  %v11531_v9 = vld [vmem:[%s13585_s26 + $0xa04] ss:$80 sps:$4 sm:$0xff]  }
  0x5c   : > { %8058 = vmatprep.subr.bf16.mxu0 %v11469_v24  ;;  %8222 = vmatprep.subr.bf16.mxu1 %v11471_v25  ;;  %v11534_v10 = vld [vmem:[%s13585_s26 + $0xa0c] ss:$80 sps:$4 sm:$0xff]   ;;  %v11529_v12 = vld [vmem:[%s13585_s26 + $0xa00] ss:$80 sps:$4 sm:$0xff]   ;;  %v11532_v14 = vld [vmem:[%s13585_s26 + $0xa08] ss:$80 sps:$4 sm:$0xff]  }
  0x5d   : > { %v11537_v15 = vld [vmem:[%s13585_s26 + $0xaa4] ss:$80 sps:$4 sm:$0xff]   ;;  %v11540_v16 = vld [vmem:[%s13585_s26 + $0xaac] ss:$80 sps:$4 sm:$0xff]   ;;  %v11535_v18 = vld [vmem:[%s13585_s26 + $0xaa0] ss:$80 sps:$4 sm:$0xff]  }
  0x5e   : > { %v11538_v19 = vld [vmem:[%s13585_s26 + $0xaa8] ss:$80 sps:$4 sm:$0xff]   ;;  %v11543_v20 = vld [vmem:[%s13585_s26 + $0xb44] ss:$80 sps:$4 sm:$0xff]   ;;  %v11546_v21 = vld [vmem:[%s13585_s26 + $0xb4c] ss:$80 sps:$4 sm:$0xff]  }
  0x5f   : > { %8059 = vmatpush1.bf16.msra.mxu0 %v11473_v26  ;;  %8223 = vmatpush1.bf16.msra.mxu1 %v11474_v27  ;;  %v11541_v22 = vld [vmem:[%s13585_s26 + $0xb40] ss:$80 sps:$4 sm:$0xff]   ;;  %v11544_v23 = vld [vmem:[%s13585_s26 + $0xb48] ss:$80 sps:$4 sm:$0xff]   ;;  %v11549_v24 = vld [vmem:[%s13585_s26 + $0xbe4] ss:$80 sps:$4 sm:$0xff]  }
  0x60   : > { %8060 = vmatprep.subr.bf16.mxu0 %v11475_v28  ;;  %8224 = vmatprep.subr.bf16.mxu1 %v11477_v29  ;;  %v11552_v25 = vld [vmem:[%s13585_s26 + $0xbec] ss:$80 sps:$4 sm:$0xff]   ;;  %v11547_v26 = vld [vmem:[%s13585_s26 + $0xbe0] ss:$80 sps:$4 sm:$0xff]   ;;  %v11550_v27 = vld [vmem:[%s13585_s26 + $0xbe8] ss:$80 sps:$4 sm:$0xff]  }
  0x61   : > { %v11555_v28 = vld [vmem:[%s13585_s26 + $0xc84] ss:$80 sps:$4 sm:$0xff]   ;;  %v11558_v29 = vld [vmem:[%s13585_s26 + $0xc8c] ss:$80 sps:$4 sm:$0xff]   ;;  %v11580_v51 = vld [vmem:[%s13585_s26 + $0xf08] ss:$80 sps:$4 sm:$0xff]  }
  0x62   : > { %v11609_v7 = vld [vmem:[%s13585_s26 + $0x1224] ss:$80 sps:$4 sm:$0xff]   ;;  %s11390_s5 = smul.u32 20, %s13581_s19  ;;  %vm9855_vm0 = vcmp.lt.s32.totalorder %v208_v36, 512  ;;  %s9859_s9 = scalar_lea.sflag [#allocation4], %s13581_s19 }
  0x63   : > { %8061 = vmatpush1.bf16.msra.mxu0 %v11479_v30  ;;  %8225 = vmatpush1.bf16.msra.mxu1 %v11480_v31  ;;  %v11553_v30 = vld [vmem:[%s13585_s26 + $0xc80] ss:$80 sps:$4 sm:$0xff]   ;;  %v11556_v31 = vld [vmem:[%s13585_s26 + $0xc88] ss:$80 sps:$4 sm:$0xff]   ;;  %v11615_v11 = vld [vmem:[%s13585_s26 + $0x12c4] ss:$80 sps:$4 sm:$0xff]  }
  0x64   : > { %8062 = vmatprep.subr.bf16.mxu0 %v11481_v32  ;;  %8226 = vmatprep.subr.bf16.mxu1 %v11483_v33  ;;  %v11561_v32 = vld [vmem:[%s13585_s26 + $0xd24] ss:$80 sps:$4 sm:$0xff]   ;;  %v11564_v33 = vld [vmem:[%s13585_s26 + $0xd2c] ss:$80 sps:$4 sm:$0xff]   ;;  %s14481_s6 = scalar_lea.vmem [#allocation5], %s11390_s5  ;;  %s9866_s10 = smul.u32 (%p13521_p9), 20, %s13498_s16 }
  0x66   : > { %s9867_s17 = ssub.s32 (%p13521_p9), 157, %s9866_s10 }
  0x67   : > { %8063 = vmatpush1.bf16.msra.mxu0 %v11485_v34  ;;  %8227 = vmatpush1.bf16.msra.mxu1 %v11486_v35  ;;  %v11559_v34 = vld [vmem:[%s13585_s26 + $0xd20] ss:$80 sps:$4 sm:$0xff]   ;;  %v11562_v35 = vld [vmem:[%s13585_s26 + $0xd28] ss:$80 sps:$4 sm:$0xff]   ;;  %p9868_p6 = scmp.lt.s32.totalorder (%p13521_p9), %s9867_s17, 20 }
  0x68   : > { %8064 = vmatprep.subr.bf16.mxu0 %v11487_v37  ;;  %8228 = vmatprep.subr.bf16.mxu1 %v11489_v38  ;;  %v11567_v37 = vld [vmem:[%s13585_s26 + $0xdc4] ss:$80 sps:$4 sm:$0xff]   ;;  %v11570_v38 = vld [vmem:[%s13585_s26 + $0xdcc] ss:$80 sps:$4 sm:$0xff]  }
  0x6b   : > { %8065 = vmatpush1.bf16.msra.mxu0 %v11491_v39  ;;  %8229 = vmatpush1.bf16.msra.mxu1 %v11492_v41  ;;  %v11565_v39 = vld [vmem:[%s13585_s26 + $0xdc0] ss:$80 sps:$4 sm:$0xff]   ;;  %v11568_v41 = vld [vmem:[%s13585_s26 + $0xdc8] ss:$80 sps:$4 sm:$0xff]  }
  0x6c   : > { %8066 = vmatprep.subr.bf16.mxu0 %v11493_v42  ;;  %8230 = vmatprep.subr.bf16.mxu1 %v11495_v43  ;;  %v11573_v42 = vld [vmem:[%s13585_s26 + $0xe64] ss:$80 sps:$4 sm:$0xff]   ;;  %v11576_v43 = vld [vmem:[%s13585_s26 + $0xe6c] ss:$80 sps:$4 sm:$0xff]  }
  0x6f   : > { %8067 = vmatpush1.bf16.msra.mxu0 %v11497_v44  ;;  %8231 = vmatpush1.bf16.msra.mxu1 %v11498_v45  ;;  %v11571_v44 = vld [vmem:[%s13585_s26 + $0xe60] ss:$80 sps:$4 sm:$0xff]   ;;  %v11574_v45 = vld [vmem:[%s13585_s26 + $0xe68] ss:$80 sps:$4 sm:$0xff]  }
  0x70   : > { %8068 = vmatprep.subr.bf16.mxu0 %v11499_v47  ;;  %8232 = vmatprep.subr.bf16.mxu1 %v11501_v48  ;;  %v11579_v47 = vld [vmem:[%s13585_s26 + $0xf04] ss:$80 sps:$4 sm:$0xff]   ;;  %v11582_v48 = vld [vmem:[%s13585_s26 + $0xf0c] ss:$80 sps:$4 sm:$0xff]  }
  0x73   : > { %8069 = vmatpush1.bf16.msra.mxu0 %v11503_v50  ;;  %8233 = vmatpush1.bf16.msra.mxu1 %v11504_v52  ;;  %v11577_v50 = vld [vmem:[%s13585_s26 + $0xf00] ss:$80 sps:$4 sm:$0xff]   ;;  %v11585_v52 = vld [vmem:[%s13585_s26 + $0xfa4] ss:$80 sps:$4 sm:$0xff]  }
  0x74   : > { %8070 = vmatprep.subr.bf16.mxu0 %v11505_v53  ;;  %8234 = vmatprep.subr.bf16.mxu1 %v11507_v54  ;;  %v11588_v53 = vld [vmem:[%s13585_s26 + $0xfac] ss:$80 sps:$4 sm:$0xff]   ;;  %v11583_v54 = vld [vmem:[%s13585_s26 + $0xfa0] ss:$80 sps:$4 sm:$0xff]  }
  0x77   : > { %8071 = vmatpush1.bf16.msra.mxu0 %v11509_v56  ;;  %8235 = vmatpush1.bf16.msra.mxu1 %v11510_v57  ;;  %v11586_v56 = vld [vmem:[%s13585_s26 + $0xfa8] ss:$80 sps:$4 sm:$0xff]   ;;  %v11591_v57 = vld [vmem:[%s13585_s26 + $0x1044] ss:$80 sps:$4 sm:$0xff]  }
  0x78   : > { %8072 = vmatprep.subr.bf16.mxu0 %v11511_v58  ;;  %8236 = vmatprep.subr.bf16.mxu1 %v11513_v59  ;;  %v11594_v58 = vld [vmem:[%s13585_s26 + $0x104c] ss:$80 sps:$4 sm:$0xff]   ;;  %v11589_v59 = vld [vmem:[%s13585_s26 + $0x1040] ss:$80 sps:$4 sm:$0xff]  }
  0x7b   : > { %8073 = vmatpush1.bf16.msra.mxu0 %v11515_v60  ;;  %8237 = vmatpush1.bf16.msra.mxu1 %v11516_v61  ;;  %v11592_v60 = vld [vmem:[%s13585_s26 + $0x1048] ss:$80 sps:$4 sm:$0xff]   ;;  %v11597_v61 = vld [vmem:[%s13585_s26 + $0x10e4] ss:$80 sps:$4 sm:$0xff]  }
  0x7c   : > { %8074 = vmatprep.subr.bf16.mxu0 %v11517_v62  ;;  %8238 = vmatprep.subr.bf16.mxu1 %v11519_v63  ;;  %v11600_v62 = vld [vmem:[%s13585_s26 + $0x10ec] ss:$80 sps:$4 sm:$0xff]   ;;  %v11595_v63 = vld [vmem:[%s13585_s26 + $0x10e0] ss:$80 sps:$4 sm:$0xff]  }
  0x7f   : > { %8075 = vmatpush1.bf16.msra.mxu0 %v11521_v0  ;;  %8239 = vmatpush1.bf16.msra.mxu1 %v11522_v2  ;;  %v11598_v0 = vld [vmem:[%s13585_s26 + $0x10e8] ss:$80 sps:$4 sm:$0xff]   ;;  %v11603_v2 = vld [vmem:[%s13585_s26 + $0x1184] ss:$80 sps:$4 sm:$0xff]  }
  0x80   : > { %8076 = vmatprep.subr.bf16.mxu0 %v11523_v3  ;;  %8240 = vmatprep.subr.bf16.mxu1 %v11525_v4  ;;  %v11606_v3 = vld [vmem:[%s13585_s26 + $0x118c] ss:$80 sps:$4 sm:$0xff]   ;;  %v11601_v4 = vld [vmem:[%s13585_s26 + $0x1180] ss:$80 sps:$4 sm:$0xff]  }
  0x83   : > { %8077 = vmatpush1.bf16.msra.mxu0 %v11527_v6  ;;  %8241 = vmatpush1.bf16.msra.mxu1 %v11528_v8  ;;  %v11604_v6 = vld [vmem:[%s13585_s26 + $0x1188] ss:$80 sps:$4 sm:$0xff]   ;;  %v11612_v8 = vld [vmem:[%s13585_s26 + $0x122c] ss:$80 sps:$4 sm:$0xff]  }
  0x84   : > { %8087 = vmatprep.subr.bf16.mxu0 %v11531_v9  ;;  %8251 = vmatprep.subr.bf16.mxu1 %v11534_v10  ;;  %v11607_v9 = vld [vmem:[%s13585_s26 + $0x1220] ss:$80 sps:$4 sm:$0xff]   ;;  %v11610_v10 = vld [vmem:[%s13585_s26 + $0x1228] ss:$80 sps:$4 sm:$0xff]  }
  0x86   : > { %8079 = vmatmul.mubr.bf16.vlgmr.msra.gmra.mrb[0].mxu0 %v13685_v13  ;;  %8243 = vmatmul.mubr.bf16.vlgmr.msra.gmra.mrb[0].mxu1 %v13685_v13 }
  0x87   : > { %8088 = vmatpush1.bf16.msra.mxu0 %v11529_v12  ;;  %8252 = vmatpush1.bf16.msra.mxu1 %v11532_v14  ;;  %v11618_v12 = vld [vmem:[%s13585_s26 + $0x12cc] ss:$80 sps:$4 sm:$0xff]   ;;  %v11613_v14 = vld [vmem:[%s13585_s26 + $0x12c0] ss:$80 sps:$4 sm:$0xff]  }
  0x88   : > { %8089 = vmatprep.subr.bf16.mxu0 %v11537_v15  ;;  %8253 = vmatprep.subr.bf16.mxu1 %v11540_v16  ;;  %v13750_v15 = vsub.s32 2, %v13631_v40  ;;  %v11616_v16 = vld [vmem:[%s13585_s26 + $0x12c8] ss:$80 sps:$4 sm:$0xff]  }
  0x89   : > { %8119 = vmatprep.mubr.bf16.mxu0 %v13690_v17  ;;  %8283 = vmatprep.mubr.bf16.mxu1 %v13690_v17 }
  0x8b   : > { %8090 = vmatpush1.bf16.msra.mxu0 %v11535_v18  ;;  %8254 = vmatpush1.bf16.msra.mxu1 %v11538_v19  ;;  %v11621_v18 = vld [vmem:[%s13585_s26 + $0x1364] ss:$80 sps:$4 sm:$0xff]   ;;  %v11624_v19 = vld [vmem:[%s13585_s26 + $0x136c] ss:$80 sps:$4 sm:$0xff]  }
  0x8c   : > { %8091 = vmatprep.subr.bf16.mxu0 %v11543_v20  ;;  %8255 = vmatprep.subr.bf16.mxu1 %v11546_v21  ;;  %v13756_v20 = vsub.s32 5, %v13631_v40  ;;  %v11619_v21 = vld [vmem:[%s13585_s26 + $0x1360] ss:$80 sps:$4 sm:$0xff]  }
  0x8f   : > { %8092 = vmatpush1.bf16.msra.mxu0 %v11541_v22  ;;  %8256 = vmatpush1.bf16.msra.mxu1 %v11544_v23  ;;  %v219_v22 = vrot.slane %v13646_v49, %v13750_v15  ;;  %v11622_v23 = vld [vmem:[%s13585_s26 + $0x1368] ss:$80 sps:$4 sm:$0xff]  }
  0x90   : > { %8093 = vmatprep.subr.bf16.mxu0 %v11549_v24  ;;  %8257 = vmatprep.subr.bf16.mxu1 %v11552_v25  ;;  %v11627_v24 = vld [vmem:[%s13585_s26 + $0x1404] ss:$80 sps:$4 sm:$0xff]   ;;  %v11630_v25 = vld [vmem:[%s13585_s26 + $0x140c] ss:$80 sps:$4 sm:$0xff]  }
  0x93   : > { %8094 = vmatpush1.bf16.msra.mxu0 %v11547_v26  ;;  %8258 = vmatpush1.bf16.msra.mxu1 %v11550_v27  ;;  %v231_v26 = vrot.slane %v13646_v49, %v13756_v20  ;;  %v11625_v27 = vld [vmem:[%s13585_s26 + $0x1400] ss:$80 sps:$4 sm:$0xff]  }
  0x94   : > { %8095 = vmatprep.subr.bf16.mxu0 %v11555_v28  ;;  %8259 = vmatprep.subr.bf16.mxu1 %v11558_v29  ;;  %v13767_v28 = vpack.c.bf16 %v219_v22, %v219_v22  ;;  %v11628_v29 = vld [vmem:[%s13585_s26 + $0x1408] ss:$80 sps:$4 sm:$0xff]   ;;  %v11631_v49 = vld [vmem:[%s13585_s26 + $0x14a0] ss:$80 sps:$4 sm:$0xff]   ;;  %v11702_v22 = vld [vmem:[%s13585_s26 + $0x1b8c] ss:$80 sps:$4 sm:$0xff]  }
  0x97   : > { %8096 = vmatpush1.bf16.msra.mxu0 %v11553_v30  ;;  %8260 = vmatpush1.bf16.msra.mxu1 %v11556_v31  ;;  %v11633_v30 = vld [vmem:[%s13585_s26 + $0x14a4] ss:$80 sps:$4 sm:$0xff]   ;;  %v11636_v31 = vld [vmem:[%s13585_s26 + $0x14ac] ss:$80 sps:$4 sm:$0xff]  }
  0x98   : > { %8097 = vmatprep.subr.bf16.mxu0 %v11561_v32  ;;  %8261 = vmatprep.subr.bf16.mxu1 %v11564_v33  ;;  %v13772_v32 = vpack.c.bf16 %v231_v26, %v231_v26  ;;  %v11634_v33 = vld [vmem:[%s13585_s26 + $0x14a8] ss:$80 sps:$4 sm:$0xff]   ;;  %v11708_v26 = vld [vmem:[%s13585_s26 + $0x1c2c] ss:$80 sps:$4 sm:$0xff]  }
  0x9b   : > { %8098 = vmatpush1.bf16.msra.mxu0 %v11559_v34  ;;  %8262 = vmatpush1.bf16.msra.mxu1 %v11562_v35  ;;  %v11639_v34 = vld [vmem:[%s13585_s26 + $0x1544] ss:$80 sps:$4 sm:$0xff]   ;;  %v11642_v35 = vld [vmem:[%s13585_s26 + $0x154c] ss:$80 sps:$4 sm:$0xff]  }
  0x9c   : > { %8099 = vmatprep.subr.bf16.mxu0 %v11567_v37  ;;  %8263 = vmatprep.subr.bf16.mxu1 %v11570_v38  ;;  %v11637_v37 = vld [vmem:[%s13585_s26 + $0x1540] ss:$80 sps:$4 sm:$0xff]   ;;  %v11640_v38 = vld [vmem:[%s13585_s26 + $0x1548] ss:$80 sps:$4 sm:$0xff]  }
  0x9f   : > { %8100 = vmatpush1.bf16.msra.mxu0 %v11565_v39  ;;  %8264 = vmatpush1.bf16.msra.mxu1 %v11568_v41  ;;  %v11645_v39 = vld [vmem:[%s13585_s26 + $0x15e4] ss:$80 sps:$4 sm:$0xff]   ;;  %v11648_v41 = vld [vmem:[%s13585_s26 + $0x15ec] ss:$80 sps:$4 sm:$0xff]  }
  0xa0   : > { %8101 = vmatprep.subr.bf16.mxu0 %v11573_v42  ;;  %8265 = vmatprep.subr.bf16.mxu1 %v11576_v43  ;;  %v11643_v42 = vld [vmem:[%s13585_s26 + $0x15e0] ss:$80 sps:$4 sm:$0xff]   ;;  %v11646_v43 = vld [vmem:[%s13585_s26 + $0x15e8] ss:$80 sps:$4 sm:$0xff]  }
  0xa3   : > { %8102 = vmatpush1.bf16.msra.mxu0 %v11571_v44  ;;  %8266 = vmatpush1.bf16.msra.mxu1 %v11574_v45  ;;  %v11651_v44 = vld [vmem:[%s13585_s26 + $0x1684] ss:$80 sps:$4 sm:$0xff]   ;;  %v11654_v45 = vld [vmem:[%s13585_s26 + $0x168c] ss:$80 sps:$4 sm:$0xff]  }
  0xa4   : > { %8103 = vmatprep.subr.bf16.mxu0 %v11579_v47  ;;  %8267 = vmatprep.subr.bf16.mxu1 %v11582_v48  ;;  %v11649_v47 = vld [vmem:[%s13585_s26 + $0x1680] ss:$80 sps:$4 sm:$0xff]   ;;  %v11652_v48 = vld [vmem:[%s13585_s26 + $0x1688] ss:$80 sps:$4 sm:$0xff]  }
  0xa7   : > { %8104 = vmatpush1.bf16.msra.mxu0 %v11577_v50  ;;  %8268 = vmatpush1.bf16.msra.mxu1 %v11580_v51  ;;  %v11657_v50 = vld [vmem:[%s13585_s26 + $0x1724] ss:$80 sps:$4 sm:$0xff]   ;;  %v11660_v51 = vld [vmem:[%s13585_s26 + $0x172c] ss:$80 sps:$4 sm:$0xff]  }
  0xa8   : > { %8105 = vmatprep.subr.bf16.mxu0 %v11585_v52  ;;  %8269 = vmatprep.subr.bf16.mxu1 %v11588_v53  ;;  %v11655_v52 = vld [vmem:[%s13585_s26 + $0x1720] ss:$80 sps:$4 sm:$0xff]   ;;  %v11658_v53 = vld [vmem:[%s13585_s26 + $0x1728] ss:$80 sps:$4 sm:$0xff]  }
  0xab   : > { %8106 = vmatpush1.bf16.msra.mxu0 %v11583_v54  ;;  %8270 = vmatpush1.bf16.msra.mxu1 %v11586_v56  ;;  %v11663_v54 = vld [vmem:[%s13585_s26 + $0x17c4] ss:$80 sps:$4 sm:$0xff]   ;;  %v11666_v56 = vld [vmem:[%s13585_s26 + $0x17cc] ss:$80 sps:$4 sm:$0xff]  }
  0xac   : > { %8107 = vmatprep.subr.bf16.mxu0 %v11591_v57  ;;  %8271 = vmatprep.subr.bf16.mxu1 %v11594_v58  ;;  %v11661_v57 = vld [vmem:[%s13585_s26 + $0x17c0] ss:$80 sps:$4 sm:$0xff]   ;;  %v11664_v58 = vld [vmem:[%s13585_s26 + $0x17c8] ss:$80 sps:$4 sm:$0xff]  }
  0xaf   : > { %8108 = vmatpush1.bf16.msra.mxu0 %v11589_v59  ;;  %8272 = vmatpush1.bf16.msra.mxu1 %v11592_v60  ;;  %v11669_v59 = vld [vmem:[%s13585_s26 + $0x1864] ss:$80 sps:$4 sm:$0xff]   ;;  %v11672_v60 = vld [vmem:[%s13585_s26 + $0x186c] ss:$80 sps:$4 sm:$0xff]  }
  0xb0   : > { %8109 = vmatprep.subr.bf16.mxu0 %v11597_v61  ;;  %8273 = vmatprep.subr.bf16.mxu1 %v11600_v62  ;;  %v11667_v61 = vld [vmem:[%s13585_s26 + $0x1860] ss:$80 sps:$4 sm:$0xff]   ;;  %v11670_v62 = vld [vmem:[%s13585_s26 + $0x1868] ss:$80 sps:$4 sm:$0xff]  }
  0xb3   : > { %8110 = vmatpush1.bf16.msra.mxu0 %v11595_v63  ;;  %8274 = vmatpush1.bf16.msra.mxu1 %v11598_v0  ;;  %v11675_v63 = vld [vmem:[%s13585_s26 + $0x1904] ss:$80 sps:$4 sm:$0xff]   ;;  %v11678_v0 = vld [vmem:[%s13585_s26 + $0x190c] ss:$80 sps:$4 sm:$0xff]  }
  0xb4   : > { %8111 = vmatprep.subr.bf16.mxu0 %v11603_v2  ;;  %8275 = vmatprep.subr.bf16.mxu1 %v11606_v3  ;;  %v11673_v2 = vld [vmem:[%s13585_s26 + $0x1900] ss:$80 sps:$4 sm:$0xff]   ;;  %v11676_v3 = vld [vmem:[%s13585_s26 + $0x1908] ss:$80 sps:$4 sm:$0xff]  }
  0xb7   : > { %8112 = vmatpush1.bf16.msra.mxu0 %v11601_v4  ;;  %8276 = vmatpush1.bf16.msra.mxu1 %v11604_v6  ;;  %v11681_v4 = vld [vmem:[%s13585_s26 + $0x19a4] ss:$80 sps:$4 sm:$0xff]   ;;  %v11684_v6 = vld [vmem:[%s13585_s26 + $0x19ac] ss:$80 sps:$4 sm:$0xff]  }
  0xb8   : > { %8113 = vmatprep.subr.bf16.mxu0 %v11609_v7  ;;  %8277 = vmatprep.subr.bf16.mxu1 %v11612_v8  ;;  %v11679_v7 = vld [vmem:[%s13585_s26 + $0x19a0] ss:$80 sps:$4 sm:$0xff]   ;;  %v11682_v8 = vld [vmem:[%s13585_s26 + $0x19a8] ss:$80 sps:$4 sm:$0xff]  }
  0xbb   : > { %8114 = vmatpush1.bf16.msra.mxu0 %v11607_v9  ;;  %8278 = vmatpush1.bf16.msra.mxu1 %v11610_v10  ;;  %v11687_v9 = vld [vmem:[%s13585_s26 + $0x1a44] ss:$80 sps:$4 sm:$0xff]   ;;  %v11690_v10 = vld [vmem:[%s13585_s26 + $0x1a4c] ss:$80 sps:$4 sm:$0xff]  }
  0xbc   : > { %8115 = vmatprep.subr.bf16.mxu0 %v11615_v11  ;;  %8279 = vmatprep.subr.bf16.mxu1 %v11618_v12  ;;  %v11685_v11 = vld [vmem:[%s13585_s26 + $0x1a40] ss:$80 sps:$4 sm:$0xff]   ;;  %v11688_v12 = vld [vmem:[%s13585_s26 + $0x1a48] ss:$80 sps:$4 sm:$0xff]  }
  0xbf   : > { %8116 = vmatpush1.bf16.msra.mxu0 %v11613_v14  ;;  %8280 = vmatpush1.bf16.msra.mxu1 %v11616_v16  ;;  %v11693_v14 = vld [vmem:[%s13585_s26 + $0x1ae4] ss:$80 sps:$4 sm:$0xff]   ;;  %v11696_v16 = vld [vmem:[%s13585_s26 + $0x1aec] ss:$80 sps:$4 sm:$0xff]  }
  0xc0   : > { %8117 = vmatprep.subr.bf16.mxu0 %v11621_v18  ;;  %8281 = vmatprep.subr.bf16.mxu1 %v11624_v19  ;;  %v11691_v18 = vld [vmem:[%s13585_s26 + $0x1ae0] ss:$80 sps:$4 sm:$0xff]   ;;  %v11694_v19 = vld [vmem:[%s13585_s26 + $0x1ae8] ss:$80 sps:$4 sm:$0xff]  }
  0xc3   : > { %8118 = vmatpush1.bf16.msra.mxu0 %v11619_v21  ;;  %8282 = vmatpush1.bf16.msra.mxu1 %v11622_v23  ;;  %v11699_v21 = vld [vmem:[%s13585_s26 + $0x1b84] ss:$80 sps:$4 sm:$0xff]   ;;  %v11697_v23 = vld [vmem:[%s13585_s26 + $0x1b80] ss:$80 sps:$4 sm:$0xff]  }
  0xc4   : > { %8128 = vmatprep.subr.bf16.mxu0 %v11627_v24  ;;  %8292 = vmatprep.subr.bf16.mxu1 %v11630_v25  ;;  %v11700_v24 = vld [vmem:[%s13585_s26 + $0x1b88] ss:$80 sps:$4 sm:$0xff]   ;;  %v11705_v25 = vld [vmem:[%s13585_s26 + $0x1c24] ss:$80 sps:$4 sm:$0xff]  }
  0xc6   : > { %8120 = vmatmul.mubr.bf16.vlgmr.msra.gmra.mrb[0].mxu0 %v13767_v28  ;;  %8284 = vmatmul.mubr.bf16.vlgmr.msra.gmra.mrb[0].mxu1 %v13767_v28 }
  0xc7   : > { %8129 = vmatpush1.bf16.msra.mxu0 %v11625_v27  ;;  %8293 = vmatpush1.bf16.msra.mxu1 %v11628_v29  ;;  %v11703_v27 = vld [vmem:[%s13585_s26 + $0x1c20] ss:$80 sps:$4 sm:$0xff]   ;;  %v11706_v29 = vld [vmem:[%s13585_s26 + $0x1c28] ss:$80 sps:$4 sm:$0xff]  }
  0xc8   : > { %8130 = vmatprep.subr.bf16.mxu0 %v11633_v30  ;;  %8294 = vmatprep.subr.bf16.mxu1 %v11636_v31  ;;  %v11711_v30 = vld [vmem:[%s13585_s26 + $0x1cc4] ss:$80 sps:$4 sm:$0xff]   ;;  %v11714_v31 = vld [vmem:[%s13585_s26 + $0x1ccc] ss:$80 sps:$4 sm:$0xff]  }
  0xc9   : > { %8160 = vmatprep.mubr.bf16.mxu0 %v13772_v32  ;;  %8324 = vmatprep.mubr.bf16.mxu1 %v13772_v32 }
  0xcb   : > { %8131 = vmatpush1.bf16.msra.mxu0 %v11631_v49  ;;  %8295 = vmatpush1.bf16.msra.mxu1 %v11634_v33  ;;  %v11709_v49 = vld [vmem:[%s13585_s26 + $0x1cc0] ss:$80 sps:$4 sm:$0xff]   ;;  %v13832_v33 = vsub.s32 4, %v13631_v40 }
  0xcc   : > { %8132 = vmatprep.subr.bf16.mxu0 %v11639_v34  ;;  %8296 = vmatprep.subr.bf16.mxu1 %v11642_v35  ;;  %v11712_v34 = vld [vmem:[%s13585_s26 + $0x1cc8] ss:$80 sps:$4 sm:$0xff]   ;;  %v11717_v35 = vld [vmem:[%s13585_s26 + $0x1d64] ss:$80 sps:$4 sm:$0xff]  }
  0xcf   : > { %8133 = vmatpush1.bf16.msra.mxu0 %v11637_v37  ;;  %8297 = vmatpush1.bf16.msra.mxu1 %v11640_v38  ;;  %v11720_v37 = vld [vmem:[%s13585_s26 + $0x1d6c] ss:$80 sps:$4 sm:$0xff]   ;;  %v13838_v38 = vsub.s32 7, %v13631_v40 }
  0xd0   : > { %8134 = vmatprep.subr.bf16.mxu0 %v11645_v39  ;;  %8298 = vmatprep.subr.bf16.mxu1 %v11648_v41  ;;  %v11715_v39 = vld [vmem:[%s13585_s26 + $0x1d60] ss:$80 sps:$4 sm:$0xff]  }
  0xd1   : > { %v13844_v41 = vld [vmem:[%s15138_s0] sm:$0xff] }
  0xd3   : > { %8135 = vmatpush1.bf16.msra.mxu0 %v11643_v42  ;;  %8299 = vmatpush1.bf16.msra.mxu1 %v11646_v43  ;;  %v227_v42 = vrot.slane %v13844_v41, %v13832_v33  ;;  %v11718_v43 = vld [vmem:[%s13585_s26 + $0x1d68] ss:$80 sps:$4 sm:$0xff]  }
  0xd4   : > { %8136 = vmatprep.subr.bf16.mxu0 %v11651_v44  ;;  %8300 = vmatprep.subr.bf16.mxu1 %v11654_v45  ;;  %v11723_v44 = vld [vmem:[%s13585_s26 + $0x1e04] ss:$80 sps:$4 sm:$0xff]   ;;  %v11726_v45 = vld [vmem:[%s13585_s26 + $0x1e0c] ss:$80 sps:$4 sm:$0xff]  }
  0xd7   : > { %8137 = vmatpush1.bf16.msra.mxu0 %v11649_v47  ;;  %8301 = vmatpush1.bf16.msra.mxu1 %v11652_v48  ;;  %v239_v47 = vrot.slane %v13844_v41, %v13838_v38  ;;  %v11721_v48 = vld [vmem:[%s13585_s26 + $0x1e00] ss:$80 sps:$4 sm:$0xff]  }
  0xd8   : > { %8138 = vmatprep.subr.bf16.mxu0 %v11657_v50  ;;  %8302 = vmatprep.subr.bf16.mxu1 %v11660_v51  ;;  %v13854_v50 = vpack.c.bf16 %v227_v42, %v227_v42  ;;  %v11724_v51 = vld [vmem:[%s13585_s26 + $0x1e08] ss:$80 sps:$4 sm:$0xff]   ;;  %v11789_v42 = vld [vmem:[%s13585_s26 + $0x24e4] ss:$80 sps:$4 sm:$0xff]  }
  0xdb   : > { %8139 = vmatpush1.bf16.msra.mxu0 %v11655_v52  ;;  %8303 = vmatpush1.bf16.msra.mxu1 %v11658_v53  ;;  %v11729_v52 = vld [vmem:[%s13585_s26 + $0x1ea4] ss:$80 sps:$4 sm:$0xff]   ;;  %v11732_v53 = vld [vmem:[%s13585_s26 + $0x1eac] ss:$80 sps:$4 sm:$0xff]  }
  0xdc   : > { %8140 = vmatprep.subr.bf16.mxu0 %v11663_v54  ;;  %8304 = vmatprep.subr.bf16.mxu1 %v11666_v56  ;;  %v13859_v54 = vpack.c.bf16 %v239_v47, %v239_v47  ;;  %v11727_v56 = vld [vmem:[%s13585_s26 + $0x1ea0] ss:$80 sps:$4 sm:$0xff]   ;;  %v11795_v47 = vld [vmem:[%s13585_s26 + $0x2584] ss:$80 sps:$4 sm:$0xff]  }
  0xdf   : > { %8141 = vmatpush1.bf16.msra.mxu0 %v11661_v57  ;;  %8305 = vmatpush1.bf16.msra.mxu1 %v11664_v58  ;;  %v11730_v57 = vld [vmem:[%s13585_s26 + $0x1ea8] ss:$80 sps:$4 sm:$0xff]   ;;  %v11735_v58 = vld [vmem:[%s13585_s26 + $0x1f44] ss:$80 sps:$4 sm:$0xff]  }
  0xe0   : > { %8142 = vmatprep.subr.bf16.mxu0 %v11669_v59  ;;  %8306 = vmatprep.subr.bf16.mxu1 %v11672_v60  ;;  %v11738_v59 = vld [vmem:[%s13585_s26 + $0x1f4c] ss:$80 sps:$4 sm:$0xff]   ;;  %v11733_v60 = vld [vmem:[%s13585_s26 + $0x1f40] ss:$80 sps:$4 sm:$0xff]  }
  0xe3   : > { %8143 = vmatpush1.bf16.msra.mxu0 %v11667_v61  ;;  %8307 = vmatpush1.bf16.msra.mxu1 %v11670_v62  ;;  %v11736_v61 = vld [vmem:[%s13585_s26 + $0x1f48] ss:$80 sps:$4 sm:$0xff]   ;;  %v11741_v62 = vld [vmem:[%s13585_s26 + $0x1fe4] ss:$80 sps:$4 sm:$0xff]  }
  0xe4   : > { %8144 = vmatprep.subr.bf16.mxu0 %v11675_v63  ;;  %8308 = vmatprep.subr.bf16.mxu1 %v11678_v0  ;;  %v11744_v63 = vld [vmem:[%s13585_s26 + $0x1fec] ss:$80 sps:$4 sm:$0xff]   ;;  %v11739_v0 = vld [vmem:[%s13585_s26 + $0x1fe0] ss:$80 sps:$4 sm:$0xff]  }
  0xe7   : > { %8145 = vmatpush1.bf16.msra.mxu0 %v11673_v2  ;;  %8309 = vmatpush1.bf16.msra.mxu1 %v11676_v3  ;;  %v11742_v2 = vld [vmem:[%s13585_s26 + $0x1fe8] ss:$80 sps:$4 sm:$0xff]   ;;  %v11747_v3 = vld [vmem:[%s13585_s26 + $0x2084] ss:$80 sps:$4 sm:$0xff]  }
  0xe8   : > { %8146 = vmatprep.subr.bf16.mxu0 %v11681_v4  ;;  %8310 = vmatprep.subr.bf16.mxu1 %v11684_v6  ;;  %v11750_v4 = vld [vmem:[%s13585_s26 + $0x208c] ss:$80 sps:$4 sm:$0xff]   ;;  %v11745_v6 = vld [vmem:[%s13585_s26 + $0x2080] ss:$80 sps:$4 sm:$0xff]  }
  0xeb   : > { %8147 = vmatpush1.bf16.msra.mxu0 %v11679_v7  ;;  %8311 = vmatpush1.bf16.msra.mxu1 %v11682_v8  ;;  %v11748_v7 = vld [vmem:[%s13585_s26 + $0x2088] ss:$80 sps:$4 sm:$0xff]   ;;  %v11753_v8 = vld [vmem:[%s13585_s26 + $0x2124] ss:$80 sps:$4 sm:$0xff]  }
  0xec   : > { %8148 = vmatprep.subr.bf16.mxu0 %v11687_v9  ;;  %8312 = vmatprep.subr.bf16.mxu1 %v11690_v10  ;;  %v11756_v9 = vld [vmem:[%s13585_s26 + $0x212c] ss:$80 sps:$4 sm:$0xff]   ;;  %v11751_v10 = vld [vmem:[%s13585_s26 + $0x2120] ss:$80 sps:$4 sm:$0xff]  }
  0xef   : > { %8149 = vmatpush1.bf16.msra.mxu0 %v11685_v11  ;;  %8313 = vmatpush1.bf16.msra.mxu1 %v11688_v12  ;;  %v11754_v11 = vld [vmem:[%s13585_s26 + $0x2128] ss:$80 sps:$4 sm:$0xff]   ;;  %v11759_v12 = vld [vmem:[%s13585_s26 + $0x21c4] ss:$80 sps:$4 sm:$0xff]  }
  0xf0   : > { %8150 = vmatprep.subr.bf16.mxu0 %v11693_v14  ;;  %8314 = vmatprep.subr.bf16.mxu1 %v11696_v16  ;;  %v11762_v14 = vld [vmem:[%s13585_s26 + $0x21cc] ss:$80 sps:$4 sm:$0xff]   ;;  %v11757_v16 = vld [vmem:[%s13585_s26 + $0x21c0] ss:$80 sps:$4 sm:$0xff]  }
  0xf3   : > { %8151 = vmatpush1.bf16.msra.mxu0 %v11691_v18  ;;  %8315 = vmatpush1.bf16.msra.mxu1 %v11694_v19  ;;  %v11760_v18 = vld [vmem:[%s13585_s26 + $0x21c8] ss:$80 sps:$4 sm:$0xff]   ;;  %v11765_v19 = vld [vmem:[%s13585_s26 + $0x2264] ss:$80 sps:$4 sm:$0xff]  }
  0xf4   : > { %8152 = vmatprep.subr.bf16.mxu0 %v11699_v21  ;;  %8316 = vmatprep.subr.bf16.mxu1 %v11702_v22  ;;  %v11768_v21 = vld [vmem:[%s13585_s26 + $0x226c] ss:$80 sps:$4 sm:$0xff]   ;;  %v11763_v22 = vld [vmem:[%s13585_s26 + $0x2260] ss:$80 sps:$4 sm:$0xff]  }
  0xf7   : > { %8153 = vmatpush1.bf16.msra.mxu0 %v11697_v23  ;;  %8317 = vmatpush1.bf16.msra.mxu1 %v11700_v24  ;;  %v11766_v23 = vld [vmem:[%s13585_s26 + $0x2268] ss:$80 sps:$4 sm:$0xff]   ;;  %v11771_v24 = vld [vmem:[%s13585_s26 + $0x2304] ss:$80 sps:$4 sm:$0xff]  }
  0xf8   : > { %8154 = vmatprep.subr.bf16.mxu0 %v11705_v25  ;;  %8318 = vmatprep.subr.bf16.mxu1 %v11708_v26  ;;  %v11774_v25 = vld [vmem:[%s13585_s26 + $0x230c] ss:$80 sps:$4 sm:$0xff]   ;;  %v11769_v26 = vld [vmem:[%s13585_s26 + $0x2300] ss:$80 sps:$4 sm:$0xff]  }
  0xfb   : > { %8155 = vmatpush1.bf16.msra.mxu0 %v11703_v27  ;;  %8319 = vmatpush1.bf16.msra.mxu1 %v11706_v29  ;;  %v11772_v27 = vld [vmem:[%s13585_s26 + $0x2308] ss:$80 sps:$4 sm:$0xff]   ;;  %v11777_v29 = vld [vmem:[%s13585_s26 + $0x23a4] ss:$80 sps:$4 sm:$0xff]  }
  0xfc   : > { %8156 = vmatprep.subr.bf16.mxu0 %v11711_v30  ;;  %8320 = vmatprep.subr.bf16.mxu1 %v11714_v31  ;;  %v11780_v30 = vld [vmem:[%s13585_s26 + $0x23ac] ss:$80 sps:$4 sm:$0xff]   ;;  %v11775_v31 = vld [vmem:[%s13585_s26 + $0x23a0] ss:$80 sps:$4 sm:$0xff]  }
  0xff   : > { %8157 = vmatpush1.bf16.msra.mxu0 %v11709_v49  ;;  %8321 = vmatpush1.bf16.msra.mxu1 %v11712_v34  ;;  %v11778_v49 = vld [vmem:[%s13585_s26 + $0x23a8] ss:$80 sps:$4 sm:$0xff]   ;;  %v11783_v34 = vld [vmem:[%s13585_s26 + $0x2444] ss:$80 sps:$4 sm:$0xff]  }
 0x100   : > { %8158 = vmatprep.subr.bf16.mxu0 %v11717_v35  ;;  %8322 = vmatprep.subr.bf16.mxu1 %v11720_v37  ;;  %v11786_v35 = vld [vmem:[%s13585_s26 + $0x244c] ss:$80 sps:$4 sm:$0xff]   ;;  %v11781_v37 = vld [vmem:[%s13585_s26 + $0x2440] ss:$80 sps:$4 sm:$0xff]  }
 0x103   : > { %8159 = vmatpush1.bf16.msra.mxu0 %v11715_v39  ;;  %8323 = vmatpush1.bf16.msra.mxu1 %v11718_v43  ;;  %v11784_v39 = vld [vmem:[%s13585_s26 + $0x2448] ss:$80 sps:$4 sm:$0xff]   ;;  %v11792_v43 = vld [vmem:[%s13585_s26 + $0x24ec] ss:$80 sps:$4 sm:$0xff]  }
 0x104   : > { %8169 = vmatprep.subr.bf16.mxu0 %v11723_v44  ;;  %8333 = vmatprep.subr.bf16.mxu1 %v11726_v45  ;;  %v11787_v44 = vld [vmem:[%s13585_s26 + $0x24e0] ss:$80 sps:$4 sm:$0xff]   ;;  %v11790_v45 = vld [vmem:[%s13585_s26 + $0x24e8] ss:$80 sps:$4 sm:$0xff]  }
 0x106   : > { %8161 = vmatmul.mubr.bf16.vlgmr.msra.gmra.mrb[0].mxu0 %v13854_v50  ;;  %8325 = vmatmul.mubr.bf16.vlgmr.msra.gmra.mrb[0].mxu1 %v13854_v50 }
 0x107   : > { %8170 = vmatpush1.bf16.msra.mxu0 %v11721_v48  ;;  %8334 = vmatpush1.bf16.msra.mxu1 %v11724_v51  ;;  %v11798_v48 = vld [vmem:[%s13585_s26 + $0x258c] ss:$80 sps:$4 sm:$0xff]   ;;  %v11793_v51 = vld [vmem:[%s13585_s26 + $0x2580] ss:$80 sps:$4 sm:$0xff]  }
 0x108   : > { %8171 = vmatprep.subr.bf16.mxu0 %v11729_v52  ;;  %8335 = vmatprep.subr.bf16.mxu1 %v11732_v53  ;;  %v11796_v52 = vld [vmem:[%s13585_s26 + $0x2588] ss:$80 sps:$4 sm:$0xff]   ;;  %v11801_v53 = vld [vmem:[%s13585_s26 + $0x2624] ss:$80 sps:$4 sm:$0xff]  }
 0x109   : > { %8201 = vmatprep.mubr.bf16.mxu0 %v13859_v54  ;;  %8365 = vmatprep.mubr.bf16.mxu1 %v13859_v54 }
 0x10b   : > { %8172 = vmatpush1.bf16.msra.mxu0 %v11727_v56  ;;  %8336 = vmatpush1.bf16.msra.mxu1 %v11730_v57  ;;  %v11804_v56 = vld [vmem:[%s13585_s26 + $0x262c] ss:$80 sps:$4 sm:$0xff]   ;;  %v11799_v57 = vld [vmem:[%s13585_s26 + $0x2620] ss:$80 sps:$4 sm:$0xff]  }
 0x10c   : > { %8173 = vmatprep.subr.bf16.mxu0 %v11735_v58  ;;  %8337 = vmatprep.subr.bf16.mxu1 %v11738_v59  ;;  %v11802_v58 = vld [vmem:[%s13585_s26 + $0x2628] ss:$80 sps:$4 sm:$0xff]   ;;  %v11807_v59 = vld [vmem:[%s13585_s26 + $0x26c4] ss:$80 sps:$4 sm:$0xff]  }
 0x10f   : > { %8174 = vmatpush1.bf16.msra.mxu0 %v11733_v60  ;;  %8338 = vmatpush1.bf16.msra.mxu1 %v11736_v61  ;;  %v11810_v60 = vld [vmem:[%s13585_s26 + $0x26cc] ss:$80 sps:$4 sm:$0xff]   ;;  %v11805_v61 = vld [vmem:[%s13585_s26 + $0x26c0] ss:$80 sps:$4 sm:$0xff]  }
 0x110   : > { %8175 = vmatprep.subr.bf16.mxu0 %v11741_v62  ;;  %8339 = vmatprep.subr.bf16.mxu1 %v11744_v63  ;;  %v13919_v62 = vsub.s32 6, %v13631_v40  ;;  %v11808_v63 = vld [vmem:[%s13585_s26 + $0x26c8] ss:$80 sps:$4 sm:$0xff]  }
 0x113   : > { %8176 = vmatpush1.bf16.msra.mxu0 %v11739_v0  ;;  %8340 = vmatpush1.bf16.msra.mxu1 %v11742_v2  ;;  %v11813_v0 = vld [vmem:[%s13585_s26 + $0x2764] ss:$80 sps:$4 sm:$0xff]   ;;  %v11816_v2 = vld [vmem:[%s13585_s26 + $0x276c] ss:$80 sps:$4 sm:$0xff]  }
 0x114   : > { %8177 = vmatprep.subr.bf16.mxu0 %v11747_v3  ;;  %8341 = vmatprep.subr.bf16.mxu1 %v11750_v4  ;;  %v11811_v3 = vld [vmem:[%s13585_s26 + $0x2760] ss:$80 sps:$4 sm:$0xff]   ;;  %v235_v4 = vrot.slane %v13844_v41, %v13919_v62  ;;  %v11825_v41 = vld [vmem:[%s13585_s26 + $0xb4] ss:$80 sps:$4 sm:$0xff]  }
 0x117   : > { %8178 = vmatpush1.bf16.msra.mxu0 %v11745_v6  ;;  %8342 = vmatpush1.bf16.msra.mxu1 %v11748_v7  ;;  %v11814_v6 = vld [vmem:[%s13585_s26 + $0x2768] ss:$80 sps:$4 sm:$0xff]   ;;  %v11819_v7 = vld [vmem:[%s13585_s26 + $0x14] ss:$80 sps:$4 sm:$0xff]  }
 0x118   : > { %8179 = vmatprep.subr.bf16.mxu0 %v11753_v8  ;;  %8343 = vmatprep.subr.bf16.mxu1 %v11756_v9  ;;  %v11822_v8 = vld [vmem:[%s13585_s26 + $0x1c] ss:$80 sps:$4 sm:$0xff]   ;;  %v13930_v9 = vpack.c.bf16 %v235_v4, %v235_v4  ;;  %v11885_v4 = vld [vmem:[%s13585_s26 + $0x6f4] ss:$80 sps:$4 sm:$0xff]  }
 0x11b   : > { %8180 = vmatpush1.bf16.msra.mxu0 %v11751_v10  ;;  %8344 = vmatpush1.bf16.msra.mxu1 %v11754_v11  ;;  %v11817_v10 = vld [vmem:[%s13585_s26 + $0x10] ss:$80 sps:$4 sm:$0xff]   ;;  %v11820_v11 = vld [vmem:[%s13585_s26 + $0x18] ss:$80 sps:$4 sm:$0xff]  }
 0x11c   : > { %8181 = vmatprep.subr.bf16.mxu0 %v11759_v12  ;;  %8345 = vmatprep.subr.bf16.mxu1 %v11762_v14  ;;  %v11828_v12 = vld [vmem:[%s13585_s26 + $0xbc] ss:$80 sps:$4 sm:$0xff]   ;;  %v11823_v14 = vld [vmem:[%s13585_s26 + $0xb0] ss:$80 sps:$4 sm:$0xff]  }
 0x11f   : > { %8182 = vmatpush1.bf16.msra.mxu0 %v11757_v16  ;;  %8346 = vmatpush1.bf16.msra.mxu1 %v11760_v18  ;;  %v11826_v16 = vld [vmem:[%s13585_s26 + $0xb8] ss:$80 sps:$4 sm:$0xff]   ;;  %v11831_v18 = vld [vmem:[%s13585_s26 + $0x154] ss:$80 sps:$4 sm:$0xff]  }
 0x120   : > { %8183 = vmatprep.subr.bf16.mxu0 %v11765_v19  ;;  %8347 = vmatprep.subr.bf16.mxu1 %v11768_v21  ;;  %v11834_v19 = vld [vmem:[%s13585_s26 + $0x15c] ss:$80 sps:$4 sm:$0xff]   ;;  %v11829_v21 = vld [vmem:[%s13585_s26 + $0x150] ss:$80 sps:$4 sm:$0xff]  }
 0x123   : > { %8184 = vmatpush1.bf16.msra.mxu0 %v11763_v22  ;;  %8348 = vmatpush1.bf16.msra.mxu1 %v11766_v23  ;;  %v11832_v22 = vld [vmem:[%s13585_s26 + $0x158] ss:$80 sps:$4 sm:$0xff]   ;;  %v11837_v23 = vld [vmem:[%s13585_s26 + $0x1f4] ss:$80 sps:$4 sm:$0xff]  }
 0x124   : > { %8185 = vmatprep.subr.bf16.mxu0 %v11771_v24  ;;  %8349 = vmatprep.subr.bf16.mxu1 %v11774_v25  ;;  %v11840_v24 = vld [vmem:[%s13585_s26 + $0x1fc] ss:$80 sps:$4 sm:$0xff]   ;;  %v11835_v25 = vld [vmem:[%s13585_s26 + $0x1f0] ss:$80 sps:$4 sm:$0xff]  }
 0x127   : > { %8186 = vmatpush1.bf16.msra.mxu0 %v11769_v26  ;;  %8350 = vmatpush1.bf16.msra.mxu1 %v11772_v27  ;;  %v11838_v26 = vld [vmem:[%s13585_s26 + $0x1f8] ss:$80 sps:$4 sm:$0xff]   ;;  %v11843_v27 = vld [vmem:[%s13585_s26 + $0x294] ss:$80 sps:$4 sm:$0xff]  }
 0x128   : > { %8187 = vmatprep.subr.bf16.mxu0 %v11777_v29  ;;  %8351 = vmatprep.subr.bf16.mxu1 %v11780_v30  ;;  %v11846_v29 = vld [vmem:[%s13585_s26 + $0x29c] ss:$80 sps:$4 sm:$0xff]   ;;  %v11841_v30 = vld [vmem:[%s13585_s26 + $0x290] ss:$80 sps:$4 sm:$0xff]  }
 0x12b   : > { %8188 = vmatpush1.bf16.msra.mxu0 %v11775_v31  ;;  %8352 = vmatpush1.bf16.msra.mxu1 %v11778_v49  ;;  %v11844_v31 = vld [vmem:[%s13585_s26 + $0x298] ss:$80 sps:$4 sm:$0xff]   ;;  %v11849_v49 = vld [vmem:[%s13585_s26 + $0x334] ss:$80 sps:$4 sm:$0xff]  }
 0x12c   : > { %8189 = vmatprep.subr.bf16.mxu0 %v11783_v34  ;;  %8353 = vmatprep.subr.bf16.mxu1 %v11786_v35  ;;  %v11852_v34 = vld [vmem:[%s13585_s26 + $0x33c] ss:$80 sps:$4 sm:$0xff]   ;;  %v11847_v35 = vld [vmem:[%s13585_s26 + $0x330] ss:$80 sps:$4 sm:$0xff]  }
 0x12f   : > { %8190 = vmatpush1.bf16.msra.mxu0 %v11781_v37  ;;  %8354 = vmatpush1.bf16.msra.mxu1 %v11784_v39  ;;  %v11850_v37 = vld [vmem:[%s13585_s26 + $0x338] ss:$80 sps:$4 sm:$0xff]   ;;  %v11855_v39 = vld [vmem:[%s13585_s26 + $0x3d4] ss:$80 sps:$4 sm:$0xff]  }
 0x130   : > { %8191 = vmatprep.subr.bf16.mxu0 %v11789_v42  ;;  %8355 = vmatprep.subr.bf16.mxu1 %v11792_v43  ;;  %v11858_v42 = vld [vmem:[%s13585_s26 + $0x3dc] ss:$80 sps:$4 sm:$0xff]   ;;  %v11853_v43 = vld [vmem:[%s13585_s26 + $0x3d0] ss:$80 sps:$4 sm:$0xff]  }
 0x133   : > { %8192 = vmatpush1.bf16.msra.mxu0 %v11787_v44  ;;  %8356 = vmatpush1.bf16.msra.mxu1 %v11790_v45  ;;  %v11856_v44 = vld [vmem:[%s13585_s26 + $0x3d8] ss:$80 sps:$4 sm:$0xff]   ;;  %v11861_v45 = vld [vmem:[%s13585_s26 + $0x474] ss:$80 sps:$4 sm:$0xff]  }
 0x134   : > { %8193 = vmatprep.subr.bf16.mxu0 %v11795_v47  ;;  %8357 = vmatprep.subr.bf16.mxu1 %v11798_v48  ;;  %v11864_v47 = vld [vmem:[%s13585_s26 + $0x47c] ss:$80 sps:$4 sm:$0xff]   ;;  %v11859_v48 = vld [vmem:[%s13585_s26 + $0x470] ss:$80 sps:$4 sm:$0xff]  }
 0x137   : > { %8194 = vmatpush1.bf16.msra.mxu0 %v11793_v51  ;;  %8358 = vmatpush1.bf16.msra.mxu1 %v11796_v52  ;;  %v11862_v51 = vld [vmem:[%s13585_s26 + $0x478] ss:$80 sps:$4 sm:$0xff]   ;;  %v11867_v52 = vld [vmem:[%s13585_s26 + $0x514] ss:$80 sps:$4 sm:$0xff]  }
 0x138   : > { %8195 = vmatprep.subr.bf16.mxu0 %v11801_v53  ;;  %8359 = vmatprep.subr.bf16.mxu1 %v11804_v56  ;;  %v11870_v53 = vld [vmem:[%s13585_s26 + $0x51c] ss:$80 sps:$4 sm:$0xff]   ;;  %v11865_v56 = vld [vmem:[%s13585_s26 + $0x510] ss:$80 sps:$4 sm:$0xff]  }
 0x13b   : > { %8196 = vmatpush1.bf16.msra.mxu0 %v11799_v57  ;;  %8360 = vmatpush1.bf16.msra.mxu1 %v11802_v58  ;;  %v11868_v57 = vld [vmem:[%s13585_s26 + $0x518] ss:$80 sps:$4 sm:$0xff]   ;;  %v11873_v58 = vld [vmem:[%s13585_s26 + $0x5b4] ss:$80 sps:$4 sm:$0xff]  }
 0x13c   : > { %8197 = vmatprep.subr.bf16.mxu0 %v11807_v59  ;;  %8361 = vmatprep.subr.bf16.mxu1 %v11810_v60  ;;  %v11876_v59 = vld [vmem:[%s13585_s26 + $0x5bc] ss:$80 sps:$4 sm:$0xff]   ;;  %v11871_v60 = vld [vmem:[%s13585_s26 + $0x5b0] ss:$80 sps:$4 sm:$0xff]  }
 0x13f   : > { %8198 = vmatpush1.bf16.msra.mxu0 %v11805_v61  ;;  %8362 = vmatpush1.bf16.msra.mxu1 %v11808_v63  ;;  %v11874_v61 = vld [vmem:[%s13585_s26 + $0x5b8] ss:$80 sps:$4 sm:$0xff]   ;;  %v11879_v63 = vld [vmem:[%s13585_s26 + $0x654] ss:$80 sps:$4 sm:$0xff]  }
 0x140   : > { %8199 = vmatprep.subr.bf16.mxu0 %v11813_v0  ;;  %8363 = vmatprep.subr.bf16.mxu1 %v11816_v2  ;;  %v11882_v0 = vld [vmem:[%s13585_s26 + $0x65c] ss:$80 sps:$4 sm:$0xff]   ;;  %v11877_v2 = vld [vmem:[%s13585_s26 + $0x650] ss:$80 sps:$4 sm:$0xff]  }
 0x143   : > { %8200 = vmatpush1.bf16.msra.mxu0 %v11811_v3  ;;  %8364 = vmatpush1.bf16.msra.mxu1 %v11814_v6  ;;  %v11880_v3 = vld [vmem:[%s13585_s26 + $0x658] ss:$80 sps:$4 sm:$0xff]   ;;  %v11888_v6 = vld [vmem:[%s13585_s26 + $0x6fc] ss:$80 sps:$4 sm:$0xff]  }
 0x144   : > { %8374 = vmatprep.subr.bf16.mxu0 %v11819_v7  ;;  %8538 = vmatprep.subr.bf16.mxu1 %v11822_v8  ;;  %v11883_v7 = vld [vmem:[%s13585_s26 + $0x6f0] ss:$80 sps:$4 sm:$0xff]   ;;  %v11886_v8 = vld [vmem:[%s13585_s26 + $0x6f8] ss:$80 sps:$4 sm:$0xff]  }
 0x146   : > { %8202 = vmatmul.mubr.bf16.vlgmr.msra.gmra.mrb[0].mxu0 %v13930_v9  ;;  %8366 = vmatmul.mubr.bf16.vlgmr.msra.gmra.mrb[0].mxu1 %v13930_v9 }
 0x147   : > { %8375 = vmatpush1.bf16.msra.mxu0 %v11817_v10  ;;  %8539 = vmatpush1.bf16.msra.mxu1 %v11820_v11  ;;  %v11891_v10 = vld [vmem:[%s13585_s26 + $0x794] ss:$80 sps:$4 sm:$0xff]   ;;  %v11894_v11 = vld [vmem:[%s13585_s26 + $0x79c] ss:$80 sps:$4 sm:$0xff]  }
 0x148   : > { %8376 = vmatprep.subr.bf16.mxu0 %v11825_v41  ;;  %8540 = vmatprep.subr.bf16.mxu1 %v11828_v12  ;;  %v11889_v41 = vld [vmem:[%s13585_s26 + $0x790] ss:$80 sps:$4 sm:$0xff]   ;;  %v11892_v12 = vld [vmem:[%s13585_s26 + $0x798] ss:$80 sps:$4 sm:$0xff]  }
 0x149   : > { %8406 = vmatprep.mubr.bf16.mxu0 %v13654_v55  ;;  %8570 = vmatprep.mubr.bf16.mxu1 %v13654_v55 }
 0x14b   : > { %8377 = vmatpush1.bf16.msra.mxu0 %v11823_v14  ;;  %8541 = vmatpush1.bf16.msra.mxu1 %v11826_v16  ;;  %v11897_v14 = vld [vmem:[%s13585_s26 + $0x834] ss:$80 sps:$4 sm:$0xff]   ;;  %v11900_v16 = vld [vmem:[%s13585_s26 + $0x83c] ss:$80 sps:$4 sm:$0xff]  }
 0x14c   : > { %8378 = vmatprep.subr.bf16.mxu0 %v11831_v18  ;;  %8542 = vmatprep.subr.bf16.mxu1 %v11834_v19  ;;  %v11895_v18 = vld [vmem:[%s13585_s26 + $0x830] ss:$80 sps:$4 sm:$0xff]   ;;  %v11898_v19 = vld [vmem:[%s13585_s26 + $0x838] ss:$80 sps:$4 sm:$0xff]  }
 0x14f   : > { %8379 = vmatpush1.bf16.msra.mxu0 %v11829_v21  ;;  %8543 = vmatpush1.bf16.msra.mxu1 %v11832_v22  ;;  %v11903_v21 = vld [vmem:[%s13585_s26 + $0x8d4] ss:$80 sps:$4 sm:$0xff]   ;;  %v11906_v22 = vld [vmem:[%s13585_s26 + $0x8dc] ss:$80 sps:$4 sm:$0xff]  }
 0x150   : > { %8380 = vmatprep.subr.bf16.mxu0 %v11837_v23  ;;  %8544 = vmatprep.subr.bf16.mxu1 %v11840_v24  ;;  %v11901_v23 = vld [vmem:[%s13585_s26 + $0x8d0] ss:$80 sps:$4 sm:$0xff]   ;;  %v11904_v24 = vld [vmem:[%s13585_s26 + $0x8d8] ss:$80 sps:$4 sm:$0xff]  }
 0x153   : > { %8381 = vmatpush1.bf16.msra.mxu0 %v11835_v25  ;;  %8545 = vmatpush1.bf16.msra.mxu1 %v11838_v26  ;;  %v11909_v25 = vld [vmem:[%s13585_s26 + $0x974] ss:$80 sps:$4 sm:$0xff]   ;;  %v11912_v26 = vld [vmem:[%s13585_s26 + $0x97c] ss:$80 sps:$4 sm:$0xff]  }
 0x154   : > { %8382 = vmatprep.subr.bf16.mxu0 %v11843_v27  ;;  %8546 = vmatprep.subr.bf16.mxu1 %v11846_v29  ;;  %v11907_v27 = vld [vmem:[%s13585_s26 + $0x970] ss:$80 sps:$4 sm:$0xff]   ;;  %v11910_v29 = vld [vmem:[%s13585_s26 + $0x978] ss:$80 sps:$4 sm:$0xff]  }
 0x157   : > { %8383 = vmatpush1.bf16.msra.mxu0 %v11841_v30  ;;  %8547 = vmatpush1.bf16.msra.mxu1 %v11844_v31  ;;  %v11915_v30 = vld [vmem:[%s13585_s26 + $0xa14] ss:$80 sps:$4 sm:$0xff]   ;;  %v11918_v31 = vld [vmem:[%s13585_s26 + $0xa1c] ss:$80 sps:$4 sm:$0xff]  }
 0x158   : > { %8384 = vmatprep.subr.bf16.mxu0 %v11849_v49  ;;  %8548 = vmatprep.subr.bf16.mxu1 %v11852_v34  ;;  %v11913_v49 = vld [vmem:[%s13585_s26 + $0xa10] ss:$80 sps:$4 sm:$0xff]   ;;  %v11916_v34 = vld [vmem:[%s13585_s26 + $0xa18] ss:$80 sps:$4 sm:$0xff]  }
 0x15b   : > { %8385 = vmatpush1.bf16.msra.mxu0 %v11847_v35  ;;  %8549 = vmatpush1.bf16.msra.mxu1 %v11850_v37  ;;  %v11921_v35 = vld [vmem:[%s13585_s26 + $0xab4] ss:$80 sps:$4 sm:$0xff]   ;;  %v11924_v37 = vld [vmem:[%s13585_s26 + $0xabc] ss:$80 sps:$4 sm:$0xff]  }
 0x15c   : > { %8386 = vmatprep.subr.bf16.mxu0 %v11855_v39  ;;  %8550 = vmatprep.subr.bf16.mxu1 %v11858_v42  ;;  %v11919_v39 = vld [vmem:[%s13585_s26 + $0xab0] ss:$80 sps:$4 sm:$0xff]   ;;  %v11922_v42 = vld [vmem:[%s13585_s26 + $0xab8] ss:$80 sps:$4 sm:$0xff]  }
 0x15f   : > { %8387 = vmatpush1.bf16.msra.mxu0 %v11853_v43  ;;  %8551 = vmatpush1.bf16.msra.mxu1 %v11856_v44  ;;  %v11927_v43 = vld [vmem:[%s13585_s26 + $0xb54] ss:$80 sps:$4 sm:$0xff]   ;;  %v11930_v44 = vld [vmem:[%s13585_s26 + $0xb5c] ss:$80 sps:$4 sm:$0xff]  }
 0x160   : > { %8388 = vmatprep.subr.bf16.mxu0 %v11861_v45  ;;  %8552 = vmatprep.subr.bf16.mxu1 %v11864_v47  ;;  %v11925_v45 = vld [vmem:[%s13585_s26 + $0xb50] ss:$80 sps:$4 sm:$0xff]   ;;  %v11928_v47 = vld [vmem:[%s13585_s26 + $0xb58] ss:$80 sps:$4 sm:$0xff]  }
 0x163   : > { %8389 = vmatpush1.bf16.msra.mxu0 %v11859_v48  ;;  %8553 = vmatpush1.bf16.msra.mxu1 %v11862_v51  ;;  %v11933_v48 = vld [vmem:[%s13585_s26 + $0xbf4] ss:$80 sps:$4 sm:$0xff]   ;;  %v11936_v51 = vld [vmem:[%s13585_s26 + $0xbfc] ss:$80 sps:$4 sm:$0xff]  }
 0x164   : > { %8390 = vmatprep.subr.bf16.mxu0 %v11867_v52  ;;  %8554 = vmatprep.subr.bf16.mxu1 %v11870_v53  ;;  %v11931_v52 = vld [vmem:[%s13585_s26 + $0xbf0] ss:$80 sps:$4 sm:$0xff]   ;;  %v11934_v53 = vld [vmem:[%s13585_s26 + $0xbf8] ss:$80 sps:$4 sm:$0xff]  }
 0x167   : > { %8391 = vmatpush1.bf16.msra.mxu0 %v11865_v56  ;;  %8555 = vmatpush1.bf16.msra.mxu1 %v11868_v57  ;;  %v11939_v56 = vld [vmem:[%s13585_s26 + $0xc94] ss:$80 sps:$4 sm:$0xff]   ;;  %v11942_v57 = vld [vmem:[%s13585_s26 + $0xc9c] ss:$80 sps:$4 sm:$0xff]  }
 0x168   : > { %8392 = vmatprep.subr.bf16.mxu0 %v11873_v58  ;;  %8556 = vmatprep.subr.bf16.mxu1 %v11876_v59  ;;  %v11937_v58 = vld [vmem:[%s13585_s26 + $0xc90] ss:$80 sps:$4 sm:$0xff]   ;;  %v11940_v59 = vld [vmem:[%s13585_s26 + $0xc98] ss:$80 sps:$4 sm:$0xff]  }
 0x16b   : > { %8393 = vmatpush1.bf16.msra.mxu0 %v11871_v60  ;;  %8557 = vmatpush1.bf16.msra.mxu1 %v11874_v61  ;;  %v11945_v60 = vld [vmem:[%s13585_s26 + $0xd34] ss:$80 sps:$4 sm:$0xff]   ;;  %v11948_v61 = vld [vmem:[%s13585_s26 + $0xd3c] ss:$80 sps:$4 sm:$0xff]  }
 0x16c   : > { %8394 = vmatprep.subr.bf16.mxu0 %v11879_v63  ;;  %8558 = vmatprep.subr.bf16.mxu1 %v11882_v0  ;;  %v11943_v63 = vld [vmem:[%s13585_s26 + $0xd30] ss:$80 sps:$4 sm:$0xff]   ;;  %v11946_v0 = vld [vmem:[%s13585_s26 + $0xd38] ss:$80 sps:$4 sm:$0xff]  }
 0x16f   : > { %8395 = vmatpush1.bf16.msra.mxu0 %v11877_v2  ;;  %8559 = vmatpush1.bf16.msra.mxu1 %v11880_v3  ;;  %v11951_v2 = vld [vmem:[%s13585_s26 + $0xdd4] ss:$80 sps:$4 sm:$0xff]   ;;  %v11954_v3 = vld [vmem:[%s13585_s26 + $0xddc] ss:$80 sps:$4 sm:$0xff]  }
 0x170   : > { %8396 = vmatprep.subr.bf16.mxu0 %v11885_v4  ;;  %8560 = vmatprep.subr.bf16.mxu1 %v11888_v6  ;;  %v11949_v4 = vld [vmem:[%s13585_s26 + $0xdd0] ss:$80 sps:$4 sm:$0xff]   ;;  %v11952_v6 = vld [vmem:[%s13585_s26 + $0xdd8] ss:$80 sps:$4 sm:$0xff]  }
 0x173   : > { %8397 = vmatpush1.bf16.msra.mxu0 %v11883_v7  ;;  %8561 = vmatpush1.bf16.msra.mxu1 %v11886_v8  ;;  %v11957_v7 = vld [vmem:[%s13585_s26 + $0xe74] ss:$80 sps:$4 sm:$0xff]   ;;  %v11960_v8 = vld [vmem:[%s13585_s26 + $0xe7c] ss:$80 sps:$4 sm:$0xff]  }
 0x174   : > { %8398 = vmatprep.subr.bf16.mxu0 %v11891_v10  ;;  %8562 = vmatprep.subr.bf16.mxu1 %v11894_v11  ;;  %v11955_v10 = vld [vmem:[%s13585_s26 + $0xe70] ss:$80 sps:$4 sm:$0xff]   ;;  %v11958_v11 = vld [vmem:[%s13585_s26 + $0xe78] ss:$80 sps:$4 sm:$0xff]  }
 0x177   : > { %8399 = vmatpush1.bf16.msra.mxu0 %v11889_v41  ;;  %8563 = vmatpush1.bf16.msra.mxu1 %v11892_v12  ;;  %v11963_v41 = vld [vmem:[%s13585_s26 + $0xf14] ss:$80 sps:$4 sm:$0xff]   ;;  %v11966_v12 = vld [vmem:[%s13585_s26 + $0xf1c] ss:$80 sps:$4 sm:$0xff]  }
 0x178   : > { %8400 = vmatprep.subr.bf16.mxu0 %v11897_v14  ;;  %8564 = vmatprep.subr.bf16.mxu1 %v11900_v16  ;;  %v11961_v14 = vld [vmem:[%s13585_s26 + $0xf10] ss:$80 sps:$4 sm:$0xff]   ;;  %v11964_v16 = vld [vmem:[%s13585_s26 + $0xf18] ss:$80 sps:$4 sm:$0xff]  }
 0x17b   : > { %8401 = vmatpush1.bf16.msra.mxu0 %v11895_v18  ;;  %8565 = vmatpush1.bf16.msra.mxu1 %v11898_v19  ;;  %v11969_v18 = vld [vmem:[%s13585_s26 + $0xfb4] ss:$80 sps:$4 sm:$0xff]   ;;  %v11972_v19 = vld [vmem:[%s13585_s26 + $0xfbc] ss:$80 sps:$4 sm:$0xff]  }
 0x17c   : > { %8402 = vmatprep.subr.bf16.mxu0 %v11903_v21  ;;  %8566 = vmatprep.subr.bf16.mxu1 %v11906_v22  ;;  %v11967_v21 = vld [vmem:[%s13585_s26 + $0xfb0] ss:$80 sps:$4 sm:$0xff]   ;;  %v11970_v22 = vld [vmem:[%s13585_s26 + $0xfb8] ss:$80 sps:$4 sm:$0xff]  }
 0x17f   : > { %8403 = vmatpush1.bf16.msra.mxu0 %v11901_v23  ;;  %8567 = vmatpush1.bf16.msra.mxu1 %v11904_v24  ;;  %v11975_v23 = vld [vmem:[%s13585_s26 + $0x1054] ss:$80 sps:$4 sm:$0xff]   ;;  %v11978_v24 = vld [vmem:[%s13585_s26 + $0x105c] ss:$80 sps:$4 sm:$0xff]  }
 0x180   : > { %8404 = vmatprep.subr.bf16.mxu0 %v11909_v25  ;;  %8568 = vmatprep.subr.bf16.mxu1 %v11912_v26  ;;  %v11973_v25 = vld [vmem:[%s13585_s26 + $0x1050] ss:$80 sps:$4 sm:$0xff]   ;;  %v11976_v26 = vld [vmem:[%s13585_s26 + $0x1058] ss:$80 sps:$4 sm:$0xff]  }
 0x183   : > { %8405 = vmatpush1.bf16.msra.mxu0 %v11907_v27  ;;  %8569 = vmatpush1.bf16.msra.mxu1 %v11910_v29  ;;  %v11981_v27 = vld [vmem:[%s13585_s26 + $0x10f4] ss:$80 sps:$4 sm:$0xff]   ;;  %v11984_v29 = vld [vmem:[%s13585_s26 + $0x10fc] ss:$80 sps:$4 sm:$0xff]  }
 0x184   : > { %8415 = vmatprep.subr.bf16.mxu0 %v11915_v30  ;;  %8579 = vmatprep.subr.bf16.mxu1 %v11918_v31  ;;  %v11979_v30 = vld [vmem:[%s13585_s26 + $0x10f0] ss:$80 sps:$4 sm:$0xff]   ;;  %v11982_v31 = vld [vmem:[%s13585_s26 + $0x10f8] ss:$80 sps:$4 sm:$0xff]  }
 0x186   : > { %8407 = vmatmul.mubr.bf16.vlgmr.msra.gmra.mrb[4].mxu0 %v13685_v13  ;;  %8571 = vmatmul.mubr.bf16.vlgmr.msra.gmra.mrb[4].mxu1 %v13685_v13 }
 0x187   : > { %8416 = vmatpush1.bf16.msra.mxu0 %v11913_v49  ;;  %8580 = vmatpush1.bf16.msra.mxu1 %v11916_v34  ;;  %v11987_v49 = vld [vmem:[%s13585_s26 + $0x1194] ss:$80 sps:$4 sm:$0xff]   ;;  %v11990_v34 = vld [vmem:[%s13585_s26 + $0x119c] ss:$80 sps:$4 sm:$0xff]  }
 0x188   : > { %8417 = vmatprep.subr.bf16.mxu0 %v11921_v35  ;;  %8581 = vmatprep.subr.bf16.mxu1 %v11924_v37  ;;  %v11985_v35 = vld [vmem:[%s13585_s26 + $0x1190] ss:$80 sps:$4 sm:$0xff]   ;;  %v11988_v37 = vld [vmem:[%s13585_s26 + $0x1198] ss:$80 sps:$4 sm:$0xff]  }
 0x189   : > { %8447 = vmatprep.mubr.bf16.mxu0 %v13690_v17  ;;  %8611 = vmatprep.mubr.bf16.mxu1 %v13690_v17 }
 0x18b   : > { %8418 = vmatpush1.bf16.msra.mxu0 %v11919_v39  ;;  %8582 = vmatpush1.bf16.msra.mxu1 %v11922_v42  ;;  %v11993_v39 = vld [vmem:[%s13585_s26 + $0x1234] ss:$80 sps:$4 sm:$0xff]   ;;  %v11996_v42 = vld [vmem:[%s13585_s26 + $0x123c] ss:$80 sps:$4 sm:$0xff]  }
 0x18c   : > { %8419 = vmatprep.subr.bf16.mxu0 %v11927_v43  ;;  %8583 = vmatprep.subr.bf16.mxu1 %v11930_v44  ;;  %v11991_v43 = vld [vmem:[%s13585_s26 + $0x1230] ss:$80 sps:$4 sm:$0xff]   ;;  %v11994_v44 = vld [vmem:[%s13585_s26 + $0x1238] ss:$80 sps:$4 sm:$0xff]  }
 0x18f   : > { %8420 = vmatpush1.bf16.msra.mxu0 %v11925_v45  ;;  %8584 = vmatpush1.bf16.msra.mxu1 %v11928_v47  ;;  %v11999_v45 = vld [vmem:[%s13585_s26 + $0x12d4] ss:$80 sps:$4 sm:$0xff]   ;;  %v12002_v47 = vld [vmem:[%s13585_s26 + $0x12dc] ss:$80 sps:$4 sm:$0xff]  }
 0x190   : > { %8421 = vmatprep.subr.bf16.mxu0 %v11933_v48  ;;  %8585 = vmatprep.subr.bf16.mxu1 %v11936_v51  ;;  %v11997_v48 = vld [vmem:[%s13585_s26 + $0x12d0] ss:$80 sps:$4 sm:$0xff]   ;;  %v12000_v51 = vld [vmem:[%s13585_s26 + $0x12d8] ss:$80 sps:$4 sm:$0xff]  }
 0x193   : > { %8422 = vmatpush1.bf16.msra.mxu0 %v11931_v52  ;;  %8586 = vmatpush1.bf16.msra.mxu1 %v11934_v53  ;;  %v12005_v52 = vld [vmem:[%s13585_s26 + $0x1374] ss:$80 sps:$4 sm:$0xff]   ;;  %v12008_v53 = vld [vmem:[%s13585_s26 + $0x137c] ss:$80 sps:$4 sm:$0xff]  }
 0x194   : > { %8423 = vmatprep.subr.bf16.mxu0 %v11939_v56  ;;  %8587 = vmatprep.subr.bf16.mxu1 %v11942_v57  ;;  %v12003_v56 = vld [vmem:[%s13585_s26 + $0x1370] ss:$80 sps:$4 sm:$0xff]   ;;  %v12006_v57 = vld [vmem:[%s13585_s26 + $0x1378] ss:$80 sps:$4 sm:$0xff]  }
 0x197   : > { %8424 = vmatpush1.bf16.msra.mxu0 %v11937_v58  ;;  %8588 = vmatpush1.bf16.msra.mxu1 %v11940_v59  ;;  %v12011_v58 = vld [vmem:[%s13585_s26 + $0x1414] ss:$80 sps:$4 sm:$0xff]   ;;  %v12014_v59 = vld [vmem:[%s13585_s26 + $0x141c] ss:$80 sps:$4 sm:$0xff]  }
 0x198   : > { %8425 = vmatprep.subr.bf16.mxu0 %v11945_v60  ;;  %8589 = vmatprep.subr.bf16.mxu1 %v11948_v61  ;;  %v12009_v60 = vld [vmem:[%s13585_s26 + $0x1410] ss:$80 sps:$4 sm:$0xff]   ;;  %v12012_v61 = vld [vmem:[%s13585_s26 + $0x1418] ss:$80 sps:$4 sm:$0xff]  }
 0x19b   : > { %8426 = vmatpush1.bf16.msra.mxu0 %v11943_v63  ;;  %8590 = vmatpush1.bf16.msra.mxu1 %v11946_v0  ;;  %v12017_v63 = vld [vmem:[%s13585_s26 + $0x14b4] ss:$80 sps:$4 sm:$0xff]   ;;  %v12020_v0 = vld [vmem:[%s13585_s26 + $0x14bc] ss:$80 sps:$4 sm:$0xff]  }
 0x19c   : > { %8427 = vmatprep.subr.bf16.mxu0 %v11951_v2  ;;  %8591 = vmatprep.subr.bf16.mxu1 %v11954_v3  ;;  %v12015_v2 = vld [vmem:[%s13585_s26 + $0x14b0] ss:$80 sps:$4 sm:$0xff]   ;;  %v12018_v3 = vld [vmem:[%s13585_s26 + $0x14b8] ss:$80 sps:$4 sm:$0xff]  }
 0x19f   : > { %8428 = vmatpush1.bf16.msra.mxu0 %v11949_v4  ;;  %8592 = vmatpush1.bf16.msra.mxu1 %v11952_v6  ;;  %v12023_v4 = vld [vmem:[%s13585_s26 + $0x1554] ss:$80 sps:$4 sm:$0xff]   ;;  %v12026_v6 = vld [vmem:[%s13585_s26 + $0x155c] ss:$80 sps:$4 sm:$0xff]  }
 0x1a0   : > { %8429 = vmatprep.subr.bf16.mxu0 %v11957_v7  ;;  %8593 = vmatprep.subr.bf16.mxu1 %v11960_v8  ;;  %v12021_v7 = vld [vmem:[%s13585_s26 + $0x1550] ss:$80 sps:$4 sm:$0xff]   ;;  %v12024_v8 = vld [vmem:[%s13585_s26 + $0x1558] ss:$80 sps:$4 sm:$0xff]  }
 0x1a3   : > { %8430 = vmatpush1.bf16.msra.mxu0 %v11955_v10  ;;  %8594 = vmatpush1.bf16.msra.mxu1 %v11958_v11  ;;  %v12029_v10 = vld [vmem:[%s13585_s26 + $0x15f4] ss:$80 sps:$4 sm:$0xff]   ;;  %v12032_v11 = vld [vmem:[%s13585_s26 + $0x15fc] ss:$80 sps:$4 sm:$0xff]  }
 0x1a4   : > { %8431 = vmatprep.subr.bf16.mxu0 %v11963_v41  ;;  %8595 = vmatprep.subr.bf16.mxu1 %v11966_v12  ;;  %v12027_v41 = vld [vmem:[%s13585_s26 + $0x15f0] ss:$80 sps:$4 sm:$0xff]   ;;  %v12030_v12 = vld [vmem:[%s13585_s26 + $0x15f8] ss:$80 sps:$4 sm:$0xff]  }
 0x1a7   : > { %8432 = vmatpush1.bf16.msra.mxu0 %v11961_v14  ;;  %8596 = vmatpush1.bf16.msra.mxu1 %v11964_v16  ;;  %v12035_v14 = vld [vmem:[%s13585_s26 + $0x1694] ss:$80 sps:$4 sm:$0xff]   ;;  %v12038_v16 = vld [vmem:[%s13585_s26 + $0x169c] ss:$80 sps:$4 sm:$0xff]  }
 0x1a8   : > { %8433 = vmatprep.subr.bf16.mxu0 %v11969_v18  ;;  %8597 = vmatprep.subr.bf16.mxu1 %v11972_v19  ;;  %v12033_v18 = vld [vmem:[%s13585_s26 + $0x1690] ss:$80 sps:$4 sm:$0xff]   ;;  %v12036_v19 = vld [vmem:[%s13585_s26 + $0x1698] ss:$80 sps:$4 sm:$0xff]  }
 0x1ab   : > { %8434 = vmatpush1.bf16.msra.mxu0 %v11967_v21  ;;  %8598 = vmatpush1.bf16.msra.mxu1 %v11970_v22  ;;  %v12041_v21 = vld [vmem:[%s13585_s26 + $0x1734] ss:$80 sps:$4 sm:$0xff]   ;;  %v12044_v22 = vld [vmem:[%s13585_s26 + $0x173c] ss:$80 sps:$4 sm:$0xff]  }
 0x1ac   : > { %8435 = vmatprep.subr.bf16.mxu0 %v11975_v23  ;;  %8599 = vmatprep.subr.bf16.mxu1 %v11978_v24  ;;  %v12039_v23 = vld [vmem:[%s13585_s26 + $0x1730] ss:$80 sps:$4 sm:$0xff]   ;;  %v12042_v24 = vld [vmem:[%s13585_s26 + $0x1738] ss:$80 sps:$4 sm:$0xff]  }
 0x1af   : > { %8436 = vmatpush1.bf16.msra.mxu0 %v11973_v25  ;;  %8600 = vmatpush1.bf16.msra.mxu1 %v11976_v26  ;;  %v12047_v25 = vld [vmem:[%s13585_s26 + $0x17d4] ss:$80 sps:$4 sm:$0xff]   ;;  %v12050_v26 = vld [vmem:[%s13585_s26 + $0x17dc] ss:$80 sps:$4 sm:$0xff]  }
 0x1b0   : > { %8437 = vmatprep.subr.bf16.mxu0 %v11981_v27  ;;  %8601 = vmatprep.subr.bf16.mxu1 %v11984_v29  ;;  %v12045_v27 = vld [vmem:[%s13585_s26 + $0x17d0] ss:$80 sps:$4 sm:$0xff]   ;;  %v12048_v29 = vld [vmem:[%s13585_s26 + $0x17d8] ss:$80 sps:$4 sm:$0xff]  }
 0x1b3   : > { %8438 = vmatpush1.bf16.msra.mxu0 %v11979_v30  ;;  %8602 = vmatpush1.bf16.msra.mxu1 %v11982_v31  ;;  %v12053_v30 = vld [vmem:[%s13585_s26 + $0x1874] ss:$80 sps:$4 sm:$0xff]   ;;  %v12056_v31 = vld [vmem:[%s13585_s26 + $0x187c] ss:$80 sps:$4 sm:$0xff]  }
 0x1b4   : > { %8439 = vmatprep.subr.bf16.mxu0 %v11987_v49  ;;  %8603 = vmatprep.subr.bf16.mxu1 %v11990_v34  ;;  %v12051_v49 = vld [vmem:[%s13585_s26 + $0x1870] ss:$80 sps:$4 sm:$0xff]   ;;  %v12054_v34 = vld [vmem:[%s13585_s26 + $0x1878] ss:$80 sps:$4 sm:$0xff]  }
 0x1b7   : > { %8440 = vmatpush1.bf16.msra.mxu0 %v11985_v35  ;;  %8604 = vmatpush1.bf16.msra.mxu1 %v11988_v37  ;;  %v12059_v35 = vld [vmem:[%s13585_s26 + $0x1914] ss:$80 sps:$4 sm:$0xff]   ;;  %v12062_v37 = vld [vmem:[%s13585_s26 + $0x191c] ss:$80 sps:$4 sm:$0xff]  }
 0x1b8   : > { %8441 = vmatprep.subr.bf16.mxu0 %v11993_v39  ;;  %8605 = vmatprep.subr.bf16.mxu1 %v11996_v42  ;;  %v12057_v39 = vld [vmem:[%s13585_s26 + $0x1910] ss:$80 sps:$4 sm:$0xff]   ;;  %v12060_v42 = vld [vmem:[%s13585_s26 + $0x1918] ss:$80 sps:$4 sm:$0xff]  }
 0x1bb   : > { %8442 = vmatpush1.bf16.msra.mxu0 %v11991_v43  ;;  %8606 = vmatpush1.bf16.msra.mxu1 %v11994_v44  ;;  %v12065_v43 = vld [vmem:[%s13585_s26 + $0x19b4] ss:$80 sps:$4 sm:$0xff]   ;;  %v12068_v44 = vld [vmem:[%s13585_s26 + $0x19bc] ss:$80 sps:$4 sm:$0xff]  }
 0x1bc   : > { %8443 = vmatprep.subr.bf16.mxu0 %v11999_v45  ;;  %8607 = vmatprep.subr.bf16.mxu1 %v12002_v47  ;;  %v12063_v45 = vld [vmem:[%s13585_s26 + $0x19b0] ss:$80 sps:$4 sm:$0xff]   ;;  %v12066_v47 = vld [vmem:[%s13585_s26 + $0x19b8] ss:$80 sps:$4 sm:$0xff]  }
 0x1bf   : > { %8444 = vmatpush1.bf16.msra.mxu0 %v11997_v48  ;;  %8608 = vmatpush1.bf16.msra.mxu1 %v12000_v51  ;;  %v12071_v48 = vld [vmem:[%s13585_s26 + $0x1a54] ss:$80 sps:$4 sm:$0xff]   ;;  %v12074_v51 = vld [vmem:[%s13585_s26 + $0x1a5c] ss:$80 sps:$4 sm:$0xff]  }
 0x1c0   : > { %8445 = vmatprep.subr.bf16.mxu0 %v12005_v52  ;;  %8609 = vmatprep.subr.bf16.mxu1 %v12008_v53  ;;  %v12069_v52 = vld [vmem:[%s13585_s26 + $0x1a50] ss:$80 sps:$4 sm:$0xff]   ;;  %v12072_v53 = vld [vmem:[%s13585_s26 + $0x1a58] ss:$80 sps:$4 sm:$0xff]  }
 0x1c3   : > { %8446 = vmatpush1.bf16.msra.mxu0 %v12003_v56  ;;  %8610 = vmatpush1.bf16.msra.mxu1 %v12006_v57  ;;  %v12077_v56 = vld [vmem:[%s13585_s26 + $0x1af4] ss:$80 sps:$4 sm:$0xff]   ;;  %v12080_v57 = vld [vmem:[%s13585_s26 + $0x1afc] ss:$80 sps:$4 sm:$0xff]  }
 0x1c4   : > { %8456 = vmatprep.subr.bf16.mxu0 %v12011_v58  ;;  %8620 = vmatprep.subr.bf16.mxu1 %v12014_v59  ;;  %v12075_v58 = vld [vmem:[%s13585_s26 + $0x1af0] ss:$80 sps:$4 sm:$0xff]   ;;  %v12078_v59 = vld [vmem:[%s13585_s26 + $0x1af8] ss:$80 sps:$4 sm:$0xff]  }
 0x1c6   : > { %8448 = vmatmul.mubr.bf16.vlgmr.msra.gmra.mrb[4].mxu0 %v13767_v28  ;;  %8612 = vmatmul.mubr.bf16.vlgmr.msra.gmra.mrb[4].mxu1 %v13767_v28 }
 0x1c7   : > { %8457 = vmatpush1.bf16.msra.mxu0 %v12009_v60  ;;  %8621 = vmatpush1.bf16.msra.mxu1 %v12012_v61  ;;  %v12083_v60 = vld [vmem:[%s13585_s26 + $0x1b94] ss:$80 sps:$4 sm:$0xff]   ;;  %v12086_v61 = vld [vmem:[%s13585_s26 + $0x1b9c] ss:$80 sps:$4 sm:$0xff]  }
 0x1c8   : > { %8458 = vmatprep.subr.bf16.mxu0 %v12017_v63  ;;  %8622 = vmatprep.subr.bf16.mxu1 %v12020_v0  ;;  %v12081_v63 = vld [vmem:[%s13585_s26 + $0x1b90] ss:$80 sps:$4 sm:$0xff]   ;;  %v12084_v0 = vld [vmem:[%s13585_s26 + $0x1b98] ss:$80 sps:$4 sm:$0xff]  }
 0x1c9   : > { %8488 = vmatprep.mubr.bf16.mxu0 %v13772_v32  ;;  %8652 = vmatprep.mubr.bf16.mxu1 %v13772_v32 }
 0x1cb   : > { %8459 = vmatpush1.bf16.msra.mxu0 %v12015_v2  ;;  %8623 = vmatpush1.bf16.msra.mxu1 %v12018_v3  ;;  %v12089_v2 = vld [vmem:[%s13585_s26 + $0x1c34] ss:$80 sps:$4 sm:$0xff]   ;;  %v12092_v3 = vld [vmem:[%s13585_s26 + $0x1c3c] ss:$80 sps:$4 sm:$0xff]  }
 0x1cc   : > { %8460 = vmatprep.subr.bf16.mxu0 %v12023_v4  ;;  %8624 = vmatprep.subr.bf16.mxu1 %v12026_v6  ;;  %v12087_v4 = vld [vmem:[%s13585_s26 + $0x1c30] ss:$80 sps:$4 sm:$0xff]   ;;  %v12090_v6 = vld [vmem:[%s13585_s26 + $0x1c38] ss:$80 sps:$4 sm:$0xff]  }
 0x1cf   : > { %8461 = vmatpush1.bf16.msra.mxu0 %v12021_v7  ;;  %8625 = vmatpush1.bf16.msra.mxu1 %v12024_v8  ;;  %v12095_v7 = vld [vmem:[%s13585_s26 + $0x1cd4] ss:$80 sps:$4 sm:$0xff]   ;;  %v12098_v8 = vld [vmem:[%s13585_s26 + $0x1cdc] ss:$80 sps:$4 sm:$0xff]  }
 0x1d0   : > { %8462 = vmatprep.subr.bf16.mxu0 %v12029_v10  ;;  %8626 = vmatprep.subr.bf16.mxu1 %v12032_v11  ;;  %v12093_v10 = vld [vmem:[%s13585_s26 + $0x1cd0] ss:$80 sps:$4 sm:$0xff]   ;;  %v12096_v11 = vld [vmem:[%s13585_s26 + $0x1cd8] ss:$80 sps:$4 sm:$0xff]  }
 0x1d3   : > { %8463 = vmatpush1.bf16.msra.mxu0 %v12027_v41  ;;  %8627 = vmatpush1.bf16.msra.mxu1 %v12030_v12  ;;  %v12101_v41 = vld [vmem:[%s13585_s26 + $0x1d74] ss:$80 sps:$4 sm:$0xff]   ;;  %v12104_v12 = vld [vmem:[%s13585_s26 + $0x1d7c] ss:$80 sps:$4 sm:$0xff]  }
 0x1d4   : > { %8464 = vmatprep.subr.bf16.mxu0 %v12035_v14  ;;  %8628 = vmatprep.subr.bf16.mxu1 %v12038_v16  ;;  %v12099_v14 = vld [vmem:[%s13585_s26 + $0x1d70] ss:$80 sps:$4 sm:$0xff]   ;;  %v12102_v16 = vld [vmem:[%s13585_s26 + $0x1d78] ss:$80 sps:$4 sm:$0xff]  }
 0x1d7   : > { %8465 = vmatpush1.bf16.msra.mxu0 %v12033_v18  ;;  %8629 = vmatpush1.bf16.msra.mxu1 %v12036_v19  ;;  %v12107_v18 = vld [vmem:[%s13585_s26 + $0x1e14] ss:$80 sps:$4 sm:$0xff]   ;;  %v12110_v19 = vld [vmem:[%s13585_s26 + $0x1e1c] ss:$80 sps:$4 sm:$0xff]  }
 0x1d8   : > { %8466 = vmatprep.subr.bf16.mxu0 %v12041_v21  ;;  %8630 = vmatprep.subr.bf16.mxu1 %v12044_v22  ;;  %v12105_v21 = vld [vmem:[%s13585_s26 + $0x1e10] ss:$80 sps:$4 sm:$0xff]   ;;  %v12108_v22 = vld [vmem:[%s13585_s26 + $0x1e18] ss:$80 sps:$4 sm:$0xff]  }
 0x1db   : > { %8467 = vmatpush1.bf16.msra.mxu0 %v12039_v23  ;;  %8631 = vmatpush1.bf16.msra.mxu1 %v12042_v24  ;;  %v12113_v23 = vld [vmem:[%s13585_s26 + $0x1eb4] ss:$80 sps:$4 sm:$0xff]   ;;  %v12116_v24 = vld [vmem:[%s13585_s26 + $0x1ebc] ss:$80 sps:$4 sm:$0xff]  }
 0x1dc   : > { %8468 = vmatprep.subr.bf16.mxu0 %v12047_v25  ;;  %8632 = vmatprep.subr.bf16.mxu1 %v12050_v26  ;;  %v12111_v25 = vld [vmem:[%s13585_s26 + $0x1eb0] ss:$80 sps:$4 sm:$0xff]   ;;  %v12114_v26 = vld [vmem:[%s13585_s26 + $0x1eb8] ss:$80 sps:$4 sm:$0xff]  }
 0x1df   : > { %8469 = vmatpush1.bf16.msra.mxu0 %v12045_v27  ;;  %8633 = vmatpush1.bf16.msra.mxu1 %v12048_v29  ;;  %v12119_v27 = vld [vmem:[%s13585_s26 + $0x1f54] ss:$80 sps:$4 sm:$0xff]   ;;  %v12122_v29 = vld [vmem:[%s13585_s26 + $0x1f5c] ss:$80 sps:$4 sm:$0xff]  }
 0x1e0   : > { %8470 = vmatprep.subr.bf16.mxu0 %v12053_v30  ;;  %8634 = vmatprep.subr.bf16.mxu1 %v12056_v31  ;;  %v12117_v30 = vld [vmem:[%s13585_s26 + $0x1f50] ss:$80 sps:$4 sm:$0xff]   ;;  %v12120_v31 = vld [vmem:[%s13585_s26 + $0x1f58] ss:$80 sps:$4 sm:$0xff]  }
 0x1e3   : > { %8471 = vmatpush1.bf16.msra.mxu0 %v12051_v49  ;;  %8635 = vmatpush1.bf16.msra.mxu1 %v12054_v34  ;;  %v12125_v49 = vld [vmem:[%s13585_s26 + $0x1ff4] ss:$80 sps:$4 sm:$0xff]   ;;  %v12128_v34 = vld [vmem:[%s13585_s26 + $0x1ffc] ss:$80 sps:$4 sm:$0xff]  }
 0x1e4   : > { %8472 = vmatprep.subr.bf16.mxu0 %v12059_v35  ;;  %8636 = vmatprep.subr.bf16.mxu1 %v12062_v37  ;;  %v12123_v35 = vld [vmem:[%s13585_s26 + $0x1ff0] ss:$80 sps:$4 sm:$0xff]   ;;  %v12126_v37 = vld [vmem:[%s13585_s26 + $0x1ff8] ss:$80 sps:$4 sm:$0xff]  }
 0x1e7   : > { %8473 = vmatpush1.bf16.msra.mxu0 %v12057_v39  ;;  %8637 = vmatpush1.bf16.msra.mxu1 %v12060_v42  ;;  %v12131_v39 = vld [vmem:[%s13585_s26 + $0x2094] ss:$80 sps:$4 sm:$0xff]   ;;  %v12134_v42 = vld [vmem:[%s13585_s26 + $0x209c] ss:$80 sps:$4 sm:$0xff]  }
 0x1e8   : > { %8474 = vmatprep.subr.bf16.mxu0 %v12065_v43  ;;  %8638 = vmatprep.subr.bf16.mxu1 %v12068_v44  ;;  %v12129_v43 = vld [vmem:[%s13585_s26 + $0x2090] ss:$80 sps:$4 sm:$0xff]   ;;  %v12132_v44 = vld [vmem:[%s13585_s26 + $0x2098] ss:$80 sps:$4 sm:$0xff]  }
 0x1eb   : > { %8475 = vmatpush1.bf16.msra.mxu0 %v12063_v45  ;;  %8639 = vmatpush1.bf16.msra.mxu1 %v12066_v47  ;;  %v1540_v45 = vld [vmem:[%s14160_s30] sm:$0xff] }
 0x1ec   : > { %8476 = vmatprep.subr.bf16.mxu0 %v12071_v48  ;;  %8640 = vmatprep.subr.bf16.mxu1 %v12074_v51  ;;  %v12137_v47 = vld [vmem:[%s13585_s26 + $0x2134] ss:$80 sps:$4 sm:$0xff]   ;;  %v12140_v48 = vld [vmem:[%s13585_s26 + $0x213c] ss:$80 sps:$4 sm:$0xff]   ;;  %v13455_v51 = vmov 1966171168  }
 0x1ef   : > { %8477 = vmatpush1.bf16.msra.mxu0 %v12069_v52  ;;  %8641 = vmatpush1.bf16.msra.mxu1 %v12072_v53  ;;  %v9731_v52 = vunpack.c.l.s4 %v13455_v51  ;;  %v7949_v53 = vrot.slane %v1540_v45, %v13668_v1  ;;  %v12167_v51 = vld [vmem:[%s13585_s26 + $0x2454] ss:$80 sps:$4 sm:$0xff]  }
 0x1f0   : > { %8478 = vmatprep.subr.bf16.mxu0 %v12077_v56  ;;  %8642 = vmatprep.subr.bf16.mxu1 %v12080_v57  ;;  %v7957_v56 = vrot.slane %v1540_v45, %v13750_v15  ;;  %v7953_v57 = vrot.slane %v1540_v45, %v13639_v46 }
 0x1f3   : > { %8479 = vmatpush1.bf16.msra.mxu0 %v12075_v58  ;;  %8643 = vmatpush1.bf16.msra.mxu1 %v12078_v59  ;;  %v7961_v58 = vrot.slane %v1540_v45, %v13674_v5  ;;  %v12135_v59 = vld [vmem:[%s13585_s26 + $0x2130] ss:$80 sps:$4 sm:$0xff]   ;;  %v12164_v45 = vld [vmem:[%s13585_s26 + $0x23bc] ss:$80 sps:$4 sm:$0xff]  }
 0x1f4   : > { %8480 = vmatprep.subr.bf16.mxu0 %v12083_v60  ;;  %8644 = vmatprep.subr.bf16.mxu1 %v12086_v61  ;;  %v12138_v60 = vld [vmem:[%s13585_s26 + $0x2138] ss:$80 sps:$4 sm:$0xff]   ;;  %v12143_v61 = vld [vmem:[%s13585_s26 + $0x21d4] ss:$80 sps:$4 sm:$0xff]  }
 0x1f7   : > { %8481 = vmatpush1.bf16.msra.mxu0 %v12081_v63  ;;  %8645 = vmatpush1.bf16.msra.mxu1 %v12084_v0  ;;  %v12146_v63 = vld [vmem:[%s13585_s26 + $0x21dc] ss:$80 sps:$4 sm:$0xff]  }
 0x1f8   : > { %8482 = vmatprep.subr.bf16.mxu0 %v12089_v2  ;;  %8646 = vmatprep.subr.bf16.mxu1 %v12092_v3  ;;  %v9732_v3 = vunpack.c.0.s8 %v9731_v52  ;;  %v12170_v52 = vld [vmem:[%s13585_s26 + $0x245c] ss:$80 sps:$4 sm:$0xff]  }
 0x1fb   : > { %8483 = vmatpush1.bf16.msra.mxu0 %v12087_v4  ;;  %8647 = vmatpush1.bf16.msra.mxu1 %v12090_v6  ;;  %v12141_v4 = vld [vmem:[%s13585_s26 + $0x21d0] ss:$80 sps:$4 sm:$0xff]  }
 0x1fc   : > { %8484 = vmatprep.subr.bf16.mxu0 %v12095_v7  ;;  %8648 = vmatprep.subr.bf16.mxu1 %v12098_v8 }
 0x1ff   : > { %8485 = vmatpush1.bf16.msra.mxu0 %v12093_v10  ;;  %8649 = vmatpush1.bf16.msra.mxu1 %v12096_v11 }
 0x200   : > { %8486 = vmatprep.subr.bf16.mxu0 %v12101_v41  ;;  %8650 = vmatprep.subr.bf16.mxu1 %v12104_v12 }
 0x203   : > { %8487 = vmatpush1.bf16.msra.mxu0 %v12099_v14  ;;  %8651 = vmatpush1.bf16.msra.mxu1 %v12102_v16  ;;  %v12144_v16 = vld [vmem:[%s13585_s26 + $0x21d8] ss:$80 sps:$4 sm:$0xff]  }
 0x204   : > { %8497 = vmatprep.subr.bf16.mxu0 %v12107_v18  ;;  %8661 = vmatprep.subr.bf16.mxu1 %v12110_v19  ;;  %v12149_v18 = vld [vmem:[%s13585_s26 + $0x2274] ss:$80 sps:$4 sm:$0xff]  }
 0x206   : > { %8489 = vmatmul.mubr.bf16.vlgmr.msra.gmra.mrb[4].mxu0 %v13854_v50  ;;  %8653 = vmatmul.mubr.bf16.vlgmr.msra.gmra.mrb[4].mxu1 %v13854_v50 }
 0x207   : > { %8498 = vmatpush1.bf16.msra.mxu0 %v12105_v21  ;;  %8662 = vmatpush1.bf16.msra.mxu1 %v12108_v22 }
 0x208   : > { %8499 = vmatprep.subr.bf16.mxu0 %v12113_v23  ;;  %8663 = vmatprep.subr.bf16.mxu1 %v12116_v24  ;;  %v12152_v24 = vld [vmem:[%s13585_s26 + $0x227c] ss:$80 sps:$4 sm:$0xff]  }
 0x209   : > { %8529 = vmatprep.mubr.bf16.mxu0 %v13859_v54  ;;  %8693 = vmatprep.mubr.bf16.mxu1 %v13859_v54 }
 0x20b   : > { %8500 = vmatpush1.bf16.msra.mxu0 %v12111_v25  ;;  %8664 = vmatpush1.bf16.msra.mxu1 %v12114_v26  ;;  %v14180_v26 = vsub.s32 %v9732_v3, %v13631_v40  ;;  %v12185_v3 = vld [vmem:[%s13585_s26 + $0x2634] ss:$80 sps:$4 sm:$0xff]  }
 0x20c   : > { %8501 = vmatprep.subr.bf16.mxu0 %v12119_v27  ;;  %8665 = vmatprep.subr.bf16.mxu1 %v12122_v29 }
 0x20f   : > { %8502 = vmatpush1.bf16.msra.mxu0 %v12117_v30  ;;  %8666 = vmatpush1.bf16.msra.mxu1 %v12120_v31  ;;  %v12147_v31 = vld [vmem:[%s13585_s26 + $0x2270] ss:$80 sps:$4 sm:$0xff]  }
 0x210   : > { %8503 = vmatprep.subr.bf16.mxu0 %v12125_v49  ;;  %8667 = vmatprep.subr.bf16.mxu1 %v12128_v34  ;;  %v12150_v49 = vld [vmem:[%s13585_s26 + $0x2278] ss:$80 sps:$4 sm:$0xff]   ;;  %v12155_v34 = vld [vmem:[%s13585_s26 + $0x2314] ss:$80 sps:$4 sm:$0xff]  }
 0x213   : > { %8504 = vmatpush1.bf16.msra.mxu0 %v12123_v35  ;;  %8668 = vmatpush1.bf16.msra.mxu1 %v12126_v37  ;;  %v12158_v35 = vld [vmem:[%s13585_s26 + $0x231c] ss:$80 sps:$4 sm:$0xff]  }
 0x214   : > { %8505 = vmatprep.subr.bf16.mxu0 %v12131_v39  ;;  %8669 = vmatprep.subr.bf16.mxu1 %v12134_v42  ;;  %v12153_v42 = vld [vmem:[%s13585_s26 + $0x2310] ss:$80 sps:$4 sm:$0xff]  }
 0x217   : > { %8506 = vmatpush1.bf16.msra.mxu0 %v12129_v43  ;;  %8670 = vmatpush1.bf16.msra.mxu1 %v12132_v44  ;;  %v12156_v43 = vld [vmem:[%s13585_s26 + $0x2318] ss:$80 sps:$4 sm:$0xff]   ;;  %v12161_v44 = vld [vmem:[%s13585_s26 + $0x23b4] ss:$80 sps:$4 sm:$0xff]  }
 0x218   : > { %8507 = vmatprep.subr.bf16.mxu0 %v12137_v47  ;;  %8671 = vmatprep.subr.bf16.mxu1 %v12140_v48  ;;  %v12159_v47 = vld [vmem:[%s13585_s26 + $0x23b0] ss:$80 sps:$4 sm:$0xff]   ;;  %v12162_v48 = vld [vmem:[%s13585_s26 + $0x23b8] ss:$80 sps:$4 sm:$0xff]  }
 0x219   : > { %v8203_v0 = vpop.f32.mrb[0].mxu0  ;;  %v8367_v2 = vpop.f32.mrb[0].mxu1 }
 0x21a   : > { %v11248_v6 = vadd.f32 %v8203_v0, %v7949_v53  ;;  %v11250_v7 = vadd.f32 %v8367_v2, %v7957_v56  ;;  %v8205_v8 = vpop.f32.mrb[1].mxu0  ;;  %v8369_v10 = vpop.f32.mrb[1].mxu1  ;;  %v12165_v53 = vld [vmem:[%s13585_s26 + $0x2450] ss:$80 sps:$4 sm:$0xff]   ;;  %v12168_v56 = vld [vmem:[%s13585_s26 + $0x2458] ss:$80 sps:$4 sm:$0xff]  }
 0x21b   : > { %v11249_v11 = vadd.f32 %v8205_v8, %v7953_v57  ;;  %v11251_v41 = vadd.f32 %v8369_v10, %v7961_v58  ;;  %v8207_v12 = vpop.f32.mrb[2].mxu0  ;;  %v8371_v14 = vpop.f32.mrb[2].mxu1  ;;  %8508 = vmatpush1.bf16.msra.mxu0 %v12135_v59  ;;  %8672 = vmatpush1.bf16.msra.mxu1 %v12138_v60  ;;  %v12173_v57 = vld [vmem:[%s13585_s26 + $0x24f4] ss:$80 sps:$4 sm:$0xff]   ;;  %v12176_v58 = vld [vmem:[%s13585_s26 + $0x24fc] ss:$80 sps:$4 sm:$0xff]  }
 0x21c   : > { %v9686_v19 = vmax.f32 %v11248_v6, 0.0  ;;  %v9688_v21 = vmax.f32 %v11250_v7, 0.0  ;;  %v8208_v22 = vpop.f32.mrb[3].mxu0  ;;  %v8372_v23 = vpop.f32.mrb[3].mxu1  ;;  %8509 = vmatprep.subr.bf16.mxu0 %v12143_v61  ;;  %8673 = vmatprep.subr.bf16.mxu1 %v12146_v63  ;;  %v12171_v59 = vld [vmem:[%s13585_s26 + $0x24f0] ss:$80 sps:$4 sm:$0xff]  }
 0x21d   : > { %v9687_v25 = vmax.f32 %v11249_v11, 0.0  ;;  %v9689_v27 = vmax.f32 %v11251_v41, 0.0  ;;  %v12174_v60 = vld [vmem:[%s13585_s26 + $0x24f8] ss:$80 sps:$4 sm:$0xff]   ;;  %v12179_v61 = vld [vmem:[%s13585_s26 + $0x2594] ss:$80 sps:$4 sm:$0xff]  }
 0x21e   : > { %v12182_v63 = vld [vmem:[%s13585_s26 + $0x259c] ss:$80 sps:$4 sm:$0xff]   ;;  %v12177_v0 = vld [vmem:[%s13585_s26 + $0x2590] ss:$80 sps:$4 sm:$0xff]   ;;  %v12180_v2 = vld [vmem:[%s13585_s26 + $0x2598] ss:$80 sps:$4 sm:$0xff]  }
 0x21f   : > { %v9726_v29 = vcombine.low %v9686_v19, %v9687_v25  ;;  %v9727_v30 = vcombine.low %v9688_v21, %v9689_v27  ;;  %8510 = vmatpush1.bf16.msra.mxu0 %v12141_v4  ;;  %8674 = vmatpush1.bf16.msra.mxu1 %v12144_v16  ;;  %v12188_v4 = vld [vmem:[%s13585_s26 + $0x263c] ss:$80 sps:$4 sm:$0xff]   ;;  %v12183_v6 = vld [vmem:[%s13585_s26 + $0x2630] ss:$80 sps:$4 sm:$0xff]   ;;  %v12186_v7 = vld [vmem:[%s13585_s26 + $0x2638] ss:$80 sps:$4 sm:$0xff]  }
 0x220   : > { %8511 = vmatprep.subr.bf16.mxu0 %v12149_v18  ;;  %8675 = vmatprep.subr.bf16.mxu1 %v12152_v24  ;;  %v12191_v8 = vld [vmem:[%s13585_s26 + $0x26d4] ss:$80 sps:$4 sm:$0xff]   ;;  %v12194_v10 = vld [vmem:[%s13585_s26 + $0x26dc] ss:$80 sps:$4 sm:$0xff]   ;;  %v12189_v11 = vld [vmem:[%s13585_s26 + $0x26d0] ss:$80 sps:$4 sm:$0xff]  }
 0x221   : > { %v9736_v40 = vrot.slane %v9726_v29, %v14180_v26  ;;  %v9743_v37 = vrot.slane %v9727_v30, %v14180_v26  ;;  %v12192_v41 = vld [vmem:[%s13585_s26 + $0x26d8] ss:$80 sps:$4 sm:$0xff]   ;;  %v12197_v12 = vld [vmem:[%s13585_s26 + $0x2774] ss:$80 sps:$4 sm:$0xff]   ;;  %v12200_v14 = vld [vmem:[%s13585_s26 + $0x277c] ss:$80 sps:$4 sm:$0xff]  }
 0x222   : > { %v12195_v16 = vld [vmem:[%s13585_s26 + $0x2770] ss:$80 sps:$4 sm:$0xff]   ;;  %v12198_v18 = vld [vmem:[%s13585_s26 + $0x2778] ss:$80 sps:$4 sm:$0xff]   ;;  %v12203_v19 = vld [vmem:[%s13585_s26 + $0x24] ss:$80 sps:$4 sm:$0xff]  }
 0x223   : > { %v14188_v39 = vcombine.low %v9736_v40, %v9743_v37  ;;  %8512 = vmatpush1.bf16.msra.mxu0 %v12147_v31  ;;  %8676 = vmatpush1.bf16.msra.mxu1 %v12150_v49  ;;  %v12206_v21 = vld [vmem:[%s13585_s26 + $0x2c] ss:$80 sps:$4 sm:$0xff]   ;;  %v12201_v22 = vld [vmem:[%s13585_s26 + $0x20] ss:$80 sps:$4 sm:$0xff]   ;;  %v12204_v23 = vld [vmem:[%s13585_s26 + $0x28] ss:$80 sps:$4 sm:$0xff]  }
 0x224   : > { %8513 = vmatprep.subr.bf16.mxu0 %v12155_v34  ;;  %8677 = vmatprep.subr.bf16.mxu1 %v12158_v35  ;;  %v12209_v24 = vld [vmem:[%s13585_s26 + $0xc4] ss:$80 sps:$4 sm:$0xff]   ;;  %v12212_v25 = vld [vmem:[%s13585_s26 + $0xcc] ss:$80 sps:$4 sm:$0xff]   ;;  %v12207_v27 = vld [vmem:[%s13585_s26 + $0xc0] ss:$80 sps:$4 sm:$0xff]  }
 0x225   : > { %v12210_v29 = vld [vmem:[%s13585_s26 + $0xc8] ss:$80 sps:$4 sm:$0xff]   ;;  %v12215_v30 = vld [vmem:[%s13585_s26 + $0x164] ss:$80 sps:$4 sm:$0xff]   ;;  %v12218_v31 = vld [vmem:[%s13585_s26 + $0x16c] ss:$80 sps:$4 sm:$0xff]  }
 0x226   : > { %v12213_v49 = vld [vmem:[%s13585_s26 + $0x160] ss:$80 sps:$4 sm:$0xff]   ;;  %v12216_v34 = vld [vmem:[%s13585_s26 + $0x168] ss:$80 sps:$4 sm:$0xff]   ;;  %v12221_v35 = vld [vmem:[%s13585_s26 + $0x204] ss:$80 sps:$4 sm:$0xff]  }
 0x227   : > { %8514 = vmatpush1.bf16.msra.mxu0 %v12153_v42  ;;  %8678 = vmatpush1.bf16.msra.mxu1 %v12156_v43  ;;  %v12224_v40 = vld [vmem:[%s13585_s26 + $0x20c] ss:$80 sps:$4 sm:$0xff]   ;;  %v12219_v37 = vld [vmem:[%s13585_s26 + $0x200] ss:$80 sps:$4 sm:$0xff]   ;;  %v12222_v42 = vld [vmem:[%s13585_s26 + $0x208] ss:$80 sps:$4 sm:$0xff]  }
 0x228   : > { %8515 = vmatprep.subr.bf16.mxu0 %v12161_v44  ;;  %8679 = vmatprep.subr.bf16.mxu1 %v12164_v45  ;;  %v12227_v43 = vld [vmem:[%s13585_s26 + $0x2a4] ss:$80 sps:$4 sm:$0xff]   ;;  %v12230_v44 = vld [vmem:[%s13585_s26 + $0x2ac] ss:$80 sps:$4 sm:$0xff]   ;;  %v12225_v45 = vld [vmem:[%s13585_s26 + $0x2a0] ss:$80 sps:$4 sm:$0xff]  }
 0x22b   : > { %8516 = vmatpush1.bf16.msra.mxu0 %v12159_v47  ;;  %8680 = vmatpush1.bf16.msra.mxu1 %v12162_v48  ;;  %v12228_v47 = vld [vmem:[%s13585_s26 + $0x2a8] ss:$80 sps:$4 sm:$0xff]   ;;  %v12233_v48 = vld [vmem:[%s13585_s26 + $0x344] ss:$80 sps:$4 sm:$0xff]  }
 0x22c   : > { %8517 = vmatprep.subr.bf16.mxu0 %v12167_v51  ;;  %8681 = vmatprep.subr.bf16.mxu1 %v12170_v52  ;;  %v12236_v51 = vld [vmem:[%s13585_s26 + $0x34c] ss:$80 sps:$4 sm:$0xff]   ;;  %v12231_v52 = vld [vmem:[%s13585_s26 + $0x340] ss:$80 sps:$4 sm:$0xff]  }
 0x22f   : > { %8518 = vmatpush1.bf16.msra.mxu0 %v12165_v53  ;;  %8682 = vmatpush1.bf16.msra.mxu1 %v12168_v56  ;;  %v12234_v53 = vld [vmem:[%s13585_s26 + $0x348] ss:$80 sps:$4 sm:$0xff]   ;;  %v12239_v56 = vld [vmem:[%s13585_s26 + $0x3e4] ss:$80 sps:$4 sm:$0xff]  }
 0x230   : > { %8519 = vmatprep.subr.bf16.mxu0 %v12173_v57  ;;  %8683 = vmatprep.subr.bf16.mxu1 %v12176_v58  ;;  %v12242_v57 = vld [vmem:[%s13585_s26 + $0x3ec] ss:$80 sps:$4 sm:$0xff]   ;;  %v12237_v58 = vld [vmem:[%s13585_s26 + $0x3e0] ss:$80 sps:$4 sm:$0xff]  }
 0x233   : > { %8520 = vmatpush1.bf16.msra.mxu0 %v12171_v59  ;;  %8684 = vmatpush1.bf16.msra.mxu1 %v12174_v60  ;;  %v12240_v59 = vld [vmem:[%s13585_s26 + $0x3e8] ss:$80 sps:$4 sm:$0xff]   ;;  %v12245_v60 = vld [vmem:[%s13585_s26 + $0x484] ss:$80 sps:$4 sm:$0xff]  }
 0x234   : > { %8521 = vmatprep.subr.bf16.mxu0 %v12179_v61  ;;  %8685 = vmatprep.subr.bf16.mxu1 %v12182_v63  ;;  %v12248_v61 = vld [vmem:[%s13585_s26 + $0x48c] ss:$80 sps:$4 sm:$0xff]   ;;  %v12243_v63 = vld [vmem:[%s13585_s26 + $0x480] ss:$80 sps:$4 sm:$0xff]  }
 0x237   : > { %8522 = vmatpush1.bf16.msra.mxu0 %v12177_v0  ;;  %8686 = vmatpush1.bf16.msra.mxu1 %v12180_v2  ;;  %v12246_v0 = vld [vmem:[%s13585_s26 + $0x488] ss:$80 sps:$4 sm:$0xff]   ;;  %v12251_v2 = vld [vmem:[%s13585_s26 + $0x524] ss:$80 sps:$4 sm:$0xff]  }
 0x238   : > { %8523 = vmatprep.subr.bf16.mxu0 %v12185_v3  ;;  %8687 = vmatprep.subr.bf16.mxu1 %v12188_v4  ;;  %v12254_v3 = vld [vmem:[%s13585_s26 + $0x52c] ss:$80 sps:$4 sm:$0xff]   ;;  %v12249_v4 = vld [vmem:[%s13585_s26 + $0x520] ss:$80 sps:$4 sm:$0xff]  }
 0x23b   : > { %8524 = vmatpush1.bf16.msra.mxu0 %v12183_v6  ;;  %8688 = vmatpush1.bf16.msra.mxu1 %v12186_v7  ;;  %v12252_v6 = vld [vmem:[%s13585_s26 + $0x528] ss:$80 sps:$4 sm:$0xff]   ;;  %v12257_v7 = vld [vmem:[%s13585_s26 + $0x5c4] ss:$80 sps:$4 sm:$0xff]  }
 0x23c   : > { %8525 = vmatprep.subr.bf16.mxu0 %v12191_v8  ;;  %8689 = vmatprep.subr.bf16.mxu1 %v12194_v10  ;;  %v12260_v8 = vld [vmem:[%s13585_s26 + $0x5cc] ss:$80 sps:$4 sm:$0xff]   ;;  %v12255_v10 = vld [vmem:[%s13585_s26 + $0x5c0] ss:$80 sps:$4 sm:$0xff]  }
 0x23f   : > { %8526 = vmatpush1.bf16.msra.mxu0 %v12189_v11  ;;  %8690 = vmatpush1.bf16.msra.mxu1 %v12192_v41  ;;  %v12258_v11 = vld [vmem:[%s13585_s26 + $0x5c8] ss:$80 sps:$4 sm:$0xff]   ;;  %v12263_v41 = vld [vmem:[%s13585_s26 + $0x664] ss:$80 sps:$4 sm:$0xff]  }
 0x240   : > { %8527 = vmatprep.subr.bf16.mxu0 %v12197_v12  ;;  %8691 = vmatprep.subr.bf16.mxu1 %v12200_v14  ;;  %v12266_v12 = vld [vmem:[%s13585_s26 + $0x66c] ss:$80 sps:$4 sm:$0xff]   ;;  %v12261_v14 = vld [vmem:[%s13585_s26 + $0x660] ss:$80 sps:$4 sm:$0xff]  }
 0x243   : > { %8528 = vmatpush1.bf16.msra.mxu0 %v12195_v16  ;;  %8692 = vmatpush1.bf16.msra.mxu1 %v12198_v18  ;;  %v12264_v16 = vld [vmem:[%s13585_s26 + $0x668] ss:$80 sps:$4 sm:$0xff]   ;;  %v12269_v18 = vld [vmem:[%s13585_s26 + $0x704] ss:$80 sps:$4 sm:$0xff]  }
 0x244   : > { %8702 = vmatprep.subr.bf16.mxu0 %v12203_v19  ;;  %8866 = vmatprep.subr.bf16.mxu1 %v12206_v21  ;;  %v12272_v19 = vld [vmem:[%s13585_s26 + $0x70c] ss:$80 sps:$4 sm:$0xff]   ;;  %v12267_v21 = vld [vmem:[%s13585_s26 + $0x700] ss:$80 sps:$4 sm:$0xff]  }
 0x246   : > { %8530 = vmatmul.mubr.bf16.vlgmr.msra.gmra.mrb[4].mxu0 %v13930_v9  ;;  %8694 = vmatmul.mubr.bf16.vlgmr.msra.gmra.mrb[4].mxu1 %v13930_v9 }
 0x247   : > { %8703 = vmatpush1.bf16.msra.mxu0 %v12201_v22  ;;  %8867 = vmatpush1.bf16.msra.mxu1 %v12204_v23  ;;  %v12270_v22 = vld [vmem:[%s13585_s26 + $0x708] ss:$80 sps:$4 sm:$0xff]   ;;  %v12275_v23 = vld [vmem:[%s13585_s26 + $0x7a4] ss:$80 sps:$4 sm:$0xff]  }
 0x248   : > { %8704 = vmatprep.subr.bf16.mxu0 %v12209_v24  ;;  %8868 = vmatprep.subr.bf16.mxu1 %v12212_v25  ;;  %v12278_v24 = vld [vmem:[%s13585_s26 + $0x7ac] ss:$80 sps:$4 sm:$0xff]   ;;  %v12273_v25 = vld [vmem:[%s13585_s26 + $0x7a0] ss:$80 sps:$4 sm:$0xff]  }
 0x249   : > { %8734 = vmatprep.mubr.bf16.mxu0 %v13654_v55  ;;  %8898 = vmatprep.mubr.bf16.mxu1 %v13654_v55 }
 0x24b   : > { %8705 = vmatpush1.bf16.msra.mxu0 %v12207_v27  ;;  %8869 = vmatpush1.bf16.msra.mxu1 %v12210_v29  ;;  %v12276_v27 = vld [vmem:[%s13585_s26 + $0x7a8] ss:$80 sps:$4 sm:$0xff]   ;;  %v12281_v29 = vld [vmem:[%s13585_s26 + $0x844] ss:$80 sps:$4 sm:$0xff]  }
 0x24c   : > { %8706 = vmatprep.subr.bf16.mxu0 %v12215_v30  ;;  %8870 = vmatprep.subr.bf16.mxu1 %v12218_v31  ;;  %v12284_v30 = vld [vmem:[%s13585_s26 + $0x84c] ss:$80 sps:$4 sm:$0xff]   ;;  %v12279_v31 = vld [vmem:[%s13585_s26 + $0x840] ss:$80 sps:$4 sm:$0xff]  }
 0x24f   : > { %8707 = vmatpush1.bf16.msra.mxu0 %v12213_v49  ;;  %8871 = vmatpush1.bf16.msra.mxu1 %v12216_v34  ;;  %v12282_v49 = vld [vmem:[%s13585_s26 + $0x848] ss:$80 sps:$4 sm:$0xff]   ;;  %v12287_v34 = vld [vmem:[%s13585_s26 + $0x8e4] ss:$80 sps:$4 sm:$0xff]  }
 0x250   : > { %8708 = vmatprep.subr.bf16.mxu0 %v12221_v35  ;;  %8872 = vmatprep.subr.bf16.mxu1 %v12224_v40  ;;  %v12290_v35 = vld [vmem:[%s13585_s26 + $0x8ec] ss:$80 sps:$4 sm:$0xff]   ;;  %v12285_v40 = vld [vmem:[%s13585_s26 + $0x8e0] ss:$80 sps:$4 sm:$0xff]  }
 0x253   : > { %8709 = vmatpush1.bf16.msra.mxu0 %v12219_v37  ;;  %8873 = vmatpush1.bf16.msra.mxu1 %v12222_v42  ;;  %v12288_v37 = vld [vmem:[%s13585_s26 + $0x8e8] ss:$80 sps:$4 sm:$0xff]   ;;  %v12293_v42 = vld [vmem:[%s13585_s26 + $0x984] ss:$80 sps:$4 sm:$0xff]  }
 0x254   : > { %8710 = vmatprep.subr.bf16.mxu0 %v12227_v43  ;;  %8874 = vmatprep.subr.bf16.mxu1 %v12230_v44  ;;  %v12296_v43 = vld [vmem:[%s13585_s26 + $0x98c] ss:$80 sps:$4 sm:$0xff]   ;;  %v12291_v44 = vld [vmem:[%s13585_s26 + $0x980] ss:$80 sps:$4 sm:$0xff]  }
 0x257   : > { %8711 = vmatpush1.bf16.msra.mxu0 %v12225_v45  ;;  %8875 = vmatpush1.bf16.msra.mxu1 %v12228_v47  ;;  %v12294_v45 = vld [vmem:[%s13585_s26 + $0x988] ss:$80 sps:$4 sm:$0xff]   ;;  %v12299_v47 = vld [vmem:[%s13585_s26 + $0xa24] ss:$80 sps:$4 sm:$0xff]  }
 0x258   : > { %8712 = vmatprep.subr.bf16.mxu0 %v12233_v48  ;;  %8876 = vmatprep.subr.bf16.mxu1 %v12236_v51  ;;  %v12302_v48 = vld [vmem:[%s13585_s26 + $0xa2c] ss:$80 sps:$4 sm:$0xff]   ;;  %v12297_v51 = vld [vmem:[%s13585_s26 + $0xa20] ss:$80 sps:$4 sm:$0xff]  }
 0x25b   : > { %8713 = vmatpush1.bf16.msra.mxu0 %v12231_v52  ;;  %8877 = vmatpush1.bf16.msra.mxu1 %v12234_v53  ;;  %v12300_v52 = vld [vmem:[%s13585_s26 + $0xa28] ss:$80 sps:$4 sm:$0xff]   ;;  %v12305_v53 = vld [vmem:[%s13585_s26 + $0xac4] ss:$80 sps:$4 sm:$0xff]  }
 0x25c   : > { %8714 = vmatprep.subr.bf16.mxu0 %v12239_v56  ;;  %8878 = vmatprep.subr.bf16.mxu1 %v12242_v57  ;;  %v12308_v56 = vld [vmem:[%s13585_s26 + $0xacc] ss:$80 sps:$4 sm:$0xff]   ;;  %v12303_v57 = vld [vmem:[%s13585_s26 + $0xac0] ss:$80 sps:$4 sm:$0xff]  }
 0x25f   : > { %8715 = vmatpush1.bf16.msra.mxu0 %v12237_v58  ;;  %8879 = vmatpush1.bf16.msra.mxu1 %v12240_v59  ;;  %v12306_v58 = vld [vmem:[%s13585_s26 + $0xac8] ss:$80 sps:$4 sm:$0xff]   ;;  %v12311_v59 = vld [vmem:[%s13585_s26 + $0xb64] ss:$80 sps:$4 sm:$0xff]  }
 0x260   : > { %8716 = vmatprep.subr.bf16.mxu0 %v12245_v60  ;;  %8880 = vmatprep.subr.bf16.mxu1 %v12248_v61  ;;  %v12314_v60 = vld [vmem:[%s13585_s26 + $0xb6c] ss:$80 sps:$4 sm:$0xff]   ;;  %v12309_v61 = vld [vmem:[%s13585_s26 + $0xb60] ss:$80 sps:$4 sm:$0xff]  }
 0x263   : > { %8717 = vmatpush1.bf16.msra.mxu0 %v12243_v63  ;;  %8881 = vmatpush1.bf16.msra.mxu1 %v12246_v0  ;;  %v12312_v63 = vld [vmem:[%s13585_s26 + $0xb68] ss:$80 sps:$4 sm:$0xff]   ;;  %v12317_v0 = vld [vmem:[%s13585_s26 + $0xc04] ss:$80 sps:$4 sm:$0xff]  }
 0x264   : > { %8718 = vmatprep.subr.bf16.mxu0 %v12251_v2  ;;  %8882 = vmatprep.subr.bf16.mxu1 %v12254_v3  ;;  %v12320_v2 = vld [vmem:[%s13585_s26 + $0xc0c] ss:$80 sps:$4 sm:$0xff]   ;;  %v12315_v3 = vld [vmem:[%s13585_s26 + $0xc00] ss:$80 sps:$4 sm:$0xff]  }
 0x267   : > { %8719 = vmatpush1.bf16.msra.mxu0 %v12249_v4  ;;  %8883 = vmatpush1.bf16.msra.mxu1 %v12252_v6  ;;  %v12318_v4 = vld [vmem:[%s13585_s26 + $0xc08] ss:$80 sps:$4 sm:$0xff]   ;;  %v12323_v6 = vld [vmem:[%s13585_s26 + $0xca4] ss:$80 sps:$4 sm:$0xff]  }
 0x268   : > { %8720 = vmatprep.subr.bf16.mxu0 %v12257_v7  ;;  %8884 = vmatprep.subr.bf16.mxu1 %v12260_v8  ;;  %v12326_v7 = vld [vmem:[%s13585_s26 + $0xcac] ss:$80 sps:$4 sm:$0xff]   ;;  %v12321_v8 = vld [vmem:[%s13585_s26 + $0xca0] ss:$80 sps:$4 sm:$0xff]  }
 0x26b   : > { %8721 = vmatpush1.bf16.msra.mxu0 %v12255_v10  ;;  %8885 = vmatpush1.bf16.msra.mxu1 %v12258_v11  ;;  %v12324_v10 = vld [vmem:[%s13585_s26 + $0xca8] ss:$80 sps:$4 sm:$0xff]   ;;  %v12329_v11 = vld [vmem:[%s13585_s26 + $0xd44] ss:$80 sps:$4 sm:$0xff]  }
 0x26c   : > { %8722 = vmatprep.subr.bf16.mxu0 %v12263_v41  ;;  %8886 = vmatprep.subr.bf16.mxu1 %v12266_v12  ;;  %v12332_v41 = vld [vmem:[%s13585_s26 + $0xd4c] ss:$80 sps:$4 sm:$0xff]   ;;  %v12327_v12 = vld [vmem:[%s13585_s26 + $0xd40] ss:$80 sps:$4 sm:$0xff]  }
 0x26f   : > { %8723 = vmatpush1.bf16.msra.mxu0 %v12261_v14  ;;  %8887 = vmatpush1.bf16.msra.mxu1 %v12264_v16  ;;  %v12330_v14 = vld [vmem:[%s13585_s26 + $0xd48] ss:$80 sps:$4 sm:$0xff]   ;;  %v12335_v16 = vld [vmem:[%s13585_s26 + $0xde4] ss:$80 sps:$4 sm:$0xff]  }
 0x270   : > { %8724 = vmatprep.subr.bf16.mxu0 %v12269_v18  ;;  %8888 = vmatprep.subr.bf16.mxu1 %v12272_v19  ;;  %v12338_v18 = vld [vmem:[%s13585_s26 + $0xdec] ss:$80 sps:$4 sm:$0xff]   ;;  %v12333_v19 = vld [vmem:[%s13585_s26 + $0xde0] ss:$80 sps:$4 sm:$0xff]  }
 0x273   : > { %8725 = vmatpush1.bf16.msra.mxu0 %v12267_v21  ;;  %8889 = vmatpush1.bf16.msra.mxu1 %v12270_v22  ;;  %v12336_v21 = vld [vmem:[%s13585_s26 + $0xde8] ss:$80 sps:$4 sm:$0xff]   ;;  %v12341_v22 = vld [vmem:[%s13585_s26 + $0xe84] ss:$80 sps:$4 sm:$0xff]  }
 0x274   : > { %8726 = vmatprep.subr.bf16.mxu0 %v12275_v23  ;;  %8890 = vmatprep.subr.bf16.mxu1 %v12278_v24  ;;  %v12344_v23 = vld [vmem:[%s13585_s26 + $0xe8c] ss:$80 sps:$4 sm:$0xff]   ;;  %v12339_v24 = vld [vmem:[%s13585_s26 + $0xe80] ss:$80 sps:$4 sm:$0xff]  }
 0x277   : > { %8727 = vmatpush1.bf16.msra.mxu0 %v12273_v25  ;;  %8891 = vmatpush1.bf16.msra.mxu1 %v12276_v27  ;;  %v12342_v25 = vld [vmem:[%s13585_s26 + $0xe88] ss:$80 sps:$4 sm:$0xff]   ;;  %v12347_v27 = vld [vmem:[%s13585_s26 + $0xf24] ss:$80 sps:$4 sm:$0xff]  }
 0x278   : > { %8728 = vmatprep.subr.bf16.mxu0 %v12281_v29  ;;  %8892 = vmatprep.subr.bf16.mxu1 %v12284_v30  ;;  %v12350_v29 = vld [vmem:[%s13585_s26 + $0xf2c] ss:$80 sps:$4 sm:$0xff]   ;;  %v12345_v30 = vld [vmem:[%s13585_s26 + $0xf20] ss:$80 sps:$4 sm:$0xff]  }
 0x27b   : > { %8729 = vmatpush1.bf16.msra.mxu0 %v12279_v31  ;;  %8893 = vmatpush1.bf16.msra.mxu1 %v12282_v49  ;;  %v12348_v31 = vld [vmem:[%s13585_s26 + $0xf28] ss:$80 sps:$4 sm:$0xff]   ;;  %v12353_v49 = vld [vmem:[%s13585_s26 + $0xfc4] ss:$80 sps:$4 sm:$0xff]  }
 0x27c   : > { %8730 = vmatprep.subr.bf16.mxu0 %v12287_v34  ;;  %8894 = vmatprep.subr.bf16.mxu1 %v12290_v35  ;;  %v12356_v34 = vld [vmem:[%s13585_s26 + $0xfcc] ss:$80 sps:$4 sm:$0xff]   ;;  %v12351_v35 = vld [vmem:[%s13585_s26 + $0xfc0] ss:$80 sps:$4 sm:$0xff]  }
 0x27f   : > { %8731 = vmatpush1.bf16.msra.mxu0 %v12285_v40  ;;  %8895 = vmatpush1.bf16.msra.mxu1 %v12288_v37  ;;  %v12354_v40 = vld [vmem:[%s13585_s26 + $0xfc8] ss:$80 sps:$4 sm:$0xff]   ;;  %v12359_v37 = vld [vmem:[%s13585_s26 + $0x1064] ss:$80 sps:$4 sm:$0xff]  }
 0x280   : > { %8732 = vmatprep.subr.bf16.mxu0 %v12293_v42  ;;  %8896 = vmatprep.subr.bf16.mxu1 %v12296_v43  ;;  %v12362_v42 = vld [vmem:[%s13585_s26 + $0x106c] ss:$80 sps:$4 sm:$0xff]   ;;  %v12357_v43 = vld [vmem:[%s13585_s26 + $0x1060] ss:$80 sps:$4 sm:$0xff]  }
 0x283   : > { %8733 = vmatpush1.bf16.msra.mxu0 %v12291_v44  ;;  %8897 = vmatpush1.bf16.msra.mxu1 %v12294_v45  ;;  %v12360_v44 = vld [vmem:[%s13585_s26 + $0x1068] ss:$80 sps:$4 sm:$0xff]   ;;  %v12365_v45 = vld [vmem:[%s13585_s26 + $0x1104] ss:$80 sps:$4 sm:$0xff]  }
 0x284   : > { %8743 = vmatprep.subr.bf16.mxu0 %v12299_v47  ;;  %8907 = vmatprep.subr.bf16.mxu1 %v12302_v48  ;;  %v12368_v47 = vld [vmem:[%s13585_s26 + $0x110c] ss:$80 sps:$4 sm:$0xff]   ;;  %v12363_v48 = vld [vmem:[%s13585_s26 + $0x1100] ss:$80 sps:$4 sm:$0xff]  }
 0x286   : > { %8735 = vmatmul.mubr.bf16.vlgmr.msra.gmra.mrb[8].mxu0 %v13685_v13  ;;  %8899 = vmatmul.mubr.bf16.vlgmr.msra.gmra.mrb[8].mxu1 %v13685_v13 }
 0x287   : > { %8744 = vmatpush1.bf16.msra.mxu0 %v12297_v51  ;;  %8908 = vmatpush1.bf16.msra.mxu1 %v12300_v52  ;;  %v12366_v51 = vld [vmem:[%s13585_s26 + $0x1108] ss:$80 sps:$4 sm:$0xff]   ;;  %v12371_v52 = vld [vmem:[%s13585_s26 + $0x11a4] ss:$80 sps:$4 sm:$0xff]  }
 0x288   : > { %8745 = vmatprep.subr.bf16.mxu0 %v12305_v53  ;;  %8909 = vmatprep.subr.bf16.mxu1 %v12308_v56  ;;  %v12374_v53 = vld [vmem:[%s13585_s26 + $0x11ac] ss:$80 sps:$4 sm:$0xff]   ;;  %v12369_v56 = vld [vmem:[%s13585_s26 + $0x11a0] ss:$80 sps:$4 sm:$0xff]  }
 0x289   : > { %8775 = vmatprep.mubr.bf16.mxu0 %v13690_v17  ;;  %8939 = vmatprep.mubr.bf16.mxu1 %v13690_v17 }
 0x28b   : > { %8746 = vmatpush1.bf16.msra.mxu0 %v12303_v57  ;;  %8910 = vmatpush1.bf16.msra.mxu1 %v12306_v58  ;;  %v12372_v57 = vld [vmem:[%s13585_s26 + $0x11a8] ss:$80 sps:$4 sm:$0xff]   ;;  %v12377_v58 = vld [vmem:[%s13585_s26 + $0x1244] ss:$80 sps:$4 sm:$0xff]  }
 0x28c   : > { %8747 = vmatprep.subr.bf16.mxu0 %v12311_v59  ;;  %8911 = vmatprep.subr.bf16.mxu1 %v12314_v60  ;;  %v12380_v59 = vld [vmem:[%s13585_s26 + $0x124c] ss:$80 sps:$4 sm:$0xff]   ;;  %v12375_v60 = vld [vmem:[%s13585_s26 + $0x1240] ss:$80 sps:$4 sm:$0xff]  }
 0x28f   : > { %8748 = vmatpush1.bf16.msra.mxu0 %v12309_v61  ;;  %8912 = vmatpush1.bf16.msra.mxu1 %v12312_v63  ;;  %v12378_v61 = vld [vmem:[%s13585_s26 + $0x1248] ss:$80 sps:$4 sm:$0xff]   ;;  %v12383_v63 = vld [vmem:[%s13585_s26 + $0x12e4] ss:$80 sps:$4 sm:$0xff]  }
 0x290   : > { %8749 = vmatprep.subr.bf16.mxu0 %v12317_v0  ;;  %8913 = vmatprep.subr.bf16.mxu1 %v12320_v2  ;;  %v12386_v0 = vld [vmem:[%s13585_s26 + $0x12ec] ss:$80 sps:$4 sm:$0xff]   ;;  %v12381_v2 = vld [vmem:[%s13585_s26 + $0x12e0] ss:$80 sps:$4 sm:$0xff]  }
 0x293   : > { %8750 = vmatpush1.bf16.msra.mxu0 %v12315_v3  ;;  %8914 = vmatpush1.bf16.msra.mxu1 %v12318_v4  ;;  %v12384_v3 = vld [vmem:[%s13585_s26 + $0x12e8] ss:$80 sps:$4 sm:$0xff]   ;;  %v12389_v4 = vld [vmem:[%s13585_s26 + $0x1384] ss:$80 sps:$4 sm:$0xff]  }
 0x294   : > { %8751 = vmatprep.subr.bf16.mxu0 %v12323_v6  ;;  %8915 = vmatprep.subr.bf16.mxu1 %v12326_v7  ;;  %v12392_v6 = vld [vmem:[%s13585_s26 + $0x138c] ss:$80 sps:$4 sm:$0xff]   ;;  %v12387_v7 = vld [vmem:[%s13585_s26 + $0x1380] ss:$80 sps:$4 sm:$0xff]  }
 0x297   : > { %8752 = vmatpush1.bf16.msra.mxu0 %v12321_v8  ;;  %8916 = vmatpush1.bf16.msra.mxu1 %v12324_v10  ;;  %v12390_v8 = vld [vmem:[%s13585_s26 + $0x1388] ss:$80 sps:$4 sm:$0xff]   ;;  %v12395_v10 = vld [vmem:[%s13585_s26 + $0x1424] ss:$80 sps:$4 sm:$0xff]  }
 0x298   : > { %8753 = vmatprep.subr.bf16.mxu0 %v12329_v11  ;;  %8917 = vmatprep.subr.bf16.mxu1 %v12332_v41  ;;  %v12398_v11 = vld [vmem:[%s13585_s26 + $0x142c] ss:$80 sps:$4 sm:$0xff]   ;;  %v12393_v41 = vld [vmem:[%s13585_s26 + $0x1420] ss:$80 sps:$4 sm:$0xff]  }
 0x29b   : > { %8754 = vmatpush1.bf16.msra.mxu0 %v12327_v12  ;;  %8918 = vmatpush1.bf16.msra.mxu1 %v12330_v14  ;;  %v12396_v12 = vld [vmem:[%s13585_s26 + $0x1428] ss:$80 sps:$4 sm:$0xff]   ;;  %v12401_v14 = vld [vmem:[%s13585_s26 + $0x14c4] ss:$80 sps:$4 sm:$0xff]  }
 0x29c   : > { %8755 = vmatprep.subr.bf16.mxu0 %v12335_v16  ;;  %8919 = vmatprep.subr.bf16.mxu1 %v12338_v18  ;;  %v12404_v16 = vld [vmem:[%s13585_s26 + $0x14cc] ss:$80 sps:$4 sm:$0xff]   ;;  %v12399_v18 = vld [vmem:[%s13585_s26 + $0x14c0] ss:$80 sps:$4 sm:$0xff]  }
 0x29f   : > { %8756 = vmatpush1.bf16.msra.mxu0 %v12333_v19  ;;  %8920 = vmatpush1.bf16.msra.mxu1 %v12336_v21  ;;  %v12402_v19 = vld [vmem:[%s13585_s26 + $0x14c8] ss:$80 sps:$4 sm:$0xff]   ;;  %v12407_v21 = vld [vmem:[%s13585_s26 + $0x1564] ss:$80 sps:$4 sm:$0xff]  }
 0x2a0   : > { %8757 = vmatprep.subr.bf16.mxu0 %v12341_v22  ;;  %8921 = vmatprep.subr.bf16.mxu1 %v12344_v23  ;;  %v12410_v22 = vld [vmem:[%s13585_s26 + $0x156c] ss:$80 sps:$4 sm:$0xff]   ;;  %v12405_v23 = vld [vmem:[%s13585_s26 + $0x1560] ss:$80 sps:$4 sm:$0xff]  }
 0x2a3   : > { %8758 = vmatpush1.bf16.msra.mxu0 %v12339_v24  ;;  %8922 = vmatpush1.bf16.msra.mxu1 %v12342_v25  ;;  %v12408_v24 = vld [vmem:[%s13585_s26 + $0x1568] ss:$80 sps:$4 sm:$0xff]   ;;  %v12413_v25 = vld [vmem:[%s13585_s26 + $0x1604] ss:$80 sps:$4 sm:$0xff]  }
 0x2a4   : > { %8759 = vmatprep.subr.bf16.mxu0 %v12347_v27  ;;  %8923 = vmatprep.subr.bf16.mxu1 %v12350_v29  ;;  %v12416_v27 = vld [vmem:[%s13585_s26 + $0x160c] ss:$80 sps:$4 sm:$0xff]   ;;  %v12411_v29 = vld [vmem:[%s13585_s26 + $0x1600] ss:$80 sps:$4 sm:$0xff]  }
 0x2a7   : > { %8760 = vmatpush1.bf16.msra.mxu0 %v12345_v30  ;;  %8924 = vmatpush1.bf16.msra.mxu1 %v12348_v31  ;;  %v12414_v30 = vld [vmem:[%s13585_s26 + $0x1608] ss:$80 sps:$4 sm:$0xff]   ;;  %v12419_v31 = vld [vmem:[%s13585_s26 + $0x16a4] ss:$80 sps:$4 sm:$0xff]  }
 0x2a8   : > { %8761 = vmatprep.subr.bf16.mxu0 %v12353_v49  ;;  %8925 = vmatprep.subr.bf16.mxu1 %v12356_v34  ;;  %v12422_v49 = vld [vmem:[%s13585_s26 + $0x16ac] ss:$80 sps:$4 sm:$0xff]   ;;  %v12417_v34 = vld [vmem:[%s13585_s26 + $0x16a0] ss:$80 sps:$4 sm:$0xff]  }
 0x2ab   : > { %8762 = vmatpush1.bf16.msra.mxu0 %v12351_v35  ;;  %8926 = vmatpush1.bf16.msra.mxu1 %v12354_v40  ;;  %v12420_v35 = vld [vmem:[%s13585_s26 + $0x16a8] ss:$80 sps:$4 sm:$0xff]   ;;  %v12425_v40 = vld [vmem:[%s13585_s26 + $0x1744] ss:$80 sps:$4 sm:$0xff]  }
 0x2ac   : > { %8763 = vmatprep.subr.bf16.mxu0 %v12359_v37  ;;  %8927 = vmatprep.subr.bf16.mxu1 %v12362_v42  ;;  %v12428_v37 = vld [vmem:[%s13585_s26 + $0x174c] ss:$80 sps:$4 sm:$0xff]   ;;  %v12423_v42 = vld [vmem:[%s13585_s26 + $0x1740] ss:$80 sps:$4 sm:$0xff]  }
 0x2af   : > { %8764 = vmatpush1.bf16.msra.mxu0 %v12357_v43  ;;  %8928 = vmatpush1.bf16.msra.mxu1 %v12360_v44  ;;  %v12426_v43 = vld [vmem:[%s13585_s26 + $0x1748] ss:$80 sps:$4 sm:$0xff]   ;;  %v12431_v44 = vld [vmem:[%s13585_s26 + $0x17e4] ss:$80 sps:$4 sm:$0xff]  }
 0x2b0   : > { %8765 = vmatprep.subr.bf16.mxu0 %v12365_v45  ;;  %8929 = vmatprep.subr.bf16.mxu1 %v12368_v47  ;;  %v12434_v45 = vld [vmem:[%s13585_s26 + $0x17ec] ss:$80 sps:$4 sm:$0xff]   ;;  %v12429_v47 = vld [vmem:[%s13585_s26 + $0x17e0] ss:$80 sps:$4 sm:$0xff]  }
 0x2b3   : > { %8766 = vmatpush1.bf16.msra.mxu0 %v12363_v48  ;;  %8930 = vmatpush1.bf16.msra.mxu1 %v12366_v51  ;;  %v12432_v48 = vld [vmem:[%s13585_s26 + $0x17e8] ss:$80 sps:$4 sm:$0xff]   ;;  %v12437_v51 = vld [vmem:[%s13585_s26 + $0x1884] ss:$80 sps:$4 sm:$0xff]  }
 0x2b4   : > { %8767 = vmatprep.subr.bf16.mxu0 %v12371_v52  ;;  %8931 = vmatprep.subr.bf16.mxu1 %v12374_v53  ;;  %v12440_v52 = vld [vmem:[%s13585_s26 + $0x188c] ss:$80 sps:$4 sm:$0xff]   ;;  %v12435_v53 = vld [vmem:[%s13585_s26 + $0x1880] ss:$80 sps:$4 sm:$0xff]  }
 0x2b7   : > { %8768 = vmatpush1.bf16.msra.mxu0 %v12369_v56  ;;  %8932 = vmatpush1.bf16.msra.mxu1 %v12372_v57  ;;  %v12438_v56 = vld [vmem:[%s13585_s26 + $0x1888] ss:$80 sps:$4 sm:$0xff]   ;;  %v12443_v57 = vld [vmem:[%s13585_s26 + $0x1924] ss:$80 sps:$4 sm:$0xff]  }
 0x2b8   : > { %8769 = vmatprep.subr.bf16.mxu0 %v12377_v58  ;;  %8933 = vmatprep.subr.bf16.mxu1 %v12380_v59  ;;  %v12446_v58 = vld [vmem:[%s13585_s26 + $0x192c] ss:$80 sps:$4 sm:$0xff]   ;;  %v12441_v59 = vld [vmem:[%s13585_s26 + $0x1920] ss:$80 sps:$4 sm:$0xff]  }
 0x2bb   : > { %8770 = vmatpush1.bf16.msra.mxu0 %v12375_v60  ;;  %8934 = vmatpush1.bf16.msra.mxu1 %v12378_v61  ;;  %v12444_v60 = vld [vmem:[%s13585_s26 + $0x1928] ss:$80 sps:$4 sm:$0xff]   ;;  %v12449_v61 = vld [vmem:[%s13585_s26 + $0x19c4] ss:$80 sps:$4 sm:$0xff]  }
 0x2bc   : > { %8771 = vmatprep.subr.bf16.mxu0 %v12383_v63  ;;  %8935 = vmatprep.subr.bf16.mxu1 %v12386_v0  ;;  %v12452_v63 = vld [vmem:[%s13585_s26 + $0x19cc] ss:$80 sps:$4 sm:$0xff]   ;;  %v12447_v0 = vld [vmem:[%s13585_s26 + $0x19c0] ss:$80 sps:$4 sm:$0xff]  }
 0x2bf   : > { %8772 = vmatpush1.bf16.msra.mxu0 %v12381_v2  ;;  %8936 = vmatpush1.bf16.msra.mxu1 %v12384_v3  ;;  %v12450_v2 = vld [vmem:[%s13585_s26 + $0x19c8] ss:$80 sps:$4 sm:$0xff]   ;;  %v12455_v3 = vld [vmem:[%s13585_s26 + $0x1a64] ss:$80 sps:$4 sm:$0xff]  }
 0x2c0   : > { %8773 = vmatprep.subr.bf16.mxu0 %v12389_v4  ;;  %8937 = vmatprep.subr.bf16.mxu1 %v12392_v6  ;;  %v12458_v4 = vld [vmem:[%s13585_s26 + $0x1a6c] ss:$80 sps:$4 sm:$0xff]   ;;  %v12453_v6 = vld [vmem:[%s13585_s26 + $0x1a60] ss:$80 sps:$4 sm:$0xff]  }
 0x2c3   : > { %8774 = vmatpush1.bf16.msra.mxu0 %v12387_v7  ;;  %8938 = vmatpush1.bf16.msra.mxu1 %v12390_v8  ;;  %v12456_v7 = vld [vmem:[%s13585_s26 + $0x1a68] ss:$80 sps:$4 sm:$0xff]   ;;  %v12461_v8 = vld [vmem:[%s13585_s26 + $0x1b04] ss:$80 sps:$4 sm:$0xff]  }
 0x2c4   : > { %8784 = vmatprep.subr.bf16.mxu0 %v12395_v10  ;;  %8948 = vmatprep.subr.bf16.mxu1 %v12398_v11  ;;  %v12464_v10 = vld [vmem:[%s13585_s26 + $0x1b0c] ss:$80 sps:$4 sm:$0xff]   ;;  %v12459_v11 = vld [vmem:[%s13585_s26 + $0x1b00] ss:$80 sps:$4 sm:$0xff]  }
 0x2c6   : > { %8776 = vmatmul.mubr.bf16.vlgmr.msra.gmra.mrb[8].mxu0 %v13767_v28  ;;  %8940 = vmatmul.mubr.bf16.vlgmr.msra.gmra.mrb[8].mxu1 %v13767_v28 }
 0x2c7   : > { %8785 = vmatpush1.bf16.msra.mxu0 %v12393_v41  ;;  %8949 = vmatpush1.bf16.msra.mxu1 %v12396_v12  ;;  %v12462_v41 = vld [vmem:[%s13585_s26 + $0x1b08] ss:$80 sps:$4 sm:$0xff]   ;;  %v12467_v12 = vld [vmem:[%s13585_s26 + $0x1ba4] ss:$80 sps:$4 sm:$0xff]  }
 0x2c8   : > { %8786 = vmatprep.subr.bf16.mxu0 %v12401_v14  ;;  %8950 = vmatprep.subr.bf16.mxu1 %v12404_v16  ;;  %v12470_v14 = vld [vmem:[%s13585_s26 + $0x1bac] ss:$80 sps:$4 sm:$0xff]   ;;  %v12465_v16 = vld [vmem:[%s13585_s26 + $0x1ba0] ss:$80 sps:$4 sm:$0xff]  }
 0x2c9   : > { %8816 = vmatprep.mubr.bf16.mxu0 %v13772_v32  ;;  %8980 = vmatprep.mubr.bf16.mxu1 %v13772_v32 }
 0x2cb   : > { %8787 = vmatpush1.bf16.msra.mxu0 %v12399_v18  ;;  %8951 = vmatpush1.bf16.msra.mxu1 %v12402_v19  ;;  %v12468_v18 = vld [vmem:[%s13585_s26 + $0x1ba8] ss:$80 sps:$4 sm:$0xff]   ;;  %v12473_v19 = vld [vmem:[%s13585_s26 + $0x1c44] ss:$80 sps:$4 sm:$0xff]  }
 0x2cc   : > { %8788 = vmatprep.subr.bf16.mxu0 %v12407_v21  ;;  %8952 = vmatprep.subr.bf16.mxu1 %v12410_v22  ;;  %v12476_v21 = vld [vmem:[%s13585_s26 + $0x1c4c] ss:$80 sps:$4 sm:$0xff]   ;;  %v12471_v22 = vld [vmem:[%s13585_s26 + $0x1c40] ss:$80 sps:$4 sm:$0xff]  }
 0x2cf   : > { %8789 = vmatpush1.bf16.msra.mxu0 %v12405_v23  ;;  %8953 = vmatpush1.bf16.msra.mxu1 %v12408_v24  ;;  %v12474_v23 = vld [vmem:[%s13585_s26 + $0x1c48] ss:$80 sps:$4 sm:$0xff]   ;;  %v12479_v24 = vld [vmem:[%s13585_s26 + $0x1ce4] ss:$80 sps:$4 sm:$0xff]  }
 0x2d0   : > { %8790 = vmatprep.subr.bf16.mxu0 %v12413_v25  ;;  %8954 = vmatprep.subr.bf16.mxu1 %v12416_v27  ;;  %v12482_v25 = vld [vmem:[%s13585_s26 + $0x1cec] ss:$80 sps:$4 sm:$0xff]   ;;  %v12477_v27 = vld [vmem:[%s13585_s26 + $0x1ce0] ss:$80 sps:$4 sm:$0xff]  }
 0x2d3   : > { %8791 = vmatpush1.bf16.msra.mxu0 %v12411_v29  ;;  %8955 = vmatpush1.bf16.msra.mxu1 %v12414_v30  ;;  %v12480_v29 = vld [vmem:[%s13585_s26 + $0x1ce8] ss:$80 sps:$4 sm:$0xff]   ;;  %v12485_v30 = vld [vmem:[%s13585_s26 + $0x1d84] ss:$80 sps:$4 sm:$0xff]  }
 0x2d4   : > { %8792 = vmatprep.subr.bf16.mxu0 %v12419_v31  ;;  %8956 = vmatprep.subr.bf16.mxu1 %v12422_v49  ;;  %v12488_v31 = vld [vmem:[%s13585_s26 + $0x1d8c] ss:$80 sps:$4 sm:$0xff]   ;;  %v12483_v49 = vld [vmem:[%s13585_s26 + $0x1d80] ss:$80 sps:$4 sm:$0xff]  }
 0x2d7   : > { %8793 = vmatpush1.bf16.msra.mxu0 %v12417_v34  ;;  %8957 = vmatpush1.bf16.msra.mxu1 %v12420_v35  ;;  %v12486_v34 = vld [vmem:[%s13585_s26 + $0x1d88] ss:$80 sps:$4 sm:$0xff]   ;;  %v12491_v35 = vld [vmem:[%s13585_s26 + $0x1e24] ss:$80 sps:$4 sm:$0xff]  }
 0x2d8   : > { %8794 = vmatprep.subr.bf16.mxu0 %v12425_v40  ;;  %8958 = vmatprep.subr.bf16.mxu1 %v12428_v37  ;;  %v12494_v40 = vld [vmem:[%s13585_s26 + $0x1e2c] ss:$80 sps:$4 sm:$0xff]   ;;  %v12489_v37 = vld [vmem:[%s13585_s26 + $0x1e20] ss:$80 sps:$4 sm:$0xff]  }
 0x2db   : > { %8795 = vmatpush1.bf16.msra.mxu0 %v12423_v42  ;;  %8959 = vmatpush1.bf16.msra.mxu1 %v12426_v43  ;;  %v12492_v42 = vld [vmem:[%s13585_s26 + $0x1e28] ss:$80 sps:$4 sm:$0xff]   ;;  %v12497_v43 = vld [vmem:[%s13585_s26 + $0x1ec4] ss:$80 sps:$4 sm:$0xff]  }
 0x2dc   : > { %8796 = vmatprep.subr.bf16.mxu0 %v12431_v44  ;;  %8960 = vmatprep.subr.bf16.mxu1 %v12434_v45  ;;  %v12500_v44 = vld [vmem:[%s13585_s26 + $0x1ecc] ss:$80 sps:$4 sm:$0xff]   ;;  %v12495_v45 = vld [vmem:[%s13585_s26 + $0x1ec0] ss:$80 sps:$4 sm:$0xff]  }
 0x2df   : > { %8797 = vmatpush1.bf16.msra.mxu0 %v12429_v47  ;;  %8961 = vmatpush1.bf16.msra.mxu1 %v12432_v48  ;;  %v12498_v47 = vld [vmem:[%s13585_s26 + $0x1ec8] ss:$80 sps:$4 sm:$0xff]   ;;  %v12503_v48 = vld [vmem:[%s13585_s26 + $0x1f64] ss:$80 sps:$4 sm:$0xff]  }
 0x2e0   : > { %8798 = vmatprep.subr.bf16.mxu0 %v12437_v51  ;;  %8962 = vmatprep.subr.bf16.mxu1 %v12440_v52  ;;  %v12506_v51 = vld [vmem:[%s13585_s26 + $0x1f6c] ss:$80 sps:$4 sm:$0xff]   ;;  %v12501_v52 = vld [vmem:[%s13585_s26 + $0x1f60] ss:$80 sps:$4 sm:$0xff]  }
 0x2e3   : > { %8799 = vmatpush1.bf16.msra.mxu0 %v12435_v53  ;;  %8963 = vmatpush1.bf16.msra.mxu1 %v12438_v56  ;;  %v12504_v53 = vld [vmem:[%s13585_s26 + $0x1f68] ss:$80 sps:$4 sm:$0xff]   ;;  %v12509_v56 = vld [vmem:[%s13585_s26 + $0x2004] ss:$80 sps:$4 sm:$0xff]  }
 0x2e4   : > { %8800 = vmatprep.subr.bf16.mxu0 %v12443_v57  ;;  %8964 = vmatprep.subr.bf16.mxu1 %v12446_v58  ;;  %v12512_v57 = vld [vmem:[%s13585_s26 + $0x200c] ss:$80 sps:$4 sm:$0xff]   ;;  %v12507_v58 = vld [vmem:[%s13585_s26 + $0x2000] ss:$80 sps:$4 sm:$0xff]  }
 0x2e7   : > { %8801 = vmatpush1.bf16.msra.mxu0 %v12441_v59  ;;  %8965 = vmatpush1.bf16.msra.mxu1 %v12444_v60  ;;  %v12510_v59 = vld [vmem:[%s13585_s26 + $0x2008] ss:$80 sps:$4 sm:$0xff]   ;;  %v12515_v60 = vld [vmem:[%s13585_s26 + $0x20a4] ss:$80 sps:$4 sm:$0xff]  }
 0x2e8   : > { %8802 = vmatprep.subr.bf16.mxu0 %v12449_v61  ;;  %8966 = vmatprep.subr.bf16.mxu1 %v12452_v63  ;;  %v12518_v61 = vld [vmem:[%s13585_s26 + $0x20ac] ss:$80 sps:$4 sm:$0xff]   ;;  %v12513_v63 = vld [vmem:[%s13585_s26 + $0x20a0] ss:$80 sps:$4 sm:$0xff]  }
 0x2eb   : > { %8803 = vmatpush1.bf16.msra.mxu0 %v12447_v0  ;;  %8967 = vmatpush1.bf16.msra.mxu1 %v12450_v2  ;;  %v12516_v0 = vld [vmem:[%s13585_s26 + $0x20a8] ss:$80 sps:$4 sm:$0xff]   ;;  %v12521_v2 = vld [vmem:[%s13585_s26 + $0x2144] ss:$80 sps:$4 sm:$0xff]  }
 0x2ec   : > { %8804 = vmatprep.subr.bf16.mxu0 %v12455_v3  ;;  %8968 = vmatprep.subr.bf16.mxu1 %v12458_v4  ;;  %v12524_v3 = vld [vmem:[%s13585_s26 + $0x214c] ss:$80 sps:$4 sm:$0xff]   ;;  %v13354_v4 = vld [vmem:[%s14160_s30] sm:$0xff] }
 0x2ef   : > { %8805 = vmatpush1.bf16.msra.mxu0 %v12453_v6  ;;  %8969 = vmatpush1.bf16.msra.mxu1 %v12456_v7  ;;  %v7965_v6 = vrot.slane %v13354_v4, %v13832_v33  ;;  %v7973_v7 = vrot.slane %v13354_v4, %v13919_v62 }
 0x2f0   : > { %8806 = vmatprep.subr.bf16.mxu0 %v12461_v8  ;;  %8970 = vmatprep.subr.bf16.mxu1 %v12464_v10  ;;  %v7969_v8 = vrot.slane %v13354_v4, %v13756_v20  ;;  %v7977_v10 = vrot.slane %v13354_v4, %v13838_v38  ;;  %v12543_v4 = vld [vmem:[%s13585_s26 + $0x23c0] ss:$80 sps:$4 sm:$0xff]  }
 0x2f3   : > { %8807 = vmatpush1.bf16.msra.mxu0 %v12459_v11  ;;  %8971 = vmatpush1.bf16.msra.mxu1 %v12462_v41  ;;  %v12519_v11 = vld [vmem:[%s13585_s26 + $0x2140] ss:$80 sps:$4 sm:$0xff]   ;;  %v12522_v41 = vld [vmem:[%s13585_s26 + $0x2148] ss:$80 sps:$4 sm:$0xff]  }
 0x2f4   : > { %8808 = vmatprep.subr.bf16.mxu0 %v12467_v12  ;;  %8972 = vmatprep.subr.bf16.mxu1 %v12470_v14  ;;  %v12527_v12 = vld [vmem:[%s13585_s26 + $0x21e4] ss:$80 sps:$4 sm:$0xff]   ;;  %v12530_v14 = vld [vmem:[%s13585_s26 + $0x21ec] ss:$80 sps:$4 sm:$0xff]  }
 0x2f7   : > { %8809 = vmatpush1.bf16.msra.mxu0 %v12465_v16  ;;  %8973 = vmatpush1.bf16.msra.mxu1 %v12468_v18 }
 0x2f8   : > { %8810 = vmatprep.subr.bf16.mxu0 %v12473_v19  ;;  %8974 = vmatprep.subr.bf16.mxu1 %v12476_v21 }
 0x2fb   : > { %8811 = vmatpush1.bf16.msra.mxu0 %v12471_v22  ;;  %8975 = vmatpush1.bf16.msra.mxu1 %v12474_v23 }
 0x2fc   : > { %8812 = vmatprep.subr.bf16.mxu0 %v12479_v24  ;;  %8976 = vmatprep.subr.bf16.mxu1 %v12482_v25  ;;  %v12525_v24 = vld [vmem:[%s13585_s26 + $0x21e0] ss:$80 sps:$4 sm:$0xff]  }
 0x2ff   : > { %8813 = vmatpush1.bf16.msra.mxu0 %v12477_v27  ;;  %8977 = vmatpush1.bf16.msra.mxu1 %v12480_v29 }
 0x300   : > { %8814 = vmatprep.subr.bf16.mxu0 %v12485_v30  ;;  %8978 = vmatprep.subr.bf16.mxu1 %v12488_v31  ;;  %v12528_v31 = vld [vmem:[%s13585_s26 + $0x21e8] ss:$80 sps:$4 sm:$0xff]  }
 0x303   : > { %8815 = vmatpush1.bf16.msra.mxu0 %v12483_v49  ;;  %8979 = vmatpush1.bf16.msra.mxu1 %v12486_v34  ;;  %v12533_v49 = vld [vmem:[%s13585_s26 + $0x2284] ss:$80 sps:$4 sm:$0xff]  }
 0x304   : > { %8825 = vmatprep.subr.bf16.mxu0 %v12491_v35  ;;  %8989 = vmatprep.subr.bf16.mxu1 %v12494_v40 }
 0x306   : > { %8817 = vmatmul.mubr.bf16.vlgmr.msra.gmra.mrb[8].mxu0 %v13854_v50  ;;  %8981 = vmatmul.mubr.bf16.vlgmr.msra.gmra.mrb[8].mxu1 %v13854_v50 }
 0x307   : > { %8826 = vmatpush1.bf16.msra.mxu0 %v12489_v37  ;;  %8990 = vmatpush1.bf16.msra.mxu1 %v12492_v42  ;;  %v12536_v42 = vld [vmem:[%s13585_s26 + $0x228c] ss:$80 sps:$4 sm:$0xff]  }
 0x308   : > { %8827 = vmatprep.subr.bf16.mxu0 %v12497_v43  ;;  %8991 = vmatprep.subr.bf16.mxu1 %v12500_v44 }
 0x309   : > { %8857 = vmatprep.mubr.bf16.mxu0 %v13859_v54  ;;  %9021 = vmatprep.mubr.bf16.mxu1 %v13859_v54 }
 0x30b   : > { %8828 = vmatpush1.bf16.msra.mxu0 %v12495_v45  ;;  %8992 = vmatpush1.bf16.msra.mxu1 %v12498_v47 }
 0x30c   : > { %8829 = vmatprep.subr.bf16.mxu0 %v12503_v48  ;;  %8993 = vmatprep.subr.bf16.mxu1 %v12506_v51  ;;  %v12531_v48 = vld [vmem:[%s13585_s26 + $0x2280] ss:$80 sps:$4 sm:$0xff]   ;;  %v12534_v51 = vld [vmem:[%s13585_s26 + $0x2288] ss:$80 sps:$4 sm:$0xff]  }
 0x30f   : > { %8830 = vmatpush1.bf16.msra.mxu0 %v12501_v52  ;;  %8994 = vmatpush1.bf16.msra.mxu1 %v12504_v53  ;;  %v12539_v52 = vld [vmem:[%s13585_s26 + $0x2324] ss:$80 sps:$4 sm:$0xff]   ;;  %v12542_v53 = vld [vmem:[%s13585_s26 + $0x232c] ss:$80 sps:$4 sm:$0xff]  }
 0x310   : > { %8831 = vmatprep.subr.bf16.mxu0 %v12509_v56  ;;  %8995 = vmatprep.subr.bf16.mxu1 %v12512_v57 }
 0x313   : > { %8832 = vmatpush1.bf16.msra.mxu0 %v12507_v58  ;;  %8996 = vmatpush1.bf16.msra.mxu1 %v12510_v59  ;;  %v12537_v59 = vld [vmem:[%s13585_s26 + $0x2320] ss:$80 sps:$4 sm:$0xff]  }
 0x314   : > { %8833 = vmatprep.subr.bf16.mxu0 %v12515_v60  ;;  %8997 = vmatprep.subr.bf16.mxu1 %v12518_v61  ;;  %v12540_v60 = vld [vmem:[%s13585_s26 + $0x2328] ss:$80 sps:$4 sm:$0xff]   ;;  %v12545_v61 = vld [vmem:[%s13585_s26 + $0x23c4] ss:$80 sps:$4 sm:$0xff]  }
 0x317   : > { %8834 = vmatpush1.bf16.msra.mxu0 %v12513_v63  ;;  %8998 = vmatpush1.bf16.msra.mxu1 %v12516_v0  ;;  %v12548_v63 = vld [vmem:[%s13585_s26 + $0x23cc] ss:$80 sps:$4 sm:$0xff]   ;;  %v9766_v0 = vrot.slane %v14188_v39, %v14180_v26  ;;  %v12549_v39 = vld [vmem:[%s13585_s26 + $0x2460] ss:$80 sps:$4 sm:$0xff]  }
 0x318   : > { %8835 = vmatprep.subr.bf16.mxu0 %v12521_v2  ;;  %8999 = vmatprep.subr.bf16.mxu1 %v12524_v3 }
 0x319   : > { %v8531_v16 = vpop.f32.mrb[4].mxu0  ;;  %v8695_v18 = vpop.f32.mrb[4].mxu1 }
 0x31a   : > { %v11252_v19 = vadd.f32 %v8531_v16, %v7965_v6  ;;  %v11254_v21 = vadd.f32 %v8695_v18, %v7973_v7  ;;  %v8533_v22 = vpop.f32.mrb[5].mxu0  ;;  %v8697_v23 = vpop.f32.mrb[5].mxu1  ;;  %v12546_v6 = vld [vmem:[%s13585_s26 + $0x23c8] ss:$80 sps:$4 sm:$0xff]   ;;  %v12551_v7 = vld [vmem:[%s13585_s26 + $0x2464] ss:$80 sps:$4 sm:$0xff]  }
 0x31b   : > { %v11253_v25 = vadd.f32 %v8533_v22, %v7969_v8  ;;  %v11255_v27 = vadd.f32 %v8697_v23, %v7977_v10  ;;  %v8535_v29 = vpop.f32.mrb[6].mxu0  ;;  %v8699_v30 = vpop.f32.mrb[6].mxu1  ;;  %8836 = vmatpush1.bf16.msra.mxu0 %v12519_v11  ;;  %9000 = vmatpush1.bf16.msra.mxu1 %v12522_v41  ;;  %v12554_v8 = vld [vmem:[%s13585_s26 + $0x246c] ss:$80 sps:$4 sm:$0xff]   ;;  %v12552_v10 = vld [vmem:[%s13585_s26 + $0x2468] ss:$80 sps:$4 sm:$0xff]  }
 0x31c   : > { %v9690_v34 = vmax.f32 %v11252_v19, 0.0  ;;  %v9692_v35 = vmax.f32 %v11254_v21, 0.0  ;;  %v8536_v40 = vpop.f32.mrb[7].mxu0  ;;  %v8700_v37 = vpop.f32.mrb[7].mxu1  ;;  %8837 = vmatprep.subr.bf16.mxu0 %v12527_v12  ;;  %9001 = vmatprep.subr.bf16.mxu1 %v12530_v14  ;;  %v12557_v11 = vld [vmem:[%s13585_s26 + $0x2504] ss:$80 sps:$4 sm:$0xff]  }
 0x31d   : > { %v9691_v43 = vmax.f32 %v11253_v25, 0.0  ;;  %v9693_v44 = vmax.f32 %v11255_v27, 0.0  ;;  %v12560_v41 = vld [vmem:[%s13585_s26 + $0x250c] ss:$80 sps:$4 sm:$0xff]   ;;  %v12555_v12 = vld [vmem:[%s13585_s26 + $0x2500] ss:$80 sps:$4 sm:$0xff]  }
 0x31e   : > { %v12558_v14 = vld [vmem:[%s13585_s26 + $0x2508] ss:$80 sps:$4 sm:$0xff]   ;;  %v12563_v16 = vld [vmem:[%s13585_s26 + $0x25a4] ss:$80 sps:$4 sm:$0xff]   ;;  %v12566_v18 = vld [vmem:[%s13585_s26 + $0x25ac] ss:$80 sps:$4 sm:$0xff]  }
 0x31f   : > { %v9728_v45 = vcombine.low %v9690_v34, %v9691_v43  ;;  %v9729_v47 = vcombine.low %v9692_v35, %v9693_v44  ;;  %8838 = vmatpush1.bf16.msra.mxu0 %v12525_v24  ;;  %9002 = vmatpush1.bf16.msra.mxu1 %v12528_v31  ;;  %v12561_v19 = vld [vmem:[%s13585_s26 + $0x25a0] ss:$80 sps:$4 sm:$0xff]   ;;  %v12564_v21 = vld [vmem:[%s13585_s26 + $0x25a8] ss:$80 sps:$4 sm:$0xff]   ;;  %v12569_v22 = vld [vmem:[%s13585_s26 + $0x2644] ss:$80 sps:$4 sm:$0xff]  }
 0x320   : > { %8839 = vmatprep.subr.bf16.mxu0 %v12533_v49  ;;  %9003 = vmatprep.subr.bf16.mxu1 %v12536_v42  ;;  %v12572_v23 = vld [vmem:[%s13585_s26 + $0x264c] ss:$80 sps:$4 sm:$0xff]   ;;  %v12567_v24 = vld [vmem:[%s13585_s26 + $0x2640] ss:$80 sps:$4 sm:$0xff]   ;;  %v12570_v25 = vld [vmem:[%s13585_s26 + $0x2648] ss:$80 sps:$4 sm:$0xff]  }
 0x321   : > { %v9750_v56 = vrot.slane %v9728_v45, %v14180_v26  ;;  %v9757_v57 = vrot.slane %v9729_v47, %v14180_v26  ;;  %v12575_v27 = vld [vmem:[%s13585_s26 + $0x26e4] ss:$80 sps:$4 sm:$0xff]   ;;  %v12578_v29 = vld [vmem:[%s13585_s26 + $0x26ec] ss:$80 sps:$4 sm:$0xff]   ;;  %v12573_v30 = vld [vmem:[%s13585_s26 + $0x26e0] ss:$80 sps:$4 sm:$0xff]  }
 0x322   : > { %v12576_v31 = vld [vmem:[%s13585_s26 + $0x26e8] ss:$80 sps:$4 sm:$0xff]   ;;  %v12581_v49 = vld [vmem:[%s13585_s26 + $0x2784] ss:$80 sps:$4 sm:$0xff]   ;;  %v12584_v34 = vld [vmem:[%s13585_s26 + $0x278c] ss:$80 sps:$4 sm:$0xff]  }
 0x323   : > { %v9759_v58 = vcombine.low %v9750_v56, %v9757_v57  ;;  %8840 = vmatpush1.bf16.msra.mxu0 %v12531_v48  ;;  %9004 = vmatpush1.bf16.msra.mxu1 %v12534_v51  ;;  %v12579_v35 = vld [vmem:[%s13585_s26 + $0x2780] ss:$80 sps:$4 sm:$0xff]   ;;  %v12582_v40 = vld [vmem:[%s13585_s26 + $0x2788] ss:$80 sps:$4 sm:$0xff]   ;;  %v12587_v37 = vld [vmem:[%s13585_s26 + $0x34] ss:$80 sps:$4 sm:$0xff]  }
 0x324   : > { %8841 = vmatprep.subr.bf16.mxu0 %v12539_v52  ;;  %9005 = vmatprep.subr.bf16.mxu1 %v12542_v53  ;;  %v12590_v42 = vld [vmem:[%s13585_s26 + $0x3c] ss:$80 sps:$4 sm:$0xff]   ;;  %v12585_v43 = vld [vmem:[%s13585_s26 + $0x30] ss:$80 sps:$4 sm:$0xff]   ;;  %v12588_v44 = vld [vmem:[%s13585_s26 + $0x38] ss:$80 sps:$4 sm:$0xff]  }
 0x325   : > { %v9773_v2 = vrot.slane %v9759_v58, %v14180_v26  ;;  %v12593_v45 = vld [vmem:[%s13585_s26 + $0xd4] ss:$80 sps:$4 sm:$0xff]   ;;  %v12596_v47 = vld [vmem:[%s13585_s26 + $0xdc] ss:$80 sps:$4 sm:$0xff]   ;;  %v12591_v48 = vld [vmem:[%s13585_s26 + $0xd0] ss:$80 sps:$4 sm:$0xff]  }
 0x326   : > { %v12594_v51 = vld [vmem:[%s13585_s26 + $0xd8] ss:$80 sps:$4 sm:$0xff]   ;;  %v12599_v52 = vld [vmem:[%s13585_s26 + $0x174] ss:$80 sps:$4 sm:$0xff]   ;;  %v12602_v53 = vld [vmem:[%s13585_s26 + $0x17c] ss:$80 sps:$4 sm:$0xff]  }
 0x327   : > { %v9774_v3 = vcombine.low %v9766_v0, %v9773_v2  ;;  %8842 = vmatpush1.bf16.msra.mxu0 %v12537_v59  ;;  %9006 = vmatpush1.bf16.msra.mxu1 %v12540_v60  ;;  %v12597_v56 = vld [vmem:[%s13585_s26 + $0x170] ss:$80 sps:$4 sm:$0xff]   ;;  %v12600_v57 = vld [vmem:[%s13585_s26 + $0x178] ss:$80 sps:$4 sm:$0xff]   ;;  %v12605_v58 = vld [vmem:[%s13585_s26 + $0x214] ss:$80 sps:$4 sm:$0xff]  }
 0x328   : > { %8843 = vmatprep.subr.bf16.mxu0 %v12545_v61  ;;  %9007 = vmatprep.subr.bf16.mxu1 %v12548_v63  ;;  %v12608_v59 = vld [vmem:[%s13585_s26 + $0x21c] ss:$80 sps:$4 sm:$0xff]   ;;  %v12603_v60 = vld [vmem:[%s13585_s26 + $0x210] ss:$80 sps:$4 sm:$0xff]   ;;  %v12606_v61 = vld [vmem:[%s13585_s26 + $0x218] ss:$80 sps:$4 sm:$0xff]  }
 0x329   : > { %9851 = vst [vmem:[%s14481_s6] sm:$0xff] %v9774_v3  ;;  %v12611_v63 = vld [vmem:[%s13585_s26 + $0x2b4] ss:$80 sps:$4 sm:$0xff]   ;;  %v12614_v0 = vld [vmem:[%s13585_s26 + $0x2bc] ss:$80 sps:$4 sm:$0xff]   ;;  %v12609_v2 = vld [vmem:[%s13585_s26 + $0x2b0] ss:$80 sps:$4 sm:$0xff]  }
 0x32a   : > { %v12612_v3 = vld [vmem:[%s13585_s26 + $0x2b8] ss:$80 sps:$4 sm:$0xff]  }
 0x32b   : > { %8844 = vmatpush1.bf16.msra.mxu0 %v12543_v4  ;;  %9008 = vmatpush1.bf16.msra.mxu1 %v12546_v6  ;;  %v12617_v4 = vld [vmem:[%s13585_s26 + $0x354] ss:$80 sps:$4 sm:$0xff]   ;;  %v12620_v6 = vld [vmem:[%s13585_s26 + $0x35c] ss:$80 sps:$4 sm:$0xff]  }
 0x32c   : > { %8845 = vmatprep.subr.bf16.mxu0 %v12551_v7  ;;  %9009 = vmatprep.subr.bf16.mxu1 %v12554_v8  ;;  %v12615_v7 = vld [vmem:[%s13585_s26 + $0x350] ss:$80 sps:$4 sm:$0xff]   ;;  %v12618_v8 = vld [vmem:[%s13585_s26 + $0x358] ss:$80 sps:$4 sm:$0xff]  }
 0x32f   : > { %8846 = vmatpush1.bf16.msra.mxu0 %v12549_v39  ;;  %9010 = vmatpush1.bf16.msra.mxu1 %v12552_v10  ;;  %v12623_v39 = vld [vmem:[%s13585_s26 + $0x3f4] ss:$80 sps:$4 sm:$0xff]   ;;  %v12626_v10 = vld [vmem:[%s13585_s26 + $0x3fc] ss:$80 sps:$4 sm:$0xff]  }
 0x330   : > { %8847 = vmatprep.subr.bf16.mxu0 %v12557_v11  ;;  %9011 = vmatprep.subr.bf16.mxu1 %v12560_v41  ;;  %v12621_v11 = vld [vmem:[%s13585_s26 + $0x3f0] ss:$80 sps:$4 sm:$0xff]   ;;  %v12624_v41 = vld [vmem:[%s13585_s26 + $0x3f8] ss:$80 sps:$4 sm:$0xff]  }
 0x333   : > { %8848 = vmatpush1.bf16.msra.mxu0 %v12555_v12  ;;  %9012 = vmatpush1.bf16.msra.mxu1 %v12558_v14  ;;  %v12629_v12 = vld [vmem:[%s13585_s26 + $0x494] ss:$80 sps:$4 sm:$0xff]   ;;  %v12632_v14 = vld [vmem:[%s13585_s26 + $0x49c] ss:$80 sps:$4 sm:$0xff]  }
 0x334   : > { %8849 = vmatprep.subr.bf16.mxu0 %v12563_v16  ;;  %9013 = vmatprep.subr.bf16.mxu1 %v12566_v18  ;;  %v12627_v16 = vld [vmem:[%s13585_s26 + $0x490] ss:$80 sps:$4 sm:$0xff]   ;;  %v12630_v18 = vld [vmem:[%s13585_s26 + $0x498] ss:$80 sps:$4 sm:$0xff]  }
 0x337   : > { %8850 = vmatpush1.bf16.msra.mxu0 %v12561_v19  ;;  %9014 = vmatpush1.bf16.msra.mxu1 %v12564_v21  ;;  %v12635_v19 = vld [vmem:[%s13585_s26 + $0x534] ss:$80 sps:$4 sm:$0xff]   ;;  %v12638_v21 = vld [vmem:[%s13585_s26 + $0x53c] ss:$80 sps:$4 sm:$0xff]  }
 0x338   : > { %8851 = vmatprep.subr.bf16.mxu0 %v12569_v22  ;;  %9015 = vmatprep.subr.bf16.mxu1 %v12572_v23  ;;  %v12633_v22 = vld [vmem:[%s13585_s26 + $0x530] ss:$80 sps:$4 sm:$0xff]   ;;  %v12636_v23 = vld [vmem:[%s13585_s26 + $0x538] ss:$80 sps:$4 sm:$0xff]  }
 0x33b   : > { %8852 = vmatpush1.bf16.msra.mxu0 %v12567_v24  ;;  %9016 = vmatpush1.bf16.msra.mxu1 %v12570_v25  ;;  %v12641_v24 = vld [vmem:[%s13585_s26 + $0x5d4] ss:$80 sps:$4 sm:$0xff]   ;;  %v12644_v25 = vld [vmem:[%s13585_s26 + $0x5dc] ss:$80 sps:$4 sm:$0xff]  }
 0x33c   : > { %8853 = vmatprep.subr.bf16.mxu0 %v12575_v27  ;;  %9017 = vmatprep.subr.bf16.mxu1 %v12578_v29  ;;  %v12639_v27 = vld [vmem:[%s13585_s26 + $0x5d0] ss:$80 sps:$4 sm:$0xff]   ;;  %v12642_v29 = vld [vmem:[%s13585_s26 + $0x5d8] ss:$80 sps:$4 sm:$0xff]  }
 0x33f   : > { %8854 = vmatpush1.bf16.msra.mxu0 %v12573_v30  ;;  %9018 = vmatpush1.bf16.msra.mxu1 %v12576_v31  ;;  %v12647_v30 = vld [vmem:[%s13585_s26 + $0x674] ss:$80 sps:$4 sm:$0xff]   ;;  %v12650_v31 = vld [vmem:[%s13585_s26 + $0x67c] ss:$80 sps:$4 sm:$0xff]  }
 0x340   : > { %8855 = vmatprep.subr.bf16.mxu0 %v12581_v49  ;;  %9019 = vmatprep.subr.bf16.mxu1 %v12584_v34  ;;  %v12645_v49 = vld [vmem:[%s13585_s26 + $0x670] ss:$80 sps:$4 sm:$0xff]   ;;  %v12648_v34 = vld [vmem:[%s13585_s26 + $0x678] ss:$80 sps:$4 sm:$0xff]  }
 0x343   : > { %8856 = vmatpush1.bf16.msra.mxu0 %v12579_v35  ;;  %9020 = vmatpush1.bf16.msra.mxu1 %v12582_v40  ;;  %v12653_v35 = vld [vmem:[%s13585_s26 + $0x714] ss:$80 sps:$4 sm:$0xff]   ;;  %v12656_v40 = vld [vmem:[%s13585_s26 + $0x71c] ss:$80 sps:$4 sm:$0xff]  }
 0x344   : > { %9030 = vmatprep.subr.bf16.mxu0 %v12587_v37  ;;  %9194 = vmatprep.subr.bf16.mxu1 %v12590_v42  ;;  %v12651_v37 = vld [vmem:[%s13585_s26 + $0x710] ss:$80 sps:$4 sm:$0xff]   ;;  %v12654_v42 = vld [vmem:[%s13585_s26 + $0x718] ss:$80 sps:$4 sm:$0xff]  }
 0x346   : > { %8858 = vmatmul.mubr.bf16.vlgmr.msra.gmra.mrb[8].mxu0 %v13930_v9  ;;  %9022 = vmatmul.mubr.bf16.vlgmr.msra.gmra.mrb[8].mxu1 %v13930_v9 }
 0x347   : > { %9031 = vmatpush1.bf16.msra.mxu0 %v12585_v43  ;;  %9195 = vmatpush1.bf16.msra.mxu1 %v12588_v44  ;;  %v12659_v43 = vld [vmem:[%s13585_s26 + $0x7b4] ss:$80 sps:$4 sm:$0xff]   ;;  %v12662_v44 = vld [vmem:[%s13585_s26 + $0x7bc] ss:$80 sps:$4 sm:$0xff]  }
 0x348   : > { %9032 = vmatprep.subr.bf16.mxu0 %v12593_v45  ;;  %9196 = vmatprep.subr.bf16.mxu1 %v12596_v47  ;;  %v12657_v45 = vld [vmem:[%s13585_s26 + $0x7b0] ss:$80 sps:$4 sm:$0xff]   ;;  %v12660_v47 = vld [vmem:[%s13585_s26 + $0x7b8] ss:$80 sps:$4 sm:$0xff]  }
 0x349   : > { %9062 = vmatprep.mubr.bf16.mxu0 %v13654_v55  ;;  %9226 = vmatprep.mubr.bf16.mxu1 %v13654_v55 }
 0x34b   : > { %9033 = vmatpush1.bf16.msra.mxu0 %v12591_v48  ;;  %9197 = vmatpush1.bf16.msra.mxu1 %v12594_v51  ;;  %v12665_v48 = vld [vmem:[%s13585_s26 + $0x854] ss:$80 sps:$4 sm:$0xff]   ;;  %v12668_v51 = vld [vmem:[%s13585_s26 + $0x85c] ss:$80 sps:$4 sm:$0xff]  }
 0x34c   : > { %9034 = vmatprep.subr.bf16.mxu0 %v12599_v52  ;;  %9198 = vmatprep.subr.bf16.mxu1 %v12602_v53  ;;  %v12663_v52 = vld [vmem:[%s13585_s26 + $0x850] ss:$80 sps:$4 sm:$0xff]   ;;  %v12666_v53 = vld [vmem:[%s13585_s26 + $0x858] ss:$80 sps:$4 sm:$0xff]  }
 0x34f   : > { %9035 = vmatpush1.bf16.msra.mxu0 %v12597_v56  ;;  %9199 = vmatpush1.bf16.msra.mxu1 %v12600_v57  ;;  %v12671_v56 = vld [vmem:[%s13585_s26 + $0x8f4] ss:$80 sps:$4 sm:$0xff]   ;;  %v12674_v57 = vld [vmem:[%s13585_s26 + $0x8fc] ss:$80 sps:$4 sm:$0xff]  }
 0x350   : > { %9036 = vmatprep.subr.bf16.mxu0 %v12605_v58  ;;  %9200 = vmatprep.subr.bf16.mxu1 %v12608_v59  ;;  %v12669_v58 = vld [vmem:[%s13585_s26 + $0x8f0] ss:$80 sps:$4 sm:$0xff]   ;;  %v12672_v59 = vld [vmem:[%s13585_s26 + $0x8f8] ss:$80 sps:$4 sm:$0xff]  }
 0x353   : > { %9037 = vmatpush1.bf16.msra.mxu0 %v12603_v60  ;;  %9201 = vmatpush1.bf16.msra.mxu1 %v12606_v61  ;;  %v12677_v60 = vld [vmem:[%s13585_s26 + $0x994] ss:$80 sps:$4 sm:$0xff]   ;;  %v12680_v61 = vld [vmem:[%s13585_s26 + $0x99c] ss:$80 sps:$4 sm:$0xff]  }
 0x354   : > { %9038 = vmatprep.subr.bf16.mxu0 %v12611_v63  ;;  %9202 = vmatprep.subr.bf16.mxu1 %v12614_v0  ;;  %v12675_v63 = vld [vmem:[%s13585_s26 + $0x990] ss:$80 sps:$4 sm:$0xff]   ;;  %v12678_v0 = vld [vmem:[%s13585_s26 + $0x998] ss:$80 sps:$4 sm:$0xff]  }
 0x357   : > { %9039 = vmatpush1.bf16.msra.mxu0 %v12609_v2  ;;  %9203 = vmatpush1.bf16.msra.mxu1 %v12612_v3  ;;  %v12683_v2 = vld [vmem:[%s13585_s26 + $0xa34] ss:$80 sps:$4 sm:$0xff]   ;;  %v12686_v3 = vld [vmem:[%s13585_s26 + $0xa3c] ss:$80 sps:$4 sm:$0xff]  }
 0x358   : > { %9040 = vmatprep.subr.bf16.mxu0 %v12617_v4  ;;  %9204 = vmatprep.subr.bf16.mxu1 %v12620_v6  ;;  %v12681_v4 = vld [vmem:[%s13585_s26 + $0xa30] ss:$80 sps:$4 sm:$0xff]   ;;  %v12684_v6 = vld [vmem:[%s13585_s26 + $0xa38] ss:$80 sps:$4 sm:$0xff]  }
 0x35b   : > { %9041 = vmatpush1.bf16.msra.mxu0 %v12615_v7  ;;  %9205 = vmatpush1.bf16.msra.mxu1 %v12618_v8  ;;  %v12689_v7 = vld [vmem:[%s13585_s26 + $0xad4] ss:$80 sps:$4 sm:$0xff]   ;;  %v12692_v8 = vld [vmem:[%s13585_s26 + $0xadc] ss:$80 sps:$4 sm:$0xff]  }
 0x35c   : > { %9042 = vmatprep.subr.bf16.mxu0 %v12623_v39  ;;  %9206 = vmatprep.subr.bf16.mxu1 %v12626_v10  ;;  %v12687_v39 = vld [vmem:[%s13585_s26 + $0xad0] ss:$80 sps:$4 sm:$0xff]   ;;  %v12690_v10 = vld [vmem:[%s13585_s26 + $0xad8] ss:$80 sps:$4 sm:$0xff]  }
 0x35f   : > { %9043 = vmatpush1.bf16.msra.mxu0 %v12621_v11  ;;  %9207 = vmatpush1.bf16.msra.mxu1 %v12624_v41  ;;  %v12695_v11 = vld [vmem:[%s13585_s26 + $0xb74] ss:$80 sps:$4 sm:$0xff]   ;;  %v12698_v41 = vld [vmem:[%s13585_s26 + $0xb7c] ss:$80 sps:$4 sm:$0xff]  }
 0x360   : > { %9044 = vmatprep.subr.bf16.mxu0 %v12629_v12  ;;  %9208 = vmatprep.subr.bf16.mxu1 %v12632_v14  ;;  %v12693_v12 = vld [vmem:[%s13585_s26 + $0xb70] ss:$80 sps:$4 sm:$0xff]   ;;  %v12696_v14 = vld [vmem:[%s13585_s26 + $0xb78] ss:$80 sps:$4 sm:$0xff]  }
 0x363   : > { %9045 = vmatpush1.bf16.msra.mxu0 %v12627_v16  ;;  %9209 = vmatpush1.bf16.msra.mxu1 %v12630_v18  ;;  %v12701_v16 = vld [vmem:[%s13585_s26 + $0xc14] ss:$80 sps:$4 sm:$0xff]   ;;  %v12704_v18 = vld [vmem:[%s13585_s26 + $0xc1c] ss:$80 sps:$4 sm:$0xff]  }
 0x364   : > { %9046 = vmatprep.subr.bf16.mxu0 %v12635_v19  ;;  %9210 = vmatprep.subr.bf16.mxu1 %v12638_v21  ;;  %v12699_v19 = vld [vmem:[%s13585_s26 + $0xc10] ss:$80 sps:$4 sm:$0xff]   ;;  %v12702_v21 = vld [vmem:[%s13585_s26 + $0xc18] ss:$80 sps:$4 sm:$0xff]  }
 0x367   : > { %9047 = vmatpush1.bf16.msra.mxu0 %v12633_v22  ;;  %9211 = vmatpush1.bf16.msra.mxu1 %v12636_v23  ;;  %v12707_v22 = vld [vmem:[%s13585_s26 + $0xcb4] ss:$80 sps:$4 sm:$0xff]   ;;  %v12710_v23 = vld [vmem:[%s13585_s26 + $0xcbc] ss:$80 sps:$4 sm:$0xff]  }
 0x368   : > { %9048 = vmatprep.subr.bf16.mxu0 %v12641_v24  ;;  %9212 = vmatprep.subr.bf16.mxu1 %v12644_v25  ;;  %v12705_v24 = vld [vmem:[%s13585_s26 + $0xcb0] ss:$80 sps:$4 sm:$0xff]   ;;  %v12708_v25 = vld [vmem:[%s13585_s26 + $0xcb8] ss:$80 sps:$4 sm:$0xff]  }
 0x36b   : > { %9049 = vmatpush1.bf16.msra.mxu0 %v12639_v27  ;;  %9213 = vmatpush1.bf16.msra.mxu1 %v12642_v29  ;;  %v12713_v27 = vld [vmem:[%s13585_s26 + $0xd54] ss:$80 sps:$4 sm:$0xff]   ;;  %v12716_v29 = vld [vmem:[%s13585_s26 + $0xd5c] ss:$80 sps:$4 sm:$0xff]  }
 0x36c   : > { %9050 = vmatprep.subr.bf16.mxu0 %v12647_v30  ;;  %9214 = vmatprep.subr.bf16.mxu1 %v12650_v31  ;;  %v12711_v30 = vld [vmem:[%s13585_s26 + $0xd50] ss:$80 sps:$4 sm:$0xff]   ;;  %v12714_v31 = vld [vmem:[%s13585_s26 + $0xd58] ss:$80 sps:$4 sm:$0xff]  }
 0x36f   : > { %9051 = vmatpush1.bf16.msra.mxu0 %v12645_v49  ;;  %9215 = vmatpush1.bf16.msra.mxu1 %v12648_v34  ;;  %v12719_v49 = vld [vmem:[%s13585_s26 + $0xdf4] ss:$80 sps:$4 sm:$0xff]   ;;  %v12722_v34 = vld [vmem:[%s13585_s26 + $0xdfc] ss:$80 sps:$4 sm:$0xff]  }
 0x370   : > { %9052 = vmatprep.subr.bf16.mxu0 %v12653_v35  ;;  %9216 = vmatprep.subr.bf16.mxu1 %v12656_v40  ;;  %v12717_v35 = vld [vmem:[%s13585_s26 + $0xdf0] ss:$80 sps:$4 sm:$0xff]   ;;  %v12720_v40 = vld [vmem:[%s13585_s26 + $0xdf8] ss:$80 sps:$4 sm:$0xff]  }
 0x373   : > { %9053 = vmatpush1.bf16.msra.mxu0 %v12651_v37  ;;  %9217 = vmatpush1.bf16.msra.mxu1 %v12654_v42  ;;  %v12725_v37 = vld [vmem:[%s13585_s26 + $0xe94] ss:$80 sps:$4 sm:$0xff]   ;;  %v12728_v42 = vld [vmem:[%s13585_s26 + $0xe9c] ss:$80 sps:$4 sm:$0xff]  }
 0x374   : > { %9054 = vmatprep.subr.bf16.mxu0 %v12659_v43  ;;  %9218 = vmatprep.subr.bf16.mxu1 %v12662_v44  ;;  %v12723_v43 = vld [vmem:[%s13585_s26 + $0xe90] ss:$80 sps:$4 sm:$0xff]   ;;  %v12726_v44 = vld [vmem:[%s13585_s26 + $0xe98] ss:$80 sps:$4 sm:$0xff]  }
 0x377   : > { %9055 = vmatpush1.bf16.msra.mxu0 %v12657_v45  ;;  %9219 = vmatpush1.bf16.msra.mxu1 %v12660_v47  ;;  %v12731_v45 = vld [vmem:[%s13585_s26 + $0xf34] ss:$80 sps:$4 sm:$0xff]   ;;  %v12734_v47 = vld [vmem:[%s13585_s26 + $0xf3c] ss:$80 sps:$4 sm:$0xff]  }
 0x378   : > { %9056 = vmatprep.subr.bf16.mxu0 %v12665_v48  ;;  %9220 = vmatprep.subr.bf16.mxu1 %v12668_v51  ;;  %v12729_v48 = vld [vmem:[%s13585_s26 + $0xf30] ss:$80 sps:$4 sm:$0xff]   ;;  %v12732_v51 = vld [vmem:[%s13585_s26 + $0xf38] ss:$80 sps:$4 sm:$0xff]  }
 0x37b   : > { %9057 = vmatpush1.bf16.msra.mxu0 %v12663_v52  ;;  %9221 = vmatpush1.bf16.msra.mxu1 %v12666_v53  ;;  %v12737_v52 = vld [vmem:[%s13585_s26 + $0xfd4] ss:$80 sps:$4 sm:$0xff]   ;;  %v12740_v53 = vld [vmem:[%s13585_s26 + $0xfdc] ss:$80 sps:$4 sm:$0xff]  }
 0x37c   : > { %9058 = vmatprep.subr.bf16.mxu0 %v12671_v56  ;;  %9222 = vmatprep.subr.bf16.mxu1 %v12674_v57  ;;  %v12735_v56 = vld [vmem:[%s13585_s26 + $0xfd0] ss:$80 sps:$4 sm:$0xff]   ;;  %v12738_v57 = vld [vmem:[%s13585_s26 + $0xfd8] ss:$80 sps:$4 sm:$0xff]  }
 0x37f   : > { %9059 = vmatpush1.bf16.msra.mxu0 %v12669_v58  ;;  %9223 = vmatpush1.bf16.msra.mxu1 %v12672_v59  ;;  %v12743_v58 = vld [vmem:[%s13585_s26 + $0x1074] ss:$80 sps:$4 sm:$0xff]   ;;  %v12746_v59 = vld [vmem:[%s13585_s26 + $0x107c] ss:$80 sps:$4 sm:$0xff]  }
 0x380   : > { %9060 = vmatprep.subr.bf16.mxu0 %v12677_v60  ;;  %9224 = vmatprep.subr.bf16.mxu1 %v12680_v61  ;;  %v12741_v60 = vld [vmem:[%s13585_s26 + $0x1070] ss:$80 sps:$4 sm:$0xff]   ;;  %v12744_v61 = vld [vmem:[%s13585_s26 + $0x1078] ss:$80 sps:$4 sm:$0xff]  }
 0x383   : > { %9061 = vmatpush1.bf16.msra.mxu0 %v12675_v63  ;;  %9225 = vmatpush1.bf16.msra.mxu1 %v12678_v0  ;;  %v12749_v63 = vld [vmem:[%s13585_s26 + $0x1114] ss:$80 sps:$4 sm:$0xff]   ;;  %v12752_v0 = vld [vmem:[%s13585_s26 + $0x111c] ss:$80 sps:$4 sm:$0xff]  }
 0x384   : > { %9071 = vmatprep.subr.bf16.mxu0 %v12683_v2  ;;  %9235 = vmatprep.subr.bf16.mxu1 %v12686_v3  ;;  %v12747_v2 = vld [vmem:[%s13585_s26 + $0x1110] ss:$80 sps:$4 sm:$0xff]   ;;  %v12750_v3 = vld [vmem:[%s13585_s26 + $0x1118] ss:$80 sps:$4 sm:$0xff]  }
 0x386   : > { %9063 = vmatmul.mubr.bf16.vlgmr.msra.gmra.mrb[12].mxu0 %v13685_v13  ;;  %9227 = vmatmul.mubr.bf16.vlgmr.msra.gmra.mrb[12].mxu1 %v13685_v13 }
 0x387   : > { %9072 = vmatpush1.bf16.msra.mxu0 %v12681_v4  ;;  %9236 = vmatpush1.bf16.msra.mxu1 %v12684_v6  ;;  %v12755_v4 = vld [vmem:[%s13585_s26 + $0x11b4] ss:$80 sps:$4 sm:$0xff]   ;;  %v12758_v6 = vld [vmem:[%s13585_s26 + $0x11bc] ss:$80 sps:$4 sm:$0xff]  }
 0x388   : > { %9073 = vmatprep.subr.bf16.mxu0 %v12689_v7  ;;  %9237 = vmatprep.subr.bf16.mxu1 %v12692_v8  ;;  %v12753_v7 = vld [vmem:[%s13585_s26 + $0x11b0] ss:$80 sps:$4 sm:$0xff]   ;;  %v12756_v8 = vld [vmem:[%s13585_s26 + $0x11b8] ss:$80 sps:$4 sm:$0xff]  }
 0x389   : > { %9103 = vmatprep.mubr.bf16.mxu0 %v13690_v17  ;;  %9267 = vmatprep.mubr.bf16.mxu1 %v13690_v17 }
 0x38b   : > { %9074 = vmatpush1.bf16.msra.mxu0 %v12687_v39  ;;  %9238 = vmatpush1.bf16.msra.mxu1 %v12690_v10  ;;  %v12761_v39 = vld [vmem:[%s13585_s26 + $0x1254] ss:$80 sps:$4 sm:$0xff]   ;;  %v12764_v10 = vld [vmem:[%s13585_s26 + $0x125c] ss:$80 sps:$4 sm:$0xff]  }
 0x38c   : > { %9075 = vmatprep.subr.bf16.mxu0 %v12695_v11  ;;  %9239 = vmatprep.subr.bf16.mxu1 %v12698_v41  ;;  %v12759_v11 = vld [vmem:[%s13585_s26 + $0x1250] ss:$80 sps:$4 sm:$0xff]   ;;  %v12762_v41 = vld [vmem:[%s13585_s26 + $0x1258] ss:$80 sps:$4 sm:$0xff]  }
 0x38f   : > { %9076 = vmatpush1.bf16.msra.mxu0 %v12693_v12  ;;  %9240 = vmatpush1.bf16.msra.mxu1 %v12696_v14  ;;  %v12767_v12 = vld [vmem:[%s13585_s26 + $0x12f4] ss:$80 sps:$4 sm:$0xff]   ;;  %v12770_v14 = vld [vmem:[%s13585_s26 + $0x12fc] ss:$80 sps:$4 sm:$0xff]  }
 0x390   : > { %9077 = vmatprep.subr.bf16.mxu0 %v12701_v16  ;;  %9241 = vmatprep.subr.bf16.mxu1 %v12704_v18  ;;  %v12765_v16 = vld [vmem:[%s13585_s26 + $0x12f0] ss:$80 sps:$4 sm:$0xff]   ;;  %v12768_v18 = vld [vmem:[%s13585_s26 + $0x12f8] ss:$80 sps:$4 sm:$0xff]  }
 0x393   : > { %9078 = vmatpush1.bf16.msra.mxu0 %v12699_v19  ;;  %9242 = vmatpush1.bf16.msra.mxu1 %v12702_v21  ;;  %v12773_v19 = vld [vmem:[%s13585_s26 + $0x1394] ss:$80 sps:$4 sm:$0xff]   ;;  %v12776_v21 = vld [vmem:[%s13585_s26 + $0x139c] ss:$80 sps:$4 sm:$0xff]  }
 0x394   : > { %9079 = vmatprep.subr.bf16.mxu0 %v12707_v22  ;;  %9243 = vmatprep.subr.bf16.mxu1 %v12710_v23  ;;  %v12771_v22 = vld [vmem:[%s13585_s26 + $0x1390] ss:$80 sps:$4 sm:$0xff]   ;;  %v12774_v23 = vld [vmem:[%s13585_s26 + $0x1398] ss:$80 sps:$4 sm:$0xff]  }
 0x397   : > { %9080 = vmatpush1.bf16.msra.mxu0 %v12705_v24  ;;  %9244 = vmatpush1.bf16.msra.mxu1 %v12708_v25  ;;  %v12779_v24 = vld [vmem:[%s13585_s26 + $0x1434] ss:$80 sps:$4 sm:$0xff]   ;;  %v12782_v25 = vld [vmem:[%s13585_s26 + $0x143c] ss:$80 sps:$4 sm:$0xff]  }
 0x398   : > { %9081 = vmatprep.subr.bf16.mxu0 %v12713_v27  ;;  %9245 = vmatprep.subr.bf16.mxu1 %v12716_v29  ;;  %v12777_v27 = vld [vmem:[%s13585_s26 + $0x1430] ss:$80 sps:$4 sm:$0xff]   ;;  %v12780_v29 = vld [vmem:[%s13585_s26 + $0x1438] ss:$80 sps:$4 sm:$0xff]  }
 0x39b   : > { %9082 = vmatpush1.bf16.msra.mxu0 %v12711_v30  ;;  %9246 = vmatpush1.bf16.msra.mxu1 %v12714_v31  ;;  %v12785_v30 = vld [vmem:[%s13585_s26 + $0x14d4] ss:$80 sps:$4 sm:$0xff]   ;;  %v12788_v31 = vld [vmem:[%s13585_s26 + $0x14dc] ss:$80 sps:$4 sm:$0xff]  }
 0x39c   : > { %9083 = vmatprep.subr.bf16.mxu0 %v12719_v49  ;;  %9247 = vmatprep.subr.bf16.mxu1 %v12722_v34  ;;  %v12783_v49 = vld [vmem:[%s13585_s26 + $0x14d0] ss:$80 sps:$4 sm:$0xff]   ;;  %v12786_v34 = vld [vmem:[%s13585_s26 + $0x14d8] ss:$80 sps:$4 sm:$0xff]  }
 0x39f   : > { %9084 = vmatpush1.bf16.msra.mxu0 %v12717_v35  ;;  %9248 = vmatpush1.bf16.msra.mxu1 %v12720_v40  ;;  %v12791_v35 = vld [vmem:[%s13585_s26 + $0x1574] ss:$80 sps:$4 sm:$0xff]   ;;  %v12794_v40 = vld [vmem:[%s13585_s26 + $0x157c] ss:$80 sps:$4 sm:$0xff]  }
 0x3a0   : > { %9085 = vmatprep.subr.bf16.mxu0 %v12725_v37  ;;  %9249 = vmatprep.subr.bf16.mxu1 %v12728_v42  ;;  %v12789_v37 = vld [vmem:[%s13585_s26 + $0x1570] ss:$80 sps:$4 sm:$0xff]   ;;  %v12792_v42 = vld [vmem:[%s13585_s26 + $0x1578] ss:$80 sps:$4 sm:$0xff]  }
 0x3a3   : > { %9086 = vmatpush1.bf16.msra.mxu0 %v12723_v43  ;;  %9250 = vmatpush1.bf16.msra.mxu1 %v12726_v44  ;;  %v12797_v43 = vld [vmem:[%s13585_s26 + $0x1614] ss:$80 sps:$4 sm:$0xff]   ;;  %v12800_v44 = vld [vmem:[%s13585_s26 + $0x161c] ss:$80 sps:$4 sm:$0xff]  }
 0x3a4   : > { %9087 = vmatprep.subr.bf16.mxu0 %v12731_v45  ;;  %9251 = vmatprep.subr.bf16.mxu1 %v12734_v47  ;;  %v12795_v45 = vld [vmem:[%s13585_s26 + $0x1610] ss:$80 sps:$4 sm:$0xff]   ;;  %v12798_v47 = vld [vmem:[%s13585_s26 + $0x1618] ss:$80 sps:$4 sm:$0xff]  }
 0x3a7   : > { %9088 = vmatpush1.bf16.msra.mxu0 %v12729_v48  ;;  %9252 = vmatpush1.bf16.msra.mxu1 %v12732_v51  ;;  %v12803_v48 = vld [vmem:[%s13585_s26 + $0x16b4] ss:$80 sps:$4 sm:$0xff]   ;;  %v12806_v51 = vld [vmem:[%s13585_s26 + $0x16bc] ss:$80 sps:$4 sm:$0xff]  }
 0x3a8   : > { %9089 = vmatprep.subr.bf16.mxu0 %v12737_v52  ;;  %9253 = vmatprep.subr.bf16.mxu1 %v12740_v53  ;;  %v12801_v52 = vld [vmem:[%s13585_s26 + $0x16b0] ss:$80 sps:$4 sm:$0xff]   ;;  %v12804_v53 = vld [vmem:[%s13585_s26 + $0x16b8] ss:$80 sps:$4 sm:$0xff]  }
 0x3ab   : > { %9090 = vmatpush1.bf16.msra.mxu0 %v12735_v56  ;;  %9254 = vmatpush1.bf16.msra.mxu1 %v12738_v57  ;;  %v12809_v56 = vld [vmem:[%s13585_s26 + $0x1754] ss:$80 sps:$4 sm:$0xff]   ;;  %v12812_v57 = vld [vmem:[%s13585_s26 + $0x175c] ss:$80 sps:$4 sm:$0xff]  }
 0x3ac   : > { %9091 = vmatprep.subr.bf16.mxu0 %v12743_v58  ;;  %9255 = vmatprep.subr.bf16.mxu1 %v12746_v59  ;;  %v12807_v58 = vld [vmem:[%s13585_s26 + $0x1750] ss:$80 sps:$4 sm:$0xff]   ;;  %v12810_v59 = vld [vmem:[%s13585_s26 + $0x1758] ss:$80 sps:$4 sm:$0xff]  }
 0x3af   : > { %9092 = vmatpush1.bf16.msra.mxu0 %v12741_v60  ;;  %9256 = vmatpush1.bf16.msra.mxu1 %v12744_v61  ;;  %v12815_v60 = vld [vmem:[%s13585_s26 + $0x17f4] ss:$80 sps:$4 sm:$0xff]   ;;  %v12818_v61 = vld [vmem:[%s13585_s26 + $0x17fc] ss:$80 sps:$4 sm:$0xff]  }
 0x3b0   : > { %9093 = vmatprep.subr.bf16.mxu0 %v12749_v63  ;;  %9257 = vmatprep.subr.bf16.mxu1 %v12752_v0  ;;  %v12813_v63 = vld [vmem:[%s13585_s26 + $0x17f0] ss:$80 sps:$4 sm:$0xff]   ;;  %v12816_v0 = vld [vmem:[%s13585_s26 + $0x17f8] ss:$80 sps:$4 sm:$0xff]  }
 0x3b3   : > { %9094 = vmatpush1.bf16.msra.mxu0 %v12747_v2  ;;  %9258 = vmatpush1.bf16.msra.mxu1 %v12750_v3  ;;  %v12821_v2 = vld [vmem:[%s13585_s26 + $0x1894] ss:$80 sps:$4 sm:$0xff]   ;;  %v12824_v3 = vld [vmem:[%s13585_s26 + $0x189c] ss:$80 sps:$4 sm:$0xff]  }
 0x3b4   : > { %9095 = vmatprep.subr.bf16.mxu0 %v12755_v4  ;;  %9259 = vmatprep.subr.bf16.mxu1 %v12758_v6  ;;  %v12819_v4 = vld [vmem:[%s13585_s26 + $0x1890] ss:$80 sps:$4 sm:$0xff]   ;;  %v12822_v6 = vld [vmem:[%s13585_s26 + $0x1898] ss:$80 sps:$4 sm:$0xff]  }
 0x3b7   : > { %9096 = vmatpush1.bf16.msra.mxu0 %v12753_v7  ;;  %9260 = vmatpush1.bf16.msra.mxu1 %v12756_v8  ;;  %v12827_v7 = vld [vmem:[%s13585_s26 + $0x1934] ss:$80 sps:$4 sm:$0xff]   ;;  %v12830_v8 = vld [vmem:[%s13585_s26 + $0x193c] ss:$80 sps:$4 sm:$0xff]  }
 0x3b8   : > { %9097 = vmatprep.subr.bf16.mxu0 %v12761_v39  ;;  %9261 = vmatprep.subr.bf16.mxu1 %v12764_v10  ;;  %v12825_v39 = vld [vmem:[%s13585_s26 + $0x1930] ss:$80 sps:$4 sm:$0xff]   ;;  %v12828_v10 = vld [vmem:[%s13585_s26 + $0x1938] ss:$80 sps:$4 sm:$0xff]  }
 0x3bb   : > { %9098 = vmatpush1.bf16.msra.mxu0 %v12759_v11  ;;  %9262 = vmatpush1.bf16.msra.mxu1 %v12762_v41  ;;  %v12833_v11 = vld [vmem:[%s13585_s26 + $0x19d4] ss:$80 sps:$4 sm:$0xff]   ;;  %v12836_v41 = vld [vmem:[%s13585_s26 + $0x19dc] ss:$80 sps:$4 sm:$0xff]  }
 0x3bc   : > { %9099 = vmatprep.subr.bf16.mxu0 %v12767_v12  ;;  %9263 = vmatprep.subr.bf16.mxu1 %v12770_v14  ;;  %v12831_v12 = vld [vmem:[%s13585_s26 + $0x19d0] ss:$80 sps:$4 sm:$0xff]   ;;  %v12834_v14 = vld [vmem:[%s13585_s26 + $0x19d8] ss:$80 sps:$4 sm:$0xff]  }
 0x3bf   : > { %9100 = vmatpush1.bf16.msra.mxu0 %v12765_v16  ;;  %9264 = vmatpush1.bf16.msra.mxu1 %v12768_v18  ;;  %v12839_v16 = vld [vmem:[%s13585_s26 + $0x1a74] ss:$80 sps:$4 sm:$0xff]   ;;  %v12842_v18 = vld [vmem:[%s13585_s26 + $0x1a7c] ss:$80 sps:$4 sm:$0xff]  }
 0x3c0   : > { %9101 = vmatprep.subr.bf16.mxu0 %v12773_v19  ;;  %9265 = vmatprep.subr.bf16.mxu1 %v12776_v21  ;;  %v12837_v19 = vld [vmem:[%s13585_s26 + $0x1a70] ss:$80 sps:$4 sm:$0xff]   ;;  %v12840_v21 = vld [vmem:[%s13585_s26 + $0x1a78] ss:$80 sps:$4 sm:$0xff]  }
 0x3c3   : > { %9102 = vmatpush1.bf16.msra.mxu0 %v12771_v22  ;;  %9266 = vmatpush1.bf16.msra.mxu1 %v12774_v23  ;;  %v12845_v22 = vld [vmem:[%s13585_s26 + $0x1b14] ss:$80 sps:$4 sm:$0xff]   ;;  %v12848_v23 = vld [vmem:[%s13585_s26 + $0x1b1c] ss:$80 sps:$4 sm:$0xff]  }
 0x3c4   : > { %9112 = vmatprep.subr.bf16.mxu0 %v12779_v24  ;;  %9276 = vmatprep.subr.bf16.mxu1 %v12782_v25  ;;  %v12843_v24 = vld [vmem:[%s13585_s26 + $0x1b10] ss:$80 sps:$4 sm:$0xff]   ;;  %v12846_v25 = vld [vmem:[%s13585_s26 + $0x1b18] ss:$80 sps:$4 sm:$0xff]  }
 0x3c6   : > { %9104 = vmatmul.mubr.bf16.vlgmr.msra.gmra.mrb[12].mxu0 %v13767_v28  ;;  %9268 = vmatmul.mubr.bf16.vlgmr.msra.gmra.mrb[12].mxu1 %v13767_v28 }
 0x3c7   : > { %9113 = vmatpush1.bf16.msra.mxu0 %v12777_v27  ;;  %9277 = vmatpush1.bf16.msra.mxu1 %v12780_v29  ;;  %v12851_v27 = vld [vmem:[%s13585_s26 + $0x1bb4] ss:$80 sps:$4 sm:$0xff]   ;;  %v12854_v29 = vld [vmem:[%s13585_s26 + $0x1bbc] ss:$80 sps:$4 sm:$0xff]  }
 0x3c8   : > { %9114 = vmatprep.subr.bf16.mxu0 %v12785_v30  ;;  %9278 = vmatprep.subr.bf16.mxu1 %v12788_v31  ;;  %v12849_v30 = vld [vmem:[%s13585_s26 + $0x1bb0] ss:$80 sps:$4 sm:$0xff]   ;;  %v12852_v31 = vld [vmem:[%s13585_s26 + $0x1bb8] ss:$80 sps:$4 sm:$0xff]  }
 0x3c9   : > { %9144 = vmatprep.mubr.bf16.mxu0 %v13772_v32  ;;  %9308 = vmatprep.mubr.bf16.mxu1 %v13772_v32 }
 0x3cb   : > { %9115 = vmatpush1.bf16.msra.mxu0 %v12783_v49  ;;  %9279 = vmatpush1.bf16.msra.mxu1 %v12786_v34  ;;  %v12857_v49 = vld [vmem:[%s13585_s26 + $0x1c54] ss:$80 sps:$4 sm:$0xff]   ;;  %v12860_v34 = vld [vmem:[%s13585_s26 + $0x1c5c] ss:$80 sps:$4 sm:$0xff]  }
 0x3cc   : > { %9116 = vmatprep.subr.bf16.mxu0 %v12791_v35  ;;  %9280 = vmatprep.subr.bf16.mxu1 %v12794_v40  ;;  %v12855_v35 = vld [vmem:[%s13585_s26 + $0x1c50] ss:$80 sps:$4 sm:$0xff]   ;;  %v12858_v40 = vld [vmem:[%s13585_s26 + $0x1c58] ss:$80 sps:$4 sm:$0xff]  }
 0x3cf   : > { %9117 = vmatpush1.bf16.msra.mxu0 %v12789_v37  ;;  %9281 = vmatpush1.bf16.msra.mxu1 %v12792_v42  ;;  %v12863_v37 = vld [vmem:[%s13585_s26 + $0x1cf4] ss:$80 sps:$4 sm:$0xff]   ;;  %v12866_v42 = vld [vmem:[%s13585_s26 + $0x1cfc] ss:$80 sps:$4 sm:$0xff]  }
 0x3d0   : > { %9118 = vmatprep.subr.bf16.mxu0 %v12797_v43  ;;  %9282 = vmatprep.subr.bf16.mxu1 %v12800_v44  ;;  %v12861_v43 = vld [vmem:[%s13585_s26 + $0x1cf0] ss:$80 sps:$4 sm:$0xff]   ;;  %v12864_v44 = vld [vmem:[%s13585_s26 + $0x1cf8] ss:$80 sps:$4 sm:$0xff]  }
 0x3d3   : > { %9119 = vmatpush1.bf16.msra.mxu0 %v12795_v45  ;;  %9283 = vmatpush1.bf16.msra.mxu1 %v12798_v47  ;;  %v12869_v45 = vld [vmem:[%s13585_s26 + $0x1d94] ss:$80 sps:$4 sm:$0xff]   ;;  %v12872_v47 = vld [vmem:[%s13585_s26 + $0x1d9c] ss:$80 sps:$4 sm:$0xff]  }
 0x3d4   : > { %9120 = vmatprep.subr.bf16.mxu0 %v12803_v48  ;;  %9284 = vmatprep.subr.bf16.mxu1 %v12806_v51  ;;  %v12867_v48 = vld [vmem:[%s13585_s26 + $0x1d90] ss:$80 sps:$4 sm:$0xff]   ;;  %v12870_v51 = vld [vmem:[%s13585_s26 + $0x1d98] ss:$80 sps:$4 sm:$0xff]  }
 0x3d7   : > { %9121 = vmatpush1.bf16.msra.mxu0 %v12801_v52  ;;  %9285 = vmatpush1.bf16.msra.mxu1 %v12804_v53  ;;  %v12875_v52 = vld [vmem:[%s13585_s26 + $0x1e34] ss:$80 sps:$4 sm:$0xff]   ;;  %v12878_v53 = vld [vmem:[%s13585_s26 + $0x1e3c] ss:$80 sps:$4 sm:$0xff]  }
 0x3d8   : > { %9122 = vmatprep.subr.bf16.mxu0 %v12809_v56  ;;  %9286 = vmatprep.subr.bf16.mxu1 %v12812_v57  ;;  %v12873_v56 = vld [vmem:[%s13585_s26 + $0x1e30] ss:$80 sps:$4 sm:$0xff]   ;;  %v12876_v57 = vld [vmem:[%s13585_s26 + $0x1e38] ss:$80 sps:$4 sm:$0xff]  }
 0x3db   : > { %9123 = vmatpush1.bf16.msra.mxu0 %v12807_v58  ;;  %9287 = vmatpush1.bf16.msra.mxu1 %v12810_v59  ;;  %v12881_v58 = vld [vmem:[%s13585_s26 + $0x1ed4] ss:$80 sps:$4 sm:$0xff]   ;;  %v12884_v59 = vld [vmem:[%s13585_s26 + $0x1edc] ss:$80 sps:$4 sm:$0xff]  }
 0x3dc   : > { %9124 = vmatprep.subr.bf16.mxu0 %v12815_v60  ;;  %9288 = vmatprep.subr.bf16.mxu1 %v12818_v61  ;;  %v12879_v60 = vld [vmem:[%s13585_s26 + $0x1ed0] ss:$80 sps:$4 sm:$0xff]   ;;  %v12882_v61 = vld [vmem:[%s13585_s26 + $0x1ed8] ss:$80 sps:$4 sm:$0xff]  }
 0x3df   : > { %9125 = vmatpush1.bf16.msra.mxu0 %v12813_v63  ;;  %9289 = vmatpush1.bf16.msra.mxu1 %v12816_v0  ;;  %v12887_v63 = vld [vmem:[%s13585_s26 + $0x1f74] ss:$80 sps:$4 sm:$0xff]   ;;  %v12890_v0 = vld [vmem:[%s13585_s26 + $0x1f7c] ss:$80 sps:$4 sm:$0xff]  }
 0x3e0   : > { %9126 = vmatprep.subr.bf16.mxu0 %v12821_v2  ;;  %9290 = vmatprep.subr.bf16.mxu1 %v12824_v3  ;;  %v12885_v2 = vld [vmem:[%s13585_s26 + $0x1f70] ss:$80 sps:$4 sm:$0xff]   ;;  %v12888_v3 = vld [vmem:[%s13585_s26 + $0x1f78] ss:$80 sps:$4 sm:$0xff]  }
 0x3e3   : > { %9127 = vmatpush1.bf16.msra.mxu0 %v12819_v4  ;;  %9291 = vmatpush1.bf16.msra.mxu1 %v12822_v6  ;;  %v12893_v4 = vld [vmem:[%s13585_s26 + $0x2014] ss:$80 sps:$4 sm:$0xff]   ;;  %v12896_v6 = vld [vmem:[%s13585_s26 + $0x201c] ss:$80 sps:$4 sm:$0xff]  }
 0x3e4   : > { %9128 = vmatprep.subr.bf16.mxu0 %v12827_v7  ;;  %9292 = vmatprep.subr.bf16.mxu1 %v12830_v8  ;;  %v12891_v7 = vld [vmem:[%s13585_s26 + $0x2010] ss:$80 sps:$4 sm:$0xff]   ;;  %v12894_v8 = vld [vmem:[%s13585_s26 + $0x2018] ss:$80 sps:$4 sm:$0xff]  }
 0x3e7   : > { %9129 = vmatpush1.bf16.msra.mxu0 %v12825_v39  ;;  %9293 = vmatpush1.bf16.msra.mxu1 %v12828_v10  ;;  %v12899_v39 = vld [vmem:[%s13585_s26 + $0x20b4] ss:$80 sps:$4 sm:$0xff]   ;;  %v12902_v10 = vld [vmem:[%s13585_s26 + $0x20bc] ss:$80 sps:$4 sm:$0xff]  }
 0x3e8   : > { %9130 = vmatprep.subr.bf16.mxu0 %v12833_v11  ;;  %9294 = vmatprep.subr.bf16.mxu1 %v12836_v41  ;;  %v12897_v11 = vld [vmem:[%s13585_s26 + $0x20b0] ss:$80 sps:$4 sm:$0xff]   ;;  %v12900_v41 = vld [vmem:[%s13585_s26 + $0x20b8] ss:$80 sps:$4 sm:$0xff]  }
 0x3eb   : > { %9131 = vmatpush1.bf16.msra.mxu0 %v12831_v12  ;;  %9295 = vmatpush1.bf16.msra.mxu1 %v12834_v14  ;;  %v1541_v12 = vld [vmem:[%s14160_s30 + $0x8] sm:$0xff]  ;;  %v12905_v14 = vld [vmem:[%s13585_s26 + $0x2154] ss:$80 sps:$4 sm:$0xff]  }
 0x3ec   : > { %9132 = vmatprep.subr.bf16.mxu0 %v12839_v16  ;;  %9296 = vmatprep.subr.bf16.mxu1 %v12842_v18  ;;  %v12908_v16 = vld [vmem:[%s13585_s26 + $0x215c] ss:$80 sps:$4 sm:$0xff]   ;;  %v7981_v18 = vrot.slane %v1541_v12, %v13668_v1 }
 0x3ef   : > { %9133 = vmatpush1.bf16.msra.mxu0 %v12837_v19  ;;  %9297 = vmatpush1.bf16.msra.mxu1 %v12840_v21  ;;  %v7989_v19 = vrot.slane %v1541_v12, %v13750_v15  ;;  %v7985_v21 = vrot.slane %v1541_v12, %v13639_v46 }
 0x3f0   : > { %9134 = vmatprep.subr.bf16.mxu0 %v12845_v22  ;;  %9298 = vmatprep.subr.bf16.mxu1 %v12848_v23  ;;  %v7993_v22 = vrot.slane %v1541_v12, %v13674_v5  ;;  %v12903_v23 = vld [vmem:[%s13585_s26 + $0x2150] ss:$80 sps:$4 sm:$0xff]   ;;  %v12935_v12 = vld [vmem:[%s13585_s26 + $0x2474] ss:$80 sps:$4 sm:$0xff]  }
 0x3f3   : > { %9135 = vmatpush1.bf16.msra.mxu0 %v12843_v24  ;;  %9299 = vmatpush1.bf16.msra.mxu1 %v12846_v25  ;;  %v12906_v24 = vld [vmem:[%s13585_s26 + $0x2158] ss:$80 sps:$4 sm:$0xff]   ;;  %v12911_v25 = vld [vmem:[%s13585_s26 + $0x21f4] ss:$80 sps:$4 sm:$0xff]  }
 0x3f4   : > { %9136 = vmatprep.subr.bf16.mxu0 %v12851_v27  ;;  %9300 = vmatprep.subr.bf16.mxu1 %v12854_v29  ;;  %v12914_v27 = vld [vmem:[%s13585_s26 + $0x21fc] ss:$80 sps:$4 sm:$0xff]  }
 0x3f7   : > { %9137 = vmatpush1.bf16.msra.mxu0 %v12849_v30  ;;  %9301 = vmatpush1.bf16.msra.mxu1 %v12852_v31 }
 0x3f8   : > { %9138 = vmatprep.subr.bf16.mxu0 %v12857_v49  ;;  %9302 = vmatprep.subr.bf16.mxu1 %v12860_v34 }
 0x3fb   : > { %9139 = vmatpush1.bf16.msra.mxu0 %v12855_v35  ;;  %9303 = vmatpush1.bf16.msra.mxu1 %v12858_v40  ;;  %v12909_v40 = vld [vmem:[%s13585_s26 + $0x21f0] ss:$80 sps:$4 sm:$0xff]  }
 0x3fc   : > { %9140 = vmatprep.subr.bf16.mxu0 %v12863_v37  ;;  %9304 = vmatprep.subr.bf16.mxu1 %v12866_v42 }
 0x3ff   : > { %9141 = vmatpush1.bf16.msra.mxu0 %v12861_v43  ;;  %9305 = vmatpush1.bf16.msra.mxu1 %v12864_v44 }
 0x400   : > { %9142 = vmatprep.subr.bf16.mxu0 %v12869_v45  ;;  %9306 = vmatprep.subr.bf16.mxu1 %v12872_v47  ;;  %v12912_v45 = vld [vmem:[%s13585_s26 + $0x21f8] ss:$80 sps:$4 sm:$0xff]   ;;  %v12917_v47 = vld [vmem:[%s13585_s26 + $0x2294] ss:$80 sps:$4 sm:$0xff]  }
 0x403   : > { %9143 = vmatpush1.bf16.msra.mxu0 %v12867_v48  ;;  %9307 = vmatpush1.bf16.msra.mxu1 %v12870_v51 }
 0x404   : > { %9153 = vmatprep.subr.bf16.mxu0 %v12875_v52  ;;  %9317 = vmatprep.subr.bf16.mxu1 %v12878_v53 }
 0x406   : > { %9145 = vmatmul.mubr.bf16.vlgmr.msra.gmra.mrb[12].mxu0 %v13854_v50  ;;  %9309 = vmatmul.mubr.bf16.vlgmr.msra.gmra.mrb[12].mxu1 %v13854_v50 }
 0x407   : > { %9154 = vmatpush1.bf16.msra.mxu0 %v12873_v56  ;;  %9318 = vmatpush1.bf16.msra.mxu1 %v12876_v57  ;;  %v12920_v56 = vld [vmem:[%s13585_s26 + $0x229c] ss:$80 sps:$4 sm:$0xff]  }
 0x408   : > { %9155 = vmatprep.subr.bf16.mxu0 %v12881_v58  ;;  %9319 = vmatprep.subr.bf16.mxu1 %v12884_v59 }
 0x409   : > { %9185 = vmatprep.mubr.bf16.mxu0 %v13859_v54  ;;  %9349 = vmatprep.mubr.bf16.mxu1 %v13859_v54 }
 0x40b   : > { %9156 = vmatpush1.bf16.msra.mxu0 %v12879_v60  ;;  %9320 = vmatpush1.bf16.msra.mxu1 %v12882_v61  ;;  %v12915_v61 = vld [vmem:[%s13585_s26 + $0x2290] ss:$80 sps:$4 sm:$0xff]  }
 0x40c   : > { %9157 = vmatprep.subr.bf16.mxu0 %v12887_v63  ;;  %9321 = vmatprep.subr.bf16.mxu1 %v12890_v0  ;;  %v12918_v63 = vld [vmem:[%s13585_s26 + $0x2298] ss:$80 sps:$4 sm:$0xff]   ;;  %v12923_v0 = vld [vmem:[%s13585_s26 + $0x2334] ss:$80 sps:$4 sm:$0xff]  }
 0x40f   : > { %9158 = vmatpush1.bf16.msra.mxu0 %v12885_v2  ;;  %9322 = vmatpush1.bf16.msra.mxu1 %v12888_v3  ;;  %v12926_v2 = vld [vmem:[%s13585_s26 + $0x233c] ss:$80 sps:$4 sm:$0xff]  }
 0x410   : > { %9159 = vmatprep.subr.bf16.mxu0 %v12893_v4  ;;  %9323 = vmatprep.subr.bf16.mxu1 %v12896_v6 }
 0x413   : > { %9160 = vmatpush1.bf16.msra.mxu0 %v12891_v7  ;;  %9324 = vmatpush1.bf16.msra.mxu1 %v12894_v8  ;;  %v12921_v7 = vld [vmem:[%s13585_s26 + $0x2330] ss:$80 sps:$4 sm:$0xff]   ;;  %v12924_v8 = vld [vmem:[%s13585_s26 + $0x2338] ss:$80 sps:$4 sm:$0xff]  }
 0x414   : > { %9161 = vmatprep.subr.bf16.mxu0 %v12899_v39  ;;  %9325 = vmatprep.subr.bf16.mxu1 %v12902_v10  ;;  %v12929_v39 = vld [vmem:[%s13585_s26 + $0x23d4] ss:$80 sps:$4 sm:$0xff]   ;;  %v12932_v10 = vld [vmem:[%s13585_s26 + $0x23dc] ss:$80 sps:$4 sm:$0xff]  }
 0x417   : > { %9162 = vmatpush1.bf16.msra.mxu0 %v12897_v11  ;;  %9326 = vmatpush1.bf16.msra.mxu1 %v12900_v41  ;;  %v12927_v11 = vld [vmem:[%s13585_s26 + $0x23d0] ss:$80 sps:$4 sm:$0xff]   ;;  %v12930_v41 = vld [vmem:[%s13585_s26 + $0x23d8] ss:$80 sps:$4 sm:$0xff]  }
 0x418   : > { %9163 = vmatprep.subr.bf16.mxu0 %v12905_v14  ;;  %9327 = vmatprep.subr.bf16.mxu1 %v12908_v16  ;;  %v12938_v14 = vld [vmem:[%s13585_s26 + $0x247c] ss:$80 sps:$4 sm:$0xff]   ;;  %v12933_v16 = vld [vmem:[%s13585_s26 + $0x2470] ss:$80 sps:$4 sm:$0xff]  }
 0x419   : > { %v8859_v29 = vpop.f32.mrb[8].mxu0  ;;  %v9023_v30 = vpop.f32.mrb[8].mxu1 }
 0x41a   : > { %v11256_v31 = vadd.f32 %v8859_v29, %v7981_v18  ;;  %v11258_v49 = vadd.f32 %v9023_v30, %v7989_v19  ;;  %v8861_v34 = vpop.f32.mrb[9].mxu0  ;;  %v9025_v35 = vpop.f32.mrb[9].mxu1  ;;  %v12936_v18 = vld [vmem:[%s13585_s26 + $0x2478] ss:$80 sps:$4 sm:$0xff]   ;;  %v12941_v19 = vld [vmem:[%s13585_s26 + $0x2514] ss:$80 sps:$4 sm:$0xff]  }
 0x41b   : > { %v11257_v37 = vadd.f32 %v8861_v34, %v7985_v21  ;;  %v11259_v42 = vadd.f32 %v9025_v35, %v7993_v22  ;;  %v8863_v43 = vpop.f32.mrb[10].mxu0  ;;  %v9027_v44 = vpop.f32.mrb[10].mxu1  ;;  %9164 = vmatpush1.bf16.msra.mxu0 %v12903_v23  ;;  %9328 = vmatpush1.bf16.msra.mxu1 %v12906_v24  ;;  %v12944_v21 = vld [vmem:[%s13585_s26 + $0x251c] ss:$80 sps:$4 sm:$0xff]   ;;  %v12939_v22 = vld [vmem:[%s13585_s26 + $0x2510] ss:$80 sps:$4 sm:$0xff]  }
 0x41c   : > { %v9694_v48 = vmax.f32 %v11256_v31, 0.0  ;;  %v9696_v51 = vmax.f32 %v11258_v49, 0.0  ;;  %v8864_v52 = vpop.f32.mrb[11].mxu0  ;;  %v9028_v53 = vpop.f32.mrb[11].mxu1  ;;  %9165 = vmatprep.subr.bf16.mxu0 %v12911_v25  ;;  %9329 = vmatprep.subr.bf16.mxu1 %v12914_v27  ;;  %v12942_v23 = vld [vmem:[%s13585_s26 + $0x2518] ss:$80 sps:$4 sm:$0xff]  }
 0x41d   : > { %v9695_v57 = vmax.f32 %v11257_v37, 0.0  ;;  %v9697_v58 = vmax.f32 %v11259_v42, 0.0  ;;  %v12947_v24 = vld [vmem:[%s13585_s26 + $0x25b4] ss:$80 sps:$4 sm:$0xff]   ;;  %v12950_v25 = vld [vmem:[%s13585_s26 + $0x25bc] ss:$80 sps:$4 sm:$0xff]  }
 0x41e   : > { %v12945_v27 = vld [vmem:[%s13585_s26 + $0x25b0] ss:$80 sps:$4 sm:$0xff]   ;;  %v12948_v29 = vld [vmem:[%s13585_s26 + $0x25b8] ss:$80 sps:$4 sm:$0xff]   ;;  %v12953_v30 = vld [vmem:[%s13585_s26 + $0x2654] ss:$80 sps:$4 sm:$0xff]  }
 0x41f   : > { %v9775_v59 = vcombine.low %v9694_v48, %v9695_v57  ;;  %v9776_v60 = vcombine.low %v9696_v51, %v9697_v58  ;;  %9166 = vmatpush1.bf16.msra.mxu0 %v12909_v40  ;;  %9330 = vmatpush1.bf16.msra.mxu1 %v12912_v45  ;;  %v12956_v31 = vld [vmem:[%s13585_s26 + $0x265c] ss:$80 sps:$4 sm:$0xff]   ;;  %v12951_v49 = vld [vmem:[%s13585_s26 + $0x2650] ss:$80 sps:$4 sm:$0xff]   ;;  %v12954_v34 = vld [vmem:[%s13585_s26 + $0x2658] ss:$80 sps:$4 sm:$0xff]  }
 0x420   : > { %9167 = vmatprep.subr.bf16.mxu0 %v12917_v47  ;;  %9331 = vmatprep.subr.bf16.mxu1 %v12920_v56  ;;  %v12959_v35 = vld [vmem:[%s13585_s26 + $0x26f4] ss:$80 sps:$4 sm:$0xff]   ;;  %v12962_v40 = vld [vmem:[%s13585_s26 + $0x26fc] ss:$80 sps:$4 sm:$0xff]   ;;  %v12957_v37 = vld [vmem:[%s13585_s26 + $0x26f0] ss:$80 sps:$4 sm:$0xff]  }
 0x421   : > { %v9785_v3 = vrot.slane %v9775_v59, %v14180_v26  ;;  %v9792_v4 = vrot.slane %v9776_v60, %v14180_v26  ;;  %v12960_v42 = vld [vmem:[%s13585_s26 + $0x26f8] ss:$80 sps:$4 sm:$0xff]   ;;  %v12965_v43 = vld [vmem:[%s13585_s26 + $0x2794] ss:$80 sps:$4 sm:$0xff]   ;;  %v12968_v44 = vld [vmem:[%s13585_s26 + $0x279c] ss:$80 sps:$4 sm:$0xff]  }
 0x422   : > { %v12963_v45 = vld [vmem:[%s13585_s26 + $0x2790] ss:$80 sps:$4 sm:$0xff]   ;;  %v12966_v47 = vld [vmem:[%s13585_s26 + $0x2798] ss:$80 sps:$4 sm:$0xff]   ;;  %v12971_v48 = vld [vmem:[%s13585_s26 + $0x44] ss:$80 sps:$4 sm:$0xff]  }
 0x423   : > { %v14755_v6 = vcombine.low %v9785_v3, %v9792_v4  ;;  %9168 = vmatpush1.bf16.msra.mxu0 %v12915_v61  ;;  %9332 = vmatpush1.bf16.msra.mxu1 %v12918_v63  ;;  %v12974_v51 = vld [vmem:[%s13585_s26 + $0x4c] ss:$80 sps:$4 sm:$0xff]   ;;  %v12969_v52 = vld [vmem:[%s13585_s26 + $0x40] ss:$80 sps:$4 sm:$0xff]   ;;  %v12972_v53 = vld [vmem:[%s13585_s26 + $0x48] ss:$80 sps:$4 sm:$0xff]  }
 0x424   : > { %9169 = vmatprep.subr.bf16.mxu0 %v12923_v0  ;;  %9333 = vmatprep.subr.bf16.mxu1 %v12926_v2  ;;  %v12977_v56 = vld [vmem:[%s13585_s26 + $0xe4] ss:$80 sps:$4 sm:$0xff]   ;;  %v12980_v57 = vld [vmem:[%s13585_s26 + $0xec] ss:$80 sps:$4 sm:$0xff]   ;;  %v12975_v58 = vld [vmem:[%s13585_s26 + $0xe0] ss:$80 sps:$4 sm:$0xff]  }
 0x425   : > { %v12978_v59 = vld [vmem:[%s13585_s26 + $0xe8] ss:$80 sps:$4 sm:$0xff]   ;;  %v12983_v60 = vld [vmem:[%s13585_s26 + $0x184] ss:$80 sps:$4 sm:$0xff]   ;;  %v12986_v61 = vld [vmem:[%s13585_s26 + $0x18c] ss:$80 sps:$4 sm:$0xff]  }
 0x426   : > { %v12981_v63 = vld [vmem:[%s13585_s26 + $0x180] ss:$80 sps:$4 sm:$0xff]   ;;  %v12984_v0 = vld [vmem:[%s13585_s26 + $0x188] ss:$80 sps:$4 sm:$0xff]   ;;  %v12989_v2 = vld [vmem:[%s13585_s26 + $0x224] ss:$80 sps:$4 sm:$0xff]  }
 0x427   : > { %9170 = vmatpush1.bf16.msra.mxu0 %v12921_v7  ;;  %9334 = vmatpush1.bf16.msra.mxu1 %v12924_v8  ;;  %v12992_v3 = vld [vmem:[%s13585_s26 + $0x22c] ss:$80 sps:$4 sm:$0xff]   ;;  %v12987_v4 = vld [vmem:[%s13585_s26 + $0x220] ss:$80 sps:$4 sm:$0xff]   ;;  %v12990_v7 = vld [vmem:[%s13585_s26 + $0x228] ss:$80 sps:$4 sm:$0xff]  }
 0x428   : > { %9171 = vmatprep.subr.bf16.mxu0 %v12929_v39  ;;  %9335 = vmatprep.subr.bf16.mxu1 %v12932_v10  ;;  %v12998_v8 = vld [vmem:[%s13585_s26 + $0x2cc] ss:$80 sps:$4 sm:$0xff]   ;;  %v12993_v39 = vld [vmem:[%s13585_s26 + $0x2c0] ss:$80 sps:$4 sm:$0xff]   ;;  %v12996_v10 = vld [vmem:[%s13585_s26 + $0x2c8] ss:$80 sps:$4 sm:$0xff]  }
 0x42b   : > { %9172 = vmatpush1.bf16.msra.mxu0 %v12927_v11  ;;  %9336 = vmatpush1.bf16.msra.mxu1 %v12930_v41  ;;  %v13001_v11 = vld [vmem:[%s13585_s26 + $0x364] ss:$80 sps:$4 sm:$0xff]   ;;  %v13004_v41 = vld [vmem:[%s13585_s26 + $0x36c] ss:$80 sps:$4 sm:$0xff]  }
 0x42c   : > { %9173 = vmatprep.subr.bf16.mxu0 %v12935_v12  ;;  %9337 = vmatprep.subr.bf16.mxu1 %v12938_v14  ;;  %v12999_v12 = vld [vmem:[%s13585_s26 + $0x360] ss:$80 sps:$4 sm:$0xff]   ;;  %v13002_v14 = vld [vmem:[%s13585_s26 + $0x368] ss:$80 sps:$4 sm:$0xff]  }
 0x42f   : > { %9174 = vmatpush1.bf16.msra.mxu0 %v12933_v16  ;;  %9338 = vmatpush1.bf16.msra.mxu1 %v12936_v18  ;;  %v13007_v16 = vld [vmem:[%s13585_s26 + $0x404] ss:$80 sps:$4 sm:$0xff]   ;;  %v13010_v18 = vld [vmem:[%s13585_s26 + $0x40c] ss:$80 sps:$4 sm:$0xff]  }
 0x430   : > { %9175 = vmatprep.subr.bf16.mxu0 %v12941_v19  ;;  %9339 = vmatprep.subr.bf16.mxu1 %v12944_v21  ;;  %v13005_v19 = vld [vmem:[%s13585_s26 + $0x400] ss:$80 sps:$4 sm:$0xff]   ;;  %v13008_v21 = vld [vmem:[%s13585_s26 + $0x408] ss:$80 sps:$4 sm:$0xff]  }
 0x433   : > { %9176 = vmatpush1.bf16.msra.mxu0 %v12939_v22  ;;  %9340 = vmatpush1.bf16.msra.mxu1 %v12942_v23  ;;  %v13013_v22 = vld [vmem:[%s13585_s26 + $0x4a4] ss:$80 sps:$4 sm:$0xff]   ;;  %v13016_v23 = vld [vmem:[%s13585_s26 + $0x4ac] ss:$80 sps:$4 sm:$0xff]  }
 0x434   : > { %9177 = vmatprep.subr.bf16.mxu0 %v12947_v24  ;;  %9341 = vmatprep.subr.bf16.mxu1 %v12950_v25  ;;  %v13011_v24 = vld [vmem:[%s13585_s26 + $0x4a0] ss:$80 sps:$4 sm:$0xff]   ;;  %v13014_v25 = vld [vmem:[%s13585_s26 + $0x4a8] ss:$80 sps:$4 sm:$0xff]  }
 0x437   : > { %9178 = vmatpush1.bf16.msra.mxu0 %v12945_v27  ;;  %9342 = vmatpush1.bf16.msra.mxu1 %v12948_v29  ;;  %v13019_v27 = vld [vmem:[%s13585_s26 + $0x544] ss:$80 sps:$4 sm:$0xff]   ;;  %v13022_v29 = vld [vmem:[%s13585_s26 + $0x54c] ss:$80 sps:$4 sm:$0xff]  }
 0x438   : > { %9179 = vmatprep.subr.bf16.mxu0 %v12953_v30  ;;  %9343 = vmatprep.subr.bf16.mxu1 %v12956_v31  ;;  %v13017_v30 = vld [vmem:[%s13585_s26 + $0x540] ss:$80 sps:$4 sm:$0xff]   ;;  %v13020_v31 = vld [vmem:[%s13585_s26 + $0x548] ss:$80 sps:$4 sm:$0xff]  }
 0x43b   : > { %9180 = vmatpush1.bf16.msra.mxu0 %v12951_v49  ;;  %9344 = vmatpush1.bf16.msra.mxu1 %v12954_v34  ;;  %v13025_v49 = vld [vmem:[%s13585_s26 + $0x5e4] ss:$80 sps:$4 sm:$0xff]   ;;  %v13028_v34 = vld [vmem:[%s13585_s26 + $0x5ec] ss:$80 sps:$4 sm:$0xff]  }
 0x43c   : > { %9181 = vmatprep.subr.bf16.mxu0 %v12959_v35  ;;  %9345 = vmatprep.subr.bf16.mxu1 %v12962_v40  ;;  %v13023_v35 = vld [vmem:[%s13585_s26 + $0x5e0] ss:$80 sps:$4 sm:$0xff]   ;;  %v13026_v40 = vld [vmem:[%s13585_s26 + $0x5e8] ss:$80 sps:$4 sm:$0xff]  }
 0x43f   : > { %9182 = vmatpush1.bf16.msra.mxu0 %v12957_v37  ;;  %9346 = vmatpush1.bf16.msra.mxu1 %v12960_v42  ;;  %v13031_v37 = vld [vmem:[%s13585_s26 + $0x684] ss:$80 sps:$4 sm:$0xff]   ;;  %v13034_v42 = vld [vmem:[%s13585_s26 + $0x68c] ss:$80 sps:$4 sm:$0xff]  }
 0x440   : > { %9183 = vmatprep.subr.bf16.mxu0 %v12965_v43  ;;  %9347 = vmatprep.subr.bf16.mxu1 %v12968_v44  ;;  %v13029_v43 = vld [vmem:[%s13585_s26 + $0x680] ss:$80 sps:$4 sm:$0xff]   ;;  %v13032_v44 = vld [vmem:[%s13585_s26 + $0x688] ss:$80 sps:$4 sm:$0xff]  }
 0x443   : > { %9184 = vmatpush1.bf16.msra.mxu0 %v12963_v45  ;;  %9348 = vmatpush1.bf16.msra.mxu1 %v12966_v47  ;;  %v13037_v45 = vld [vmem:[%s13585_s26 + $0x724] ss:$80 sps:$4 sm:$0xff]   ;;  %v13040_v47 = vld [vmem:[%s13585_s26 + $0x72c] ss:$80 sps:$4 sm:$0xff]  }
 0x444   : > { %9358 = vmatprep.subr.bf16.mxu0 %v12971_v48  ;;  %9522 = vmatprep.subr.bf16.mxu1 %v12974_v51  ;;  %v13035_v48 = vld [vmem:[%s13585_s26 + $0x720] ss:$80 sps:$4 sm:$0xff]   ;;  %v13038_v51 = vld [vmem:[%s13585_s26 + $0x728] ss:$80 sps:$4 sm:$0xff]  }
 0x446   : > { %9186 = vmatmul.mubr.bf16.vlgmr.msra.gmra.mrb[12].mxu0 %v13930_v9  ;;  %9350 = vmatmul.mubr.bf16.vlgmr.msra.gmra.mrb[12].mxu1 %v13930_v9 }
 0x447   : > { %9359 = vmatpush1.bf16.msra.mxu0 %v12969_v52  ;;  %9523 = vmatpush1.bf16.msra.mxu1 %v12972_v53  ;;  %v13043_v52 = vld [vmem:[%s13585_s26 + $0x7c4] ss:$80 sps:$4 sm:$0xff]   ;;  %v13046_v53 = vld [vmem:[%s13585_s26 + $0x7cc] ss:$80 sps:$4 sm:$0xff]  }
 0x448   : > { %9360 = vmatprep.subr.bf16.mxu0 %v12977_v56  ;;  %9524 = vmatprep.subr.bf16.mxu1 %v12980_v57  ;;  %v13041_v56 = vld [vmem:[%s13585_s26 + $0x7c0] ss:$80 sps:$4 sm:$0xff]   ;;  %v13044_v57 = vld [vmem:[%s13585_s26 + $0x7c8] ss:$80 sps:$4 sm:$0xff]  }
 0x449   : > { %9390 = vmatprep.mubr.bf16.mxu0 %v13654_v55  ;;  %9554 = vmatprep.mubr.bf16.mxu1 %v13654_v55  ;;  %v12995_v55 = vld [vmem:[%s13585_s26 + $0x2c4] ss:$80 sps:$4 sm:$0xff]  }
 0x44b   : > { %9361 = vmatpush1.bf16.msra.mxu0 %v12975_v58  ;;  %9525 = vmatpush1.bf16.msra.mxu1 %v12978_v59  ;;  %v13049_v58 = vld [vmem:[%s13585_s26 + $0x864] ss:$80 sps:$4 sm:$0xff]   ;;  %v13052_v59 = vld [vmem:[%s13585_s26 + $0x86c] ss:$80 sps:$4 sm:$0xff]  }
 0x44c   : > { %9362 = vmatprep.subr.bf16.mxu0 %v12983_v60  ;;  %9526 = vmatprep.subr.bf16.mxu1 %v12986_v61  ;;  %v13047_v60 = vld [vmem:[%s13585_s26 + $0x860] ss:$80 sps:$4 sm:$0xff]   ;;  %v13050_v61 = vld [vmem:[%s13585_s26 + $0x868] ss:$80 sps:$4 sm:$0xff]  }
 0x44f   : > { %9363 = vmatpush1.bf16.msra.mxu0 %v12981_v63  ;;  %9527 = vmatpush1.bf16.msra.mxu1 %v12984_v0  ;;  %v13055_v63 = vld [vmem:[%s13585_s26 + $0x904] ss:$80 sps:$4 sm:$0xff]   ;;  %v13058_v0 = vld [vmem:[%s13585_s26 + $0x90c] ss:$80 sps:$4 sm:$0xff]  }
 0x450   : > { %9364 = vmatprep.subr.bf16.mxu0 %v12989_v2  ;;  %9528 = vmatprep.subr.bf16.mxu1 %v12992_v3  ;;  %v13053_v2 = vld [vmem:[%s13585_s26 + $0x900] ss:$80 sps:$4 sm:$0xff]   ;;  %v13056_v3 = vld [vmem:[%s13585_s26 + $0x908] ss:$80 sps:$4 sm:$0xff]  }
 0x453   : > { %9365 = vmatpush1.bf16.msra.mxu0 %v12987_v4  ;;  %9529 = vmatpush1.bf16.msra.mxu1 %v12990_v7  ;;  %v13061_v4 = vld [vmem:[%s13585_s26 + $0x9a4] ss:$80 sps:$4 sm:$0xff]   ;;  %v13064_v7 = vld [vmem:[%s13585_s26 + $0x9ac] ss:$80 sps:$4 sm:$0xff]  }
 0x454   : > { %9366 = vmatprep.subr.bf16.mxu0 %v12995_v55  ;;  %9530 = vmatprep.subr.bf16.mxu1 %v12998_v8  ;;  %v13059_v55 = vld [vmem:[%s13585_s26 + $0x9a0] ss:$80 sps:$4 sm:$0xff]   ;;  %v13062_v8 = vld [vmem:[%s13585_s26 + $0x9a8] ss:$80 sps:$4 sm:$0xff]  }
 0x457   : > { %9367 = vmatpush1.bf16.msra.mxu0 %v12993_v39  ;;  %9531 = vmatpush1.bf16.msra.mxu1 %v12996_v10  ;;  %v13067_v39 = vld [vmem:[%s13585_s26 + $0xa44] ss:$80 sps:$4 sm:$0xff]   ;;  %v13070_v10 = vld [vmem:[%s13585_s26 + $0xa4c] ss:$80 sps:$4 sm:$0xff]  }
 0x458   : > { %9368 = vmatprep.subr.bf16.mxu0 %v13001_v11  ;;  %9532 = vmatprep.subr.bf16.mxu1 %v13004_v41  ;;  %v13065_v11 = vld [vmem:[%s13585_s26 + $0xa40] ss:$80 sps:$4 sm:$0xff]   ;;  %v13068_v41 = vld [vmem:[%s13585_s26 + $0xa48] ss:$80 sps:$4 sm:$0xff]  }
 0x45b   : > { %9369 = vmatpush1.bf16.msra.mxu0 %v12999_v12  ;;  %9533 = vmatpush1.bf16.msra.mxu1 %v13002_v14  ;;  %v13073_v12 = vld [vmem:[%s13585_s26 + $0xae4] ss:$80 sps:$4 sm:$0xff]   ;;  %v13076_v14 = vld [vmem:[%s13585_s26 + $0xaec] ss:$80 sps:$4 sm:$0xff]  }
 0x45c   : > { %9370 = vmatprep.subr.bf16.mxu0 %v13007_v16  ;;  %9534 = vmatprep.subr.bf16.mxu1 %v13010_v18  ;;  %v13071_v16 = vld [vmem:[%s13585_s26 + $0xae0] ss:$80 sps:$4 sm:$0xff]   ;;  %v13074_v18 = vld [vmem:[%s13585_s26 + $0xae8] ss:$80 sps:$4 sm:$0xff]  }
 0x45f   : > { %9371 = vmatpush1.bf16.msra.mxu0 %v13005_v19  ;;  %9535 = vmatpush1.bf16.msra.mxu1 %v13008_v21  ;;  %v13079_v19 = vld [vmem:[%s13585_s26 + $0xb84] ss:$80 sps:$4 sm:$0xff]   ;;  %v13082_v21 = vld [vmem:[%s13585_s26 + $0xb8c] ss:$80 sps:$4 sm:$0xff]  }
 0x460   : > { %9372 = vmatprep.subr.bf16.mxu0 %v13013_v22  ;;  %9536 = vmatprep.subr.bf16.mxu1 %v13016_v23  ;;  %v13080_v22 = vld [vmem:[%s13585_s26 + $0xb88] ss:$80 sps:$4 sm:$0xff]   ;;  %v13085_v23 = vld [vmem:[%s13585_s26 + $0xc24] ss:$80 sps:$4 sm:$0xff]  }
 0x463   : > { %9373 = vmatpush1.bf16.msra.mxu0 %v13011_v24  ;;  %9537 = vmatpush1.bf16.msra.mxu1 %v13014_v25  ;;  %v13088_v24 = vld [vmem:[%s13585_s26 + $0xc2c] ss:$80 sps:$4 sm:$0xff]   ;;  %v13083_v25 = vld [vmem:[%s13585_s26 + $0xc20] ss:$80 sps:$4 sm:$0xff]  }
 0x464   : > { %9374 = vmatprep.subr.bf16.mxu0 %v13019_v27  ;;  %9538 = vmatprep.subr.bf16.mxu1 %v13022_v29  ;;  %v13086_v27 = vld [vmem:[%s13585_s26 + $0xc28] ss:$80 sps:$4 sm:$0xff]   ;;  %v13094_v29 = vld [vmem:[%s13585_s26 + $0xccc] ss:$80 sps:$4 sm:$0xff]  }
 0x467   : > { %9375 = vmatpush1.bf16.msra.mxu0 %v13017_v30  ;;  %9539 = vmatpush1.bf16.msra.mxu1 %v13020_v31  ;;  %v13089_v30 = vld [vmem:[%s13585_s26 + $0xcc0] ss:$80 sps:$4 sm:$0xff]   ;;  %v13092_v31 = vld [vmem:[%s13585_s26 + $0xcc8] ss:$80 sps:$4 sm:$0xff]  }
 0x468   : > { %9376 = vmatprep.subr.bf16.mxu0 %v13025_v49  ;;  %9540 = vmatprep.subr.bf16.mxu1 %v13028_v34  ;;  %v13097_v49 = vld [vmem:[%s13585_s26 + $0xd64] ss:$80 sps:$4 sm:$0xff]   ;;  %v13100_v34 = vld [vmem:[%s13585_s26 + $0xd6c] ss:$80 sps:$4 sm:$0xff]  }
 0x46b   : > { %9377 = vmatpush1.bf16.msra.mxu0 %v13023_v35  ;;  %9541 = vmatpush1.bf16.msra.mxu1 %v13026_v40  ;;  %v13095_v35 = vld [vmem:[%s13585_s26 + $0xd60] ss:$80 sps:$4 sm:$0xff]   ;;  %v13098_v40 = vld [vmem:[%s13585_s26 + $0xd68] ss:$80 sps:$4 sm:$0xff]  }
 0x46c   : > { %9378 = vmatprep.subr.bf16.mxu0 %v13031_v37  ;;  %9542 = vmatprep.subr.bf16.mxu1 %v13034_v42  ;;  %v13103_v37 = vld [vmem:[%s13585_s26 + $0xe04] ss:$80 sps:$4 sm:$0xff]   ;;  %v13106_v42 = vld [vmem:[%s13585_s26 + $0xe0c] ss:$80 sps:$4 sm:$0xff]  }
 0x46f   : > { %9379 = vmatpush1.bf16.msra.mxu0 %v13029_v43  ;;  %9543 = vmatpush1.bf16.msra.mxu1 %v13032_v44  ;;  %v13101_v43 = vld [vmem:[%s13585_s26 + $0xe00] ss:$80 sps:$4 sm:$0xff]   ;;  %v13104_v44 = vld [vmem:[%s13585_s26 + $0xe08] ss:$80 sps:$4 sm:$0xff]  }
 0x470   : > { %9380 = vmatprep.subr.bf16.mxu0 %v13037_v45  ;;  %9544 = vmatprep.subr.bf16.mxu1 %v13040_v47  ;;  %v13109_v45 = vld [vmem:[%s13585_s26 + $0xea4] ss:$80 sps:$4 sm:$0xff]   ;;  %v13112_v47 = vld [vmem:[%s13585_s26 + $0xeac] ss:$80 sps:$4 sm:$0xff]  }
 0x473   : > { %9381 = vmatpush1.bf16.msra.mxu0 %v13035_v48  ;;  %9545 = vmatpush1.bf16.msra.mxu1 %v13038_v51  ;;  %v13107_v48 = vld [vmem:[%s13585_s26 + $0xea0] ss:$80 sps:$4 sm:$0xff]   ;;  %v13110_v51 = vld [vmem:[%s13585_s26 + $0xea8] ss:$80 sps:$4 sm:$0xff]  }
 0x474   : > { %9382 = vmatprep.subr.bf16.mxu0 %v13043_v52  ;;  %9546 = vmatprep.subr.bf16.mxu1 %v13046_v53  ;;  %v13115_v52 = vld [vmem:[%s13585_s26 + $0xf44] ss:$80 sps:$4 sm:$0xff]   ;;  %v13118_v53 = vld [vmem:[%s13585_s26 + $0xf4c] ss:$80 sps:$4 sm:$0xff]  }
 0x477   : > { %9383 = vmatpush1.bf16.msra.mxu0 %v13041_v56  ;;  %9547 = vmatpush1.bf16.msra.mxu1 %v13044_v57  ;;  %v13113_v56 = vld [vmem:[%s13585_s26 + $0xf40] ss:$80 sps:$4 sm:$0xff]   ;;  %v13116_v57 = vld [vmem:[%s13585_s26 + $0xf48] ss:$80 sps:$4 sm:$0xff]  }
 0x478   : > { %9384 = vmatprep.subr.bf16.mxu0 %v13049_v58  ;;  %9548 = vmatprep.subr.bf16.mxu1 %v13052_v59  ;;  %v13121_v58 = vld [vmem:[%s13585_s26 + $0xfe4] ss:$80 sps:$4 sm:$0xff]   ;;  %v13124_v59 = vld [vmem:[%s13585_s26 + $0xfec] ss:$80 sps:$4 sm:$0xff]  }
 0x47b   : > { %9385 = vmatpush1.bf16.msra.mxu0 %v13047_v60  ;;  %9549 = vmatpush1.bf16.msra.mxu1 %v13050_v61  ;;  %v13119_v60 = vld [vmem:[%s13585_s26 + $0xfe0] ss:$80 sps:$4 sm:$0xff]   ;;  %v13122_v61 = vld [vmem:[%s13585_s26 + $0xfe8] ss:$80 sps:$4 sm:$0xff]  }
 0x47c   : > { %9386 = vmatprep.subr.bf16.mxu0 %v13055_v63  ;;  %9550 = vmatprep.subr.bf16.mxu1 %v13058_v0  ;;  %v13127_v63 = vld [vmem:[%s13585_s26 + $0x1084] ss:$80 sps:$4 sm:$0xff]   ;;  %v13130_v0 = vld [vmem:[%s13585_s26 + $0x108c] ss:$80 sps:$4 sm:$0xff]  }
 0x47f   : > { %9387 = vmatpush1.bf16.msra.mxu0 %v13053_v2  ;;  %9551 = vmatpush1.bf16.msra.mxu1 %v13056_v3  ;;  %v13125_v2 = vld [vmem:[%s13585_s26 + $0x1080] ss:$80 sps:$4 sm:$0xff]   ;;  %v13128_v3 = vld [vmem:[%s13585_s26 + $0x1088] ss:$80 sps:$4 sm:$0xff]  }
 0x480   : > { %9388 = vmatprep.subr.bf16.mxu0 %v13061_v4  ;;  %9552 = vmatprep.subr.bf16.mxu1 %v13064_v7  ;;  %v13133_v4 = vld [vmem:[%s13585_s26 + $0x1124] ss:$80 sps:$4 sm:$0xff]   ;;  %v13136_v7 = vld [vmem:[%s13585_s26 + $0x112c] ss:$80 sps:$4 sm:$0xff]  }
 0x483   : > { %9389 = vmatpush1.bf16.msra.mxu0 %v13059_v55  ;;  %9553 = vmatpush1.bf16.msra.mxu1 %v13062_v8  ;;  %v13131_v55 = vld [vmem:[%s13585_s26 + $0x1120] ss:$80 sps:$4 sm:$0xff]   ;;  %v13134_v8 = vld [vmem:[%s13585_s26 + $0x1128] ss:$80 sps:$4 sm:$0xff]  }
 0x484   : > { %9399 = vmatprep.subr.bf16.mxu0 %v13067_v39  ;;  %9563 = vmatprep.subr.bf16.mxu1 %v13070_v10  ;;  %v13139_v39 = vld [vmem:[%s13585_s26 + $0x11c4] ss:$80 sps:$4 sm:$0xff]   ;;  %v13142_v10 = vld [vmem:[%s13585_s26 + $0x11cc] ss:$80 sps:$4 sm:$0xff]  }
 0x486   : > { %9391 = vmatmul.mubr.bf16.vlgmr.msra.gmra.mrb[16].mxu0 %v13685_v13  ;;  %9555 = vmatmul.mubr.bf16.vlgmr.msra.gmra.mrb[16].mxu1 %v13685_v13  ;;  %v13077_v13 = vld [vmem:[%s13585_s26 + $0xb80] ss:$80 sps:$4 sm:$0xff]  }
 0x487   : > { %9400 = vmatpush1.bf16.msra.mxu0 %v13065_v11  ;;  %9564 = vmatpush1.bf16.msra.mxu1 %v13068_v41  ;;  %v13137_v11 = vld [vmem:[%s13585_s26 + $0x11c0] ss:$80 sps:$4 sm:$0xff]   ;;  %v13140_v41 = vld [vmem:[%s13585_s26 + $0x11c8] ss:$80 sps:$4 sm:$0xff]  }
 0x488   : > { %9401 = vmatprep.subr.bf16.mxu0 %v13073_v12  ;;  %9565 = vmatprep.subr.bf16.mxu1 %v13076_v14  ;;  %v13145_v12 = vld [vmem:[%s13585_s26 + $0x1264] ss:$80 sps:$4 sm:$0xff]   ;;  %v13148_v14 = vld [vmem:[%s13585_s26 + $0x126c] ss:$80 sps:$4 sm:$0xff]  }
 0x489   : > { %9431 = vmatprep.mubr.bf16.mxu0 %v13690_v17  ;;  %9595 = vmatprep.mubr.bf16.mxu1 %v13690_v17  ;;  %v13091_v17 = vld [vmem:[%s13585_s26 + $0xcc4] ss:$80 sps:$4 sm:$0xff]  }
 0x48b   : > { %9402 = vmatpush1.bf16.msra.mxu0 %v13071_v16  ;;  %9566 = vmatpush1.bf16.msra.mxu1 %v13074_v18  ;;  %v13143_v16 = vld [vmem:[%s13585_s26 + $0x1260] ss:$80 sps:$4 sm:$0xff]   ;;  %v13146_v18 = vld [vmem:[%s13585_s26 + $0x1268] ss:$80 sps:$4 sm:$0xff]  }
 0x48c   : > { %9403 = vmatprep.subr.bf16.mxu0 %v13079_v19  ;;  %9567 = vmatprep.subr.bf16.mxu1 %v13082_v21  ;;  %v13151_v19 = vld [vmem:[%s13585_s26 + $0x1304] ss:$80 sps:$4 sm:$0xff]   ;;  %v13154_v21 = vld [vmem:[%s13585_s26 + $0x130c] ss:$80 sps:$4 sm:$0xff]  }
 0x48f   : > { %9404 = vmatpush1.bf16.msra.mxu0 %v13077_v13  ;;  %9568 = vmatpush1.bf16.msra.mxu1 %v13080_v22  ;;  %v13149_v13 = vld [vmem:[%s13585_s26 + $0x1300] ss:$80 sps:$4 sm:$0xff]   ;;  %v13152_v22 = vld [vmem:[%s13585_s26 + $0x1308] ss:$80 sps:$4 sm:$0xff]  }
 0x490   : > { %9405 = vmatprep.subr.bf16.mxu0 %v13085_v23  ;;  %9569 = vmatprep.subr.bf16.mxu1 %v13088_v24  ;;  %v13157_v23 = vld [vmem:[%s13585_s26 + $0x13a4] ss:$80 sps:$4 sm:$0xff]   ;;  %v13160_v24 = vld [vmem:[%s13585_s26 + $0x13ac] ss:$80 sps:$4 sm:$0xff]  }
 0x493   : > { %9406 = vmatpush1.bf16.msra.mxu0 %v13083_v25  ;;  %9570 = vmatpush1.bf16.msra.mxu1 %v13086_v27  ;;  %v13155_v25 = vld [vmem:[%s13585_s26 + $0x13a0] ss:$80 sps:$4 sm:$0xff]   ;;  %v13158_v27 = vld [vmem:[%s13585_s26 + $0x13a8] ss:$80 sps:$4 sm:$0xff]  }
 0x494   : > { %9407 = vmatprep.subr.bf16.mxu0 %v13091_v17  ;;  %9571 = vmatprep.subr.bf16.mxu1 %v13094_v29  ;;  %v13163_v17 = vld [vmem:[%s13585_s26 + $0x1444] ss:$80 sps:$4 sm:$0xff]   ;;  %v13166_v29 = vld [vmem:[%s13585_s26 + $0x144c] ss:$80 sps:$4 sm:$0xff]  }
 0x497   : > { %9408 = vmatpush1.bf16.msra.mxu0 %v13089_v30  ;;  %9572 = vmatpush1.bf16.msra.mxu1 %v13092_v31  ;;  %v13161_v30 = vld [vmem:[%s13585_s26 + $0x1440] ss:$80 sps:$4 sm:$0xff]   ;;  %v13164_v31 = vld [vmem:[%s13585_s26 + $0x1448] ss:$80 sps:$4 sm:$0xff]  }
 0x498   : > { %9409 = vmatprep.subr.bf16.mxu0 %v13097_v49  ;;  %9573 = vmatprep.subr.bf16.mxu1 %v13100_v34  ;;  %v13169_v49 = vld [vmem:[%s13585_s26 + $0x14e4] ss:$80 sps:$4 sm:$0xff]   ;;  %v13172_v34 = vld [vmem:[%s13585_s26 + $0x14ec] ss:$80 sps:$4 sm:$0xff]  }
 0x49b   : > { %9410 = vmatpush1.bf16.msra.mxu0 %v13095_v35  ;;  %9574 = vmatpush1.bf16.msra.mxu1 %v13098_v40  ;;  %v13167_v35 = vld [vmem:[%s13585_s26 + $0x14e0] ss:$80 sps:$4 sm:$0xff]   ;;  %v13170_v40 = vld [vmem:[%s13585_s26 + $0x14e8] ss:$80 sps:$4 sm:$0xff]  }
 0x49c   : > { %9411 = vmatprep.subr.bf16.mxu0 %v13103_v37  ;;  %9575 = vmatprep.subr.bf16.mxu1 %v13106_v42  ;;  %v13175_v37 = vld [vmem:[%s13585_s26 + $0x1584] ss:$80 sps:$4 sm:$0xff]   ;;  %v13178_v42 = vld [vmem:[%s13585_s26 + $0x158c] ss:$80 sps:$4 sm:$0xff]  }
 0x49f   : > { %9412 = vmatpush1.bf16.msra.mxu0 %v13101_v43  ;;  %9576 = vmatpush1.bf16.msra.mxu1 %v13104_v44  ;;  %v13176_v43 = vld [vmem:[%s13585_s26 + $0x1588] ss:$80 sps:$4 sm:$0xff]   ;;  %v13181_v44 = vld [vmem:[%s13585_s26 + $0x1624] ss:$80 sps:$4 sm:$0xff]  }
 0x4a0   : > { %9413 = vmatprep.subr.bf16.mxu0 %v13109_v45  ;;  %9577 = vmatprep.subr.bf16.mxu1 %v13112_v47  ;;  %v13184_v45 = vld [vmem:[%s13585_s26 + $0x162c] ss:$80 sps:$4 sm:$0xff]   ;;  %v13179_v47 = vld [vmem:[%s13585_s26 + $0x1620] ss:$80 sps:$4 sm:$0xff]  }
 0x4a3   : > { %9414 = vmatpush1.bf16.msra.mxu0 %v13107_v48  ;;  %9578 = vmatpush1.bf16.msra.mxu1 %v13110_v51  ;;  %v13182_v48 = vld [vmem:[%s13585_s26 + $0x1628] ss:$80 sps:$4 sm:$0xff]   ;;  %v13190_v51 = vld [vmem:[%s13585_s26 + $0x16cc] ss:$80 sps:$4 sm:$0xff]  }
 0x4a4   : > { %9415 = vmatprep.subr.bf16.mxu0 %v13115_v52  ;;  %9579 = vmatprep.subr.bf16.mxu1 %v13118_v53  ;;  %v13185_v52 = vld [vmem:[%s13585_s26 + $0x16c0] ss:$80 sps:$4 sm:$0xff]   ;;  %v13188_v53 = vld [vmem:[%s13585_s26 + $0x16c8] ss:$80 sps:$4 sm:$0xff]  }
 0x4a7   : > { %9416 = vmatpush1.bf16.msra.mxu0 %v13113_v56  ;;  %9580 = vmatpush1.bf16.msra.mxu1 %v13116_v57  ;;  %v13193_v56 = vld [vmem:[%s13585_s26 + $0x1764] ss:$80 sps:$4 sm:$0xff]   ;;  %v13196_v57 = vld [vmem:[%s13585_s26 + $0x176c] ss:$80 sps:$4 sm:$0xff]  }
 0x4a8   : > { %9417 = vmatprep.subr.bf16.mxu0 %v13121_v58  ;;  %9581 = vmatprep.subr.bf16.mxu1 %v13124_v59  ;;  %v13191_v58 = vld [vmem:[%s13585_s26 + $0x1760] ss:$80 sps:$4 sm:$0xff]   ;;  %v13194_v59 = vld [vmem:[%s13585_s26 + $0x1768] ss:$80 sps:$4 sm:$0xff]  }
 0x4ab   : > { %9418 = vmatpush1.bf16.msra.mxu0 %v13119_v60  ;;  %9582 = vmatpush1.bf16.msra.mxu1 %v13122_v61  ;;  %v13199_v60 = vld [vmem:[%s13585_s26 + $0x1804] ss:$80 sps:$4 sm:$0xff]   ;;  %v13202_v61 = vld [vmem:[%s13585_s26 + $0x180c] ss:$80 sps:$4 sm:$0xff]  }
 0x4ac   : > { %9419 = vmatprep.subr.bf16.mxu0 %v13127_v63  ;;  %9583 = vmatprep.subr.bf16.mxu1 %v13130_v0  ;;  %v13197_v63 = vld [vmem:[%s13585_s26 + $0x1800] ss:$80 sps:$4 sm:$0xff]   ;;  %v13200_v0 = vld [vmem:[%s13585_s26 + $0x1808] ss:$80 sps:$4 sm:$0xff]  }
 0x4af   : > { %9420 = vmatpush1.bf16.msra.mxu0 %v13125_v2  ;;  %9584 = vmatpush1.bf16.msra.mxu1 %v13128_v3  ;;  %v13205_v2 = vld [vmem:[%s13585_s26 + $0x18a4] ss:$80 sps:$4 sm:$0xff]   ;;  %v13208_v3 = vld [vmem:[%s13585_s26 + $0x18ac] ss:$80 sps:$4 sm:$0xff]  }
 0x4b0   : > { %9421 = vmatprep.subr.bf16.mxu0 %v13133_v4  ;;  %9585 = vmatprep.subr.bf16.mxu1 %v13136_v7  ;;  %v13203_v4 = vld [vmem:[%s13585_s26 + $0x18a0] ss:$80 sps:$4 sm:$0xff]   ;;  %v13206_v7 = vld [vmem:[%s13585_s26 + $0x18a8] ss:$80 sps:$4 sm:$0xff]  }
 0x4b3   : > { %9422 = vmatpush1.bf16.msra.mxu0 %v13131_v55  ;;  %9586 = vmatpush1.bf16.msra.mxu1 %v13134_v8  ;;  %v13211_v55 = vld [vmem:[%s13585_s26 + $0x1944] ss:$80 sps:$4 sm:$0xff]   ;;  %v13214_v8 = vld [vmem:[%s13585_s26 + $0x194c] ss:$80 sps:$4 sm:$0xff]  }
 0x4b4   : > { %9423 = vmatprep.subr.bf16.mxu0 %v13139_v39  ;;  %9587 = vmatprep.subr.bf16.mxu1 %v13142_v10  ;;  %v13209_v39 = vld [vmem:[%s13585_s26 + $0x1940] ss:$80 sps:$4 sm:$0xff]   ;;  %v13212_v10 = vld [vmem:[%s13585_s26 + $0x1948] ss:$80 sps:$4 sm:$0xff]  }
 0x4b7   : > { %9424 = vmatpush1.bf16.msra.mxu0 %v13137_v11  ;;  %9588 = vmatpush1.bf16.msra.mxu1 %v13140_v41  ;;  %v13217_v11 = vld [vmem:[%s13585_s26 + $0x19e4] ss:$80 sps:$4 sm:$0xff]   ;;  %v13220_v41 = vld [vmem:[%s13585_s26 + $0x19ec] ss:$80 sps:$4 sm:$0xff]  }
 0x4b8   : > { %9425 = vmatprep.subr.bf16.mxu0 %v13145_v12  ;;  %9589 = vmatprep.subr.bf16.mxu1 %v13148_v14  ;;  %v13215_v12 = vld [vmem:[%s13585_s26 + $0x19e0] ss:$80 sps:$4 sm:$0xff]   ;;  %v13218_v14 = vld [vmem:[%s13585_s26 + $0x19e8] ss:$80 sps:$4 sm:$0xff]  }
 0x4bb   : > { %9426 = vmatpush1.bf16.msra.mxu0 %v13143_v16  ;;  %9590 = vmatpush1.bf16.msra.mxu1 %v13146_v18  ;;  %v13223_v16 = vld [vmem:[%s13585_s26 + $0x1a84] ss:$80 sps:$4 sm:$0xff]   ;;  %v13226_v18 = vld [vmem:[%s13585_s26 + $0x1a8c] ss:$80 sps:$4 sm:$0xff]  }
 0x4bc   : > { %9427 = vmatprep.subr.bf16.mxu0 %v13151_v19  ;;  %9591 = vmatprep.subr.bf16.mxu1 %v13154_v21  ;;  %v13221_v19 = vld [vmem:[%s13585_s26 + $0x1a80] ss:$80 sps:$4 sm:$0xff]   ;;  %v13224_v21 = vld [vmem:[%s13585_s26 + $0x1a88] ss:$80 sps:$4 sm:$0xff]  }
 0x4bf   : > { %9428 = vmatpush1.bf16.msra.mxu0 %v13149_v13  ;;  %9592 = vmatpush1.bf16.msra.mxu1 %v13152_v22  ;;  %v13229_v13 = vld [vmem:[%s13585_s26 + $0x1b24] ss:$80 sps:$4 sm:$0xff]   ;;  %v13232_v22 = vld [vmem:[%s13585_s26 + $0x1b2c] ss:$80 sps:$4 sm:$0xff]  }
 0x4c0   : > { %9429 = vmatprep.subr.bf16.mxu0 %v13157_v23  ;;  %9593 = vmatprep.subr.bf16.mxu1 %v13160_v24  ;;  %v13227_v23 = vld [vmem:[%s13585_s26 + $0x1b20] ss:$80 sps:$4 sm:$0xff]   ;;  %v13230_v24 = vld [vmem:[%s13585_s26 + $0x1b28] ss:$80 sps:$4 sm:$0xff]  }
 0x4c3   : > { %9430 = vmatpush1.bf16.msra.mxu0 %v13155_v25  ;;  %9594 = vmatpush1.bf16.msra.mxu1 %v13158_v27  ;;  %v13235_v25 = vld [vmem:[%s13585_s26 + $0x1bc4] ss:$80 sps:$4 sm:$0xff]   ;;  %v13238_v27 = vld [vmem:[%s13585_s26 + $0x1bcc] ss:$80 sps:$4 sm:$0xff]  }
 0x4c4   : > { %9440 = vmatprep.subr.bf16.mxu0 %v13163_v17  ;;  %9604 = vmatprep.subr.bf16.mxu1 %v13166_v29  ;;  %v13233_v17 = vld [vmem:[%s13585_s26 + $0x1bc0] ss:$80 sps:$4 sm:$0xff]   ;;  %v13236_v29 = vld [vmem:[%s13585_s26 + $0x1bc8] ss:$80 sps:$4 sm:$0xff]  }
 0x4c6   : > { %9432 = vmatmul.mubr.bf16.vlgmr.msra.gmra.mrb[16].mxu0 %v13767_v28  ;;  %9596 = vmatmul.mubr.bf16.vlgmr.msra.gmra.mrb[16].mxu1 %v13767_v28  ;;  %v13173_v28 = vld [vmem:[%s13585_s26 + $0x1580] ss:$80 sps:$4 sm:$0xff]  }
 0x4c7   : > { %9441 = vmatpush1.bf16.msra.mxu0 %v13161_v30  ;;  %9605 = vmatpush1.bf16.msra.mxu1 %v13164_v31  ;;  %v13241_v30 = vld [vmem:[%s13585_s26 + $0x1c64] ss:$80 sps:$4 sm:$0xff]   ;;  %v13244_v31 = vld [vmem:[%s13585_s26 + $0x1c6c] ss:$80 sps:$4 sm:$0xff]  }
 0x4c8   : > { %9442 = vmatprep.subr.bf16.mxu0 %v13169_v49  ;;  %9606 = vmatprep.subr.bf16.mxu1 %v13172_v34  ;;  %v13239_v49 = vld [vmem:[%s13585_s26 + $0x1c60] ss:$80 sps:$4 sm:$0xff]   ;;  %v13242_v34 = vld [vmem:[%s13585_s26 + $0x1c68] ss:$80 sps:$4 sm:$0xff]  }
 0x4c9   : > { %9472 = vmatprep.mubr.bf16.mxu0 %v13772_v32  ;;  %9636 = vmatprep.mubr.bf16.mxu1 %v13772_v32  ;;  %v13187_v32 = vld [vmem:[%s13585_s26 + $0x16c4] ss:$80 sps:$4 sm:$0xff]  }
 0x4cb   : > { %9443 = vmatpush1.bf16.msra.mxu0 %v13167_v35  ;;  %9607 = vmatpush1.bf16.msra.mxu1 %v13170_v40  ;;  %v13247_v35 = vld [vmem:[%s13585_s26 + $0x1d04] ss:$80 sps:$4 sm:$0xff]   ;;  %v13250_v40 = vld [vmem:[%s13585_s26 + $0x1d0c] ss:$80 sps:$4 sm:$0xff]  }
 0x4cc   : > { %9444 = vmatprep.subr.bf16.mxu0 %v13175_v37  ;;  %9608 = vmatprep.subr.bf16.mxu1 %v13178_v42  ;;  %v13245_v37 = vld [vmem:[%s13585_s26 + $0x1d00] ss:$80 sps:$4 sm:$0xff]   ;;  %v13248_v42 = vld [vmem:[%s13585_s26 + $0x1d08] ss:$80 sps:$4 sm:$0xff]  }
 0x4cf   : > { %9445 = vmatpush1.bf16.msra.mxu0 %v13173_v28  ;;  %9609 = vmatpush1.bf16.msra.mxu1 %v13176_v43  ;;  %v13253_v28 = vld [vmem:[%s13585_s26 + $0x1da4] ss:$80 sps:$4 sm:$0xff]   ;;  %v13256_v43 = vld [vmem:[%s13585_s26 + $0x1dac] ss:$80 sps:$4 sm:$0xff]  }
 0x4d0   : > { %9446 = vmatprep.subr.bf16.mxu0 %v13181_v44  ;;  %9610 = vmatprep.subr.bf16.mxu1 %v13184_v45  ;;  %v13251_v44 = vld [vmem:[%s13585_s26 + $0x1da0] ss:$80 sps:$4 sm:$0xff]   ;;  %v13254_v45 = vld [vmem:[%s13585_s26 + $0x1da8] ss:$80 sps:$4 sm:$0xff]  }
 0x4d3   : > { %9447 = vmatpush1.bf16.msra.mxu0 %v13179_v47  ;;  %9611 = vmatpush1.bf16.msra.mxu1 %v13182_v48  ;;  %v13259_v47 = vld [vmem:[%s13585_s26 + $0x1e44] ss:$80 sps:$4 sm:$0xff]   ;;  %v13262_v48 = vld [vmem:[%s13585_s26 + $0x1e4c] ss:$80 sps:$4 sm:$0xff]  }
 0x4d4   : > { %9448 = vmatprep.subr.bf16.mxu0 %v13187_v32  ;;  %9612 = vmatprep.subr.bf16.mxu1 %v13190_v51  ;;  %v13257_v32 = vld [vmem:[%s13585_s26 + $0x1e40] ss:$80 sps:$4 sm:$0xff]   ;;  %v13260_v51 = vld [vmem:[%s13585_s26 + $0x1e48] ss:$80 sps:$4 sm:$0xff]  }
 0x4d7   : > { %9449 = vmatpush1.bf16.msra.mxu0 %v13185_v52  ;;  %9613 = vmatpush1.bf16.msra.mxu1 %v13188_v53  ;;  %v13265_v52 = vld [vmem:[%s13585_s26 + $0x1ee4] ss:$80 sps:$4 sm:$0xff]   ;;  %v13268_v53 = vld [vmem:[%s13585_s26 + $0x1eec] ss:$80 sps:$4 sm:$0xff]  }
 0x4d8   : > { %9450 = vmatprep.subr.bf16.mxu0 %v13193_v56  ;;  %9614 = vmatprep.subr.bf16.mxu1 %v13196_v57  ;;  %v13263_v56 = vld [vmem:[%s13585_s26 + $0x1ee0] ss:$80 sps:$4 sm:$0xff]   ;;  %v13266_v57 = vld [vmem:[%s13585_s26 + $0x1ee8] ss:$80 sps:$4 sm:$0xff]  }
 0x4db   : > { %9451 = vmatpush1.bf16.msra.mxu0 %v13191_v58  ;;  %9615 = vmatpush1.bf16.msra.mxu1 %v13194_v59  ;;  %v13271_v58 = vld [vmem:[%s13585_s26 + $0x1f84] ss:$80 sps:$4 sm:$0xff]   ;;  %v13274_v59 = vld [vmem:[%s13585_s26 + $0x1f8c] ss:$80 sps:$4 sm:$0xff]  }
 0x4dc   : > { %9452 = vmatprep.subr.bf16.mxu0 %v13199_v60  ;;  %9616 = vmatprep.subr.bf16.mxu1 %v13202_v61  ;;  %v13272_v60 = vld [vmem:[%s13585_s26 + $0x1f88] ss:$80 sps:$4 sm:$0xff]   ;;  %v13277_v61 = vld [vmem:[%s13585_s26 + $0x2024] ss:$80 sps:$4 sm:$0xff]  }
 0x4df   : > { %9453 = vmatpush1.bf16.msra.mxu0 %v13197_v63  ;;  %9617 = vmatpush1.bf16.msra.mxu1 %v13200_v0  ;;  %v13280_v63 = vld [vmem:[%s13585_s26 + $0x202c] ss:$80 sps:$4 sm:$0xff]   ;;  %v13275_v0 = vld [vmem:[%s13585_s26 + $0x2020] ss:$80 sps:$4 sm:$0xff]  }
 0x4e0   : > { %9454 = vmatprep.subr.bf16.mxu0 %v13205_v2  ;;  %9618 = vmatprep.subr.bf16.mxu1 %v13208_v3  ;;  %v13278_v2 = vld [vmem:[%s13585_s26 + $0x2028] ss:$80 sps:$4 sm:$0xff]   ;;  %v13286_v3 = vld [vmem:[%s13585_s26 + $0x20cc] ss:$80 sps:$4 sm:$0xff]  }
 0x4e3   : > { %9455 = vmatpush1.bf16.msra.mxu0 %v13203_v4  ;;  %9619 = vmatpush1.bf16.msra.mxu1 %v13206_v7  ;;  %v13281_v4 = vld [vmem:[%s13585_s26 + $0x20c0] ss:$80 sps:$4 sm:$0xff]   ;;  %v13284_v7 = vld [vmem:[%s13585_s26 + $0x20c8] ss:$80 sps:$4 sm:$0xff]  }
 0x4e4   : > { %9456 = vmatprep.subr.bf16.mxu0 %v13211_v55  ;;  %9620 = vmatprep.subr.bf16.mxu1 %v13214_v8  ;;  %v13289_v55 = vld [vmem:[%s13585_s26 + $0x2164] ss:$80 sps:$4 sm:$0xff]   ;;  %v13292_v8 = vld [vmem:[%s13585_s26 + $0x216c] ss:$80 sps:$4 sm:$0xff]  }
 0x4e7   : > { %9457 = vmatpush1.bf16.msra.mxu0 %v13209_v39  ;;  %9621 = vmatpush1.bf16.msra.mxu1 %v13212_v10  ;;  %v13355_v39 = vld [vmem:[%s14160_s30 + $0x8] sm:$0xff] }
 0x4e8   : > { %9458 = vmatprep.subr.bf16.mxu0 %v13217_v11  ;;  %9622 = vmatprep.subr.bf16.mxu1 %v13220_v41  ;;  %v7997_v10 = vrot.slane %v13355_v39, %v13832_v33  ;;  %v8005_v11 = vrot.slane %v13355_v39, %v13919_v62  ;;  %v8001_v41 = vrot.slane %v13355_v39, %v13756_v20 }
 0x4eb   : > { %9459 = vmatpush1.bf16.msra.mxu0 %v13215_v12  ;;  %9623 = vmatpush1.bf16.msra.mxu1 %v13218_v14  ;;  %v8009_v12 = vrot.slane %v13355_v39, %v13838_v38  ;;  %v13287_v14 = vld [vmem:[%s13585_s26 + $0x2160] ss:$80 sps:$4 sm:$0xff]  }
 0x4ec   : > { %9460 = vmatprep.subr.bf16.mxu0 %v13223_v16  ;;  %9624 = vmatprep.subr.bf16.mxu1 %v13226_v18  ;;  %v13290_v16 = vld [vmem:[%s13585_s26 + $0x2168] ss:$80 sps:$4 sm:$0xff]   ;;  %v13295_v18 = vld [vmem:[%s13585_s26 + $0x2204] ss:$80 sps:$4 sm:$0xff]   ;;  %v13329_v39 = vld [vmem:[%s13585_s26 + $0x25c0] ss:$80 sps:$4 sm:$0xff]  }
 0x4ef   : > { %9461 = vmatpush1.bf16.msra.mxu0 %v13221_v19  ;;  %9625 = vmatpush1.bf16.msra.mxu1 %v13224_v21  ;;  %v13298_v19 = vld [vmem:[%s13585_s26 + $0x220c] ss:$80 sps:$4 sm:$0xff]  }
 0x4f0   : > { %9462 = vmatprep.subr.bf16.mxu0 %v13229_v13  ;;  %9626 = vmatprep.subr.bf16.mxu1 %v13232_v22 }
 0x4f3   : > { %9463 = vmatpush1.bf16.msra.mxu0 %v13227_v23  ;;  %9627 = vmatpush1.bf16.msra.mxu1 %v13230_v24  ;;  %v13293_v24 = vld [vmem:[%s13585_s26 + $0x2200] ss:$80 sps:$4 sm:$0xff]  }
 0x4f4   : > { %9464 = vmatprep.subr.bf16.mxu0 %v13235_v25  ;;  %9628 = vmatprep.subr.bf16.mxu1 %v13238_v27 }
 0x4f7   : > { %9465 = vmatpush1.bf16.msra.mxu0 %v13233_v17  ;;  %9629 = vmatpush1.bf16.msra.mxu1 %v13236_v29  ;;  %v13296_v17 = vld [vmem:[%s13585_s26 + $0x2208] ss:$80 sps:$4 sm:$0xff]   ;;  %v13301_v29 = vld [vmem:[%s13585_s26 + $0x22a4] ss:$80 sps:$4 sm:$0xff]  }
 0x4f8   : > { %9466 = vmatprep.subr.bf16.mxu0 %v13241_v30  ;;  %9630 = vmatprep.subr.bf16.mxu1 %v13244_v31 }
 0x4fb   : > { %9467 = vmatpush1.bf16.msra.mxu0 %v13239_v49  ;;  %9631 = vmatpush1.bf16.msra.mxu1 %v13242_v34 }
 0x4fc   : > { %9468 = vmatprep.subr.bf16.mxu0 %v13247_v35  ;;  %9632 = vmatprep.subr.bf16.mxu1 %v13250_v40  ;;  %v13304_v35 = vld [vmem:[%s13585_s26 + $0x22ac] ss:$80 sps:$4 sm:$0xff]  }
 0x4ff   : > { %9469 = vmatpush1.bf16.msra.mxu0 %v13245_v37  ;;  %9633 = vmatpush1.bf16.msra.mxu1 %v13248_v42 }
 0x500   : > { %9470 = vmatprep.subr.bf16.mxu0 %v13253_v28  ;;  %9634 = vmatprep.subr.bf16.mxu1 %v13256_v43  ;;  %v13299_v43 = vld [vmem:[%s13585_s26 + $0x22a0] ss:$80 sps:$4 sm:$0xff]  }
 0x503   : > { %9471 = vmatpush1.bf16.msra.mxu0 %v13251_v44  ;;  %9635 = vmatpush1.bf16.msra.mxu1 %v13254_v45  ;;  %v13302_v44 = vld [vmem:[%s13585_s26 + $0x22a8] ss:$80 sps:$4 sm:$0xff]   ;;  %v13307_v45 = vld [vmem:[%s13585_s26 + $0x2344] ss:$80 sps:$4 sm:$0xff]  }
 0x504   : > { %9481 = vmatprep.subr.bf16.mxu0 %v13259_v47  ;;  %9645 = vmatprep.subr.bf16.mxu1 %v13262_v48  ;;  %v13310_v47 = vld [vmem:[%s13585_s26 + $0x234c] ss:$80 sps:$4 sm:$0xff]  }
 0x506   : > { %9473 = vmatmul.mubr.bf16.vlgmr.msra.gmra.mrb[16].mxu0 %v13854_v50  ;;  %9637 = vmatmul.mubr.bf16.vlgmr.msra.gmra.mrb[16].mxu1 %v13854_v50  ;;  %v13269_v50 = vld [vmem:[%s13585_s26 + $0x1f80] ss:$80 sps:$4 sm:$0xff]  }
 0x507   : > { %9482 = vmatpush1.bf16.msra.mxu0 %v13257_v32  ;;  %9646 = vmatpush1.bf16.msra.mxu1 %v13260_v51 }
 0x508   : > { %9483 = vmatprep.subr.bf16.mxu0 %v13265_v52  ;;  %9647 = vmatprep.subr.bf16.mxu1 %v13268_v53  ;;  %v13305_v52 = vld [vmem:[%s13585_s26 + $0x2340] ss:$80 sps:$4 sm:$0xff]   ;;  %v13308_v53 = vld [vmem:[%s13585_s26 + $0x2348] ss:$80 sps:$4 sm:$0xff]  }
 0x509   : > { %9513 = vmatprep.mubr.bf16.mxu0 %v13859_v54  ;;  %9677 = vmatprep.mubr.bf16.mxu1 %v13859_v54  ;;  %v13283_v54 = vld [vmem:[%s13585_s26 + $0x20c4] ss:$80 sps:$4 sm:$0xff]  }
 0x50b   : > { %9484 = vmatpush1.bf16.msra.mxu0 %v13263_v56  ;;  %9648 = vmatpush1.bf16.msra.mxu1 %v13266_v57  ;;  %v13313_v56 = vld [vmem:[%s13585_s26 + $0x23e4] ss:$80 sps:$4 sm:$0xff]   ;;  %v13316_v57 = vld [vmem:[%s13585_s26 + $0x23ec] ss:$80 sps:$4 sm:$0xff]  }
 0x50c   : > { %9485 = vmatprep.subr.bf16.mxu0 %v13271_v58  ;;  %9649 = vmatprep.subr.bf16.mxu1 %v13274_v59  ;;  %v9815_v58 = vrot.slane %v14755_v6, %v14180_v26  ;;  %v13317_v6 = vld [vmem:[%s13585_s26 + $0x2480] ss:$80 sps:$4 sm:$0xff]  }
 0x50f   : > { %9486 = vmatpush1.bf16.msra.mxu0 %v13269_v50  ;;  %9650 = vmatpush1.bf16.msra.mxu1 %v13272_v60  ;;  %v13311_v60 = vld [vmem:[%s13585_s26 + $0x23e0] ss:$80 sps:$4 sm:$0xff]  }
 0x510   : > { %9487 = vmatprep.subr.bf16.mxu0 %v13277_v61  ;;  %9651 = vmatprep.subr.bf16.mxu1 %v13280_v63  ;;  %v13314_v61 = vld [vmem:[%s13585_s26 + $0x23e8] ss:$80 sps:$4 sm:$0xff]   ;;  %v13319_v63 = vld [vmem:[%s13585_s26 + $0x2484] ss:$80 sps:$4 sm:$0xff]  }
 0x513   : > { %9488 = vmatpush1.bf16.msra.mxu0 %v13275_v0  ;;  %9652 = vmatpush1.bf16.msra.mxu1 %v13278_v2  ;;  %v13322_v0 = vld [vmem:[%s13585_s26 + $0x248c] ss:$80 sps:$4 sm:$0xff]   ;;  %v13320_v2 = vld [vmem:[%s13585_s26 + $0x2488] ss:$80 sps:$4 sm:$0xff]  }
 0x514   : > { %9489 = vmatprep.subr.bf16.mxu0 %v13283_v54  ;;  %9653 = vmatprep.subr.bf16.mxu1 %v13286_v3  ;;  %v13325_v54 = vld [vmem:[%s13585_s26 + $0x2524] ss:$80 sps:$4 sm:$0xff]   ;;  %v13328_v3 = vld [vmem:[%s13585_s26 + $0x252c] ss:$80 sps:$4 sm:$0xff]  }
 0x517   : > { %9490 = vmatpush1.bf16.msra.mxu0 %v13281_v4  ;;  %9654 = vmatpush1.bf16.msra.mxu1 %v13284_v7  ;;  %v13323_v4 = vld [vmem:[%s13585_s26 + $0x2520] ss:$80 sps:$4 sm:$0xff]   ;;  %v13326_v7 = vld [vmem:[%s13585_s26 + $0x2528] ss:$80 sps:$4 sm:$0xff]  }
 0x518   : > { %9491 = vmatprep.subr.bf16.mxu0 %v13289_v55  ;;  %9655 = vmatprep.subr.bf16.mxu1 %v13292_v8  ;;  %v13331_v55 = vld [vmem:[%s13585_s26 + $0x25c4] ss:$80 sps:$4 sm:$0xff]   ;;  %v13334_v8 = vld [vmem:[%s13585_s26 + $0x25cc] ss:$80 sps:$4 sm:$0xff]  }
 0x519   : > { %v9187_v21 = vpop.f32.mrb[12].mxu0  ;;  %v9351_v13 = vpop.f32.mrb[12].mxu1 }
 0x51a   : > { %v11260_v33 = vadd.f32 %v9187_v21, %v7997_v10  ;;  %v11262_v22 = vadd.f32 %v9351_v13, %v8005_v11  ;;  %v9189_v62 = vpop.f32.mrb[13].mxu0  ;;  %v9353_v23 = vpop.f32.mrb[13].mxu1  ;;  %v13332_v10 = vld [vmem:[%s13585_s26 + $0x25c8] ss:$80 sps:$4 sm:$0xff]   ;;  %v13337_v11 = vld [vmem:[%s13585_s26 + $0x2664] ss:$80 sps:$4 sm:$0xff]  }
 0x51b   : > { %v11261_v25 = vadd.f32 %v9189_v62, %v8001_v41  ;;  %v11263_v20 = vadd.f32 %v9353_v23, %v8009_v12  ;;  %v9191_v27 = vpop.f32.mrb[14].mxu0  ;;  %v9355_v38 = vpop.f32.mrb[14].mxu1  ;;  %9492 = vmatpush1.bf16.msra.mxu0 %v13287_v14  ;;  %9656 = vmatpush1.bf16.msra.mxu1 %v13290_v16  ;;  %v13340_v41 = vld [vmem:[%s13585_s26 + $0x266c] ss:$80 sps:$4 sm:$0xff]   ;;  %v13335_v12 = vld [vmem:[%s13585_s26 + $0x2660] ss:$80 sps:$4 sm:$0xff]  }
 0x51c   : > { %v9698_v30 = vmax.f32 %v11260_v33, 0.0  ;;  %v9700_v31 = vmax.f32 %v11262_v22, 0.0  ;;  %v9192_v49 = vpop.f32.mrb[15].mxu0  ;;  %v9356_v34 = vpop.f32.mrb[15].mxu1  ;;  %9493 = vmatprep.subr.bf16.mxu0 %v13295_v18  ;;  %9657 = vmatprep.subr.bf16.mxu1 %v13298_v19  ;;  %v13338_v14 = vld [vmem:[%s13585_s26 + $0x2668] ss:$80 sps:$4 sm:$0xff]  }
 0x51d   : > { %v9699_v40 = vmax.f32 %v11261_v25, 0.0  ;;  %v9701_v37 = vmax.f32 %v11263_v20, 0.0  ;;  %v13343_v16 = vld [vmem:[%s13585_s26 + $0x2704] ss:$80 sps:$4 sm:$0xff]   ;;  %v13346_v18 = vld [vmem:[%s13585_s26 + $0x270c] ss:$80 sps:$4 sm:$0xff]  }
 0x51e   : > { %v13341_v19 = vld [vmem:[%s13585_s26 + $0x2700] ss:$80 sps:$4 sm:$0xff]   ;;  %v13344_v21 = vld [vmem:[%s13585_s26 + $0x2708] ss:$80 sps:$4 sm:$0xff]   ;;  %v13349_v13 = vld [vmem:[%s13585_s26 + $0x27a4] ss:$80 sps:$4 sm:$0xff]  }
 0x51f   : > { %v9777_v42 = vcombine.low %v9698_v30, %v9699_v40  ;;  %v9778_v28 = vcombine.low %v9700_v31, %v9701_v37  ;;  %9494 = vmatpush1.bf16.msra.mxu0 %v13293_v24  ;;  %9658 = vmatpush1.bf16.msra.mxu1 %v13296_v17  ;;  %v13352_v33 = vld [vmem:[%s13585_s26 + $0x27ac] ss:$80 sps:$4 sm:$0xff]   ;;  %v13347_v22 = vld [vmem:[%s13585_s26 + $0x27a0] ss:$80 sps:$4 sm:$0xff]   ;;  %v13350_v62 = vld [vmem:[%s13585_s26 + $0x27a8] ss:$80 sps:$4 sm:$0xff]  }
 0x520   : > { %9495 = vmatprep.subr.bf16.mxu0 %v13301_v29  ;;  %9659 = vmatprep.subr.bf16.mxu1 %v13304_v35  ;;  %v1542_v23 = vld [vmem:[%s14160_s30 + $0x10] sm:$0xf] }
 0x521   : > { %v9799_v48 = vrot.slane %v9777_v42, %v14180_v26  ;;  %v9806_v32 = vrot.slane %v9778_v28, %v14180_v26  ;;  %v8013_v24 = vrot.slane %v1542_v23, %v13668_v1  ;;  %v8021_v25 = vrot.slane %v1542_v23, %v13750_v15 }
 0x522   : > { %v8017_v20 = vrot.slane %v1542_v23, %v13639_v46  ;;  %v8025_v27 = vrot.slane %v1542_v23, %v13674_v5 }
 0x523   : > { %v9808_v51 = vcombine.low %v9799_v48, %v9806_v32  ;;  %9496 = vmatpush1.bf16.msra.mxu0 %v13299_v43  ;;  %9660 = vmatpush1.bf16.msra.mxu1 %v13302_v44 }
 0x524   : > { %9497 = vmatprep.subr.bf16.mxu0 %v13307_v45  ;;  %9661 = vmatprep.subr.bf16.mxu1 %v13310_v47 }
 0x525   : > { %v9822_v59 = vrot.slane %v9808_v51, %v14180_v26 }
 0x527   : > { %v9823_v50 = vcombine.low %v9815_v58, %v9822_v59  ;;  %9498 = vmatpush1.bf16.msra.mxu0 %v13305_v52  ;;  %9662 = vmatpush1.bf16.msra.mxu1 %v13308_v53 }
 0x528   : > { %9499 = vmatprep.subr.bf16.mxu0 %v13313_v56  ;;  %9663 = vmatprep.subr.bf16.mxu1 %v13316_v57 }
 0x529   : > { %9852 = vst [vmem:[%s14481_s6 + $0x8] sm:$0xff] %v9823_v50 }
 0x52b   : > { %9500 = vmatpush1.bf16.msra.mxu0 %v13311_v60  ;;  %9664 = vmatpush1.bf16.msra.mxu1 %v13314_v61 }
 0x52c   : > { %9501 = vmatprep.subr.bf16.mxu0 %v13319_v63  ;;  %9665 = vmatprep.subr.bf16.mxu1 %v13322_v0 }
 0x52f   : > { %9502 = vmatpush1.bf16.msra.mxu0 %v13317_v6  ;;  %9666 = vmatpush1.bf16.msra.mxu1 %v13320_v2 }
 0x530   : > { %9503 = vmatprep.subr.bf16.mxu0 %v13325_v54  ;;  %9667 = vmatprep.subr.bf16.mxu1 %v13328_v3 }
 0x533   : > { %9504 = vmatpush1.bf16.msra.mxu0 %v13323_v4  ;;  %9668 = vmatpush1.bf16.msra.mxu1 %v13326_v7 }
 0x534   : > { %9505 = vmatprep.subr.bf16.mxu0 %v13331_v55  ;;  %9669 = vmatprep.subr.bf16.mxu1 %v13334_v8 }
 0x537   : > { %9506 = vmatpush1.bf16.msra.mxu0 %v13329_v39  ;;  %9670 = vmatpush1.bf16.msra.mxu1 %v13332_v10 }
 0x538   : > { %9507 = vmatprep.subr.bf16.mxu0 %v13337_v11  ;;  %9671 = vmatprep.subr.bf16.mxu1 %v13340_v41 }
 0x53b   : > { %9508 = vmatpush1.bf16.msra.mxu0 %v13335_v12  ;;  %9672 = vmatpush1.bf16.msra.mxu1 %v13338_v14 }
 0x53c   : > { %9509 = vmatprep.subr.bf16.mxu0 %v13343_v16  ;;  %9673 = vmatprep.subr.bf16.mxu1 %v13346_v18 }
 0x53f   : > { %9510 = vmatpush1.bf16.msra.mxu0 %v13341_v19  ;;  %9674 = vmatpush1.bf16.msra.mxu1 %v13344_v21 }
 0x540   : > { %9511 = vmatprep.subr.bf16.mxu0 %v13349_v13  ;;  %9675 = vmatprep.subr.bf16.mxu1 %v13352_v33 }
 0x543   : > { %9512 = vmatpush1.bf16.msra.mxu0 %v13347_v22  ;;  %9676 = vmatpush1.bf16.msra.mxu1 %v13350_v62 }
 0x546   : > { %9514 = vmatmul.mubr.bf16.vlgmr.msra.gmra.mrb[16].mxu0 %v13930_v9  ;;  %9678 = vmatmul.mubr.bf16.vlgmr.msra.gmra.mrb[16].mxu1 %v13930_v9 }
 0x619   : > { %v9515_v38 = vpop.f32.mrb[16].mxu0  ;;  %v9679_v17 = vpop.f32.mrb[16].mxu1 }
 0x61a   : > { %v11264_v29 = vadd.f32 %v9515_v38, %v8013_v24  ;;  %v11266_v30 = vadd.f32 %v9679_v17, %v8021_v25  ;;  %v9517_v31 = vpop.f32.mrb[17].mxu0  ;;  %v9681_v49 = vpop.f32.mrb[17].mxu1 }
 0x61b   : > { %v11265_v34 = vadd.f32 %v9517_v31, %v8017_v20  ;;  %v11267_v35 = vadd.f32 %v9681_v49, %v8025_v27  ;;  %v9519_v40 = vpop.f32.mrb[18].mxu0  ;;  %v9683_v9 = vpop.f32.mrb[18].mxu1 }
 0x61c   : > { %v9702_v37 = vmax.f32 %v11264_v29, 0.0  ;;  %v9704_v1 = vmax.f32 %v11266_v30, 0.0  ;;  %v9520_v42 = vpop.f32.mrb[19].mxu0  ;;  %v9684_v15 = vpop.f32.mrb[19].mxu1 }
 0x61d   : > { %v9703_v28 = vmax.f32 %v11265_v34, 0.0  ;;  %v9705_v46 = vmax.f32 %v11267_v35, 0.0 }
 0x61f   : > { %v9824_v43 = vcombine.low %v9702_v37, %v9703_v28  ;;  %v9825_v5 = vcombine.low %v9704_v1, %v9705_v46 }
 0x621   : > { %v9832_v44 = vrot.slane %v9824_v43, %v14180_v26  ;;  %v9839_v45 = vrot.slane %v9825_v5, %v14180_v26  ;;  %9865 = sbr.rel (!%p13521_p9) target bundleno = 1603 (0x643), region = 40 }
 0x623   : > { %v9840_v47 = vcombine.low %v9832_v44, %v9839_v45 }
 0x625   : > { %v9847_v48 = vrot.slane %v9840_v47, %v14180_v26 }
 0x627   : > { %9857 = vst.msk [vmem:[%s14481_s6 + $0x10] sm:$0xf] %vm9855_vm0, %v9847_v48 }
 0x628   : > { %s15153_s17 = smov (!%p9868_p6, %s9867_s17), 20 }
 0x629   : > { %s15086_s20 = sshll.u32 %s15153_s17, 4 }
 0x62a   : > { %s9872_s25 = ssub.s32 320, %s15086_s20 }
 0x62b   : > { %9873 = vsyncadd %s9859_s9, %s9872_s25  ;;  %p11240_p13 = scmp.ne.s32.totalorder %s15086_s20, 0  ;;  %s11247_s23 = smul.u32 320, %s13498_s16 }
 0x62c   : > { %s9878_s26 = sshll.u32 %s14481_s6, 4  ;;  %s13456_s7 = smov [#allocation5]   ;;  %s9879_s26 = int_to_ptr.vmem [resolvable:$true] %s9878_s26 }
 0x62d   : > { %s15097_s29 = scalar_lea.hbm %s15141_s3, %s11247_s23  ;;  %s13384_s4 = scalar_lea.vmem %s9879_s26, %s15086_s20 }
 0x62e   : > { %p13385_p9 = scmp.ne.s32.totalorder %s9879_s26, %s13384_s4  ;;  %s13388_s8 = sshll.u32 %s13456_s7, 4  ;;  %s13389_s8 = int_to_ptr.vmem [resolvable:$false] %s13388_s8 }
 0x62f   : > { %s13390_s11 = scalar_lea.vmem %s13389_s8, 640  ;;  %p13391_p12 = scmp.lt.s32.totalorder %s9879_s26, %s13389_s8 }
 0x630   : > { %p13386_p8 = pnand %p13385_p9, %p11240_p13  ;;  %p13392_p0 = scmp.lt.s32.totalorder %s13390_s11, %s13384_s4 }
 0x632   : > { %p13387_p11 = pneg %p13386_p8  ;;  %p13393_p1 = por %p13392_p0, %p13391_p12 }
 0x634   : > { %p13394_p3 = pnand %p13393_p1, %p13387_p11 }
 0x636   : > { %13397 = shalt.err (!%p13394_p3)
}
 0x637   : > { %s13398_s16 = scalar_lea.hbm %s15097_s29, %s15086_s20  ;;  %s13402_s5 = scalar_lea.hbm %s15141_s3, 2512 }
 0x638   : > { %p13399_p4 = scmp.ne.s32.totalorder %s15097_s29, %s13398_s16  ;;  %p13403_p7 = scmp.lt.u32.totalorder %s15097_s29, %s15141_s3 }
 0x639   : > { %p13404_p10 = scmp.lt.u32.totalorder %s13402_s5, %s13398_s16  ;;  %p13406_p9 = scmp.lt.u32.totalorder %s13398_s16, %s15097_s29 }
 0x63a   : > { %p13400_p5 = pnand %p13399_p4, %p11240_p13 }
 0x63b   : > { %p13405_p6 = por %p13404_p10, %p13403_p7 }
 0x63c   : > { %p13401_p2 = pneg %p13400_p5 }
 0x63d   : > { %p13407_p8 = por %p13406_p9, %p13405_p6 }
 0x63f   : > { %p13408_p11 = pnand %p13407_p8, %p13401_p2 }
 0x641   : > { %13411 = shalt.err (!%p13408_p11)
}
 0x642   : > { %9881 = dma.vmem_to_hbm [thread:$0]  (%p11240_p13), %s9879_s26, %s15086_s20, %s15097_s29, %s9859_s9  }
 0x643 PF: > { %p11397_p12 = scmp.ge.s32.totalorder %s13450_s15, 2  ;;  %s9890_s17 = sand.u32 1, %s13438_s12  }
 0x644   : > { %p15145_p0 = scmp.ne.s32.totalorder %s15144_s24, 0  ;;  %s9891_s25 = scalar_lea.sflag [#allocation4], %s9890_s17 }
 0x646   : > { %p11394_p1 = pnand %p11397_p12, %p15145_p0 }
 0x648   : > { %13433 = dma.done.wait (!%p11394_p1), %s9891_s25, 320  }
 0x649   : > { %13435 = vsyncadd (!%p11394_p1), %s9891_s25, 4294966976  ;;  %p16_p3 = scmp.ge.s32.totalorder %s13502_s18, 10   ;;  %s15146_s12 = smov %s13442_s13 }
 0x64a   : > { %s15147_s13 = smov %s13446_s14  ;;  %s15148_s14 = smov %s13514_s21 }
 0x64b   : > { %s15149_s15 = smov %s13502_s18  ;;  %18 = sbr.rel (!%p16_p3) target bundleno = 5 (0x5), region = 78 }
 0x652   :  { %9896 = vsyncpa [#allocation3], 1 }
 0x653   :  { %9898 = vsyncpa [#allocation3 + $0x1], 1 }
 0x654   :  { %9899 = vsyncpa [#allocation4], 1 }
 0x655   :  { %9901 = vsyncpa [#allocation4 + $0x1], 1 }

</bundles_post_ra>
